<compile_context>
chip_gen: v5e
topology: v5e:2x2
jax: 0.10.0
libtpu: 0.0.40
codegen_flags: <defaults>
</compile_context>

<pallas_src>
import math

import jax
import jax.numpy as jnp
from jax.experimental import pallas as pl
from jax.experimental.pallas import tpu as pltpu

# ----------------------------- configuration --------------------------------
EMBED_DIM = 16      # d_model
HIDDEN_DIM = 32     # dim_feedforward
VOCAB_SIZE = 32
MAX_SEQ_LEN = 8
PADDING_IDX = 0
NHEAD = 2
NLAYERS = 2
BATCH = 2
LN_EPS = 1e-5
NEG = -1e9          # finite "-inf" for masking (avoids NaN/-inf arithmetic)


# ------------------------------ fused kernel --------------------------------
def _fused_forward_kernel(*refs):
    (xs_ref, xt_ref, sp_ref, tp_ref,
     e_wqkv, e_bqkv, e_wo, e_bo, e_g1, e_be1,
     e_w1, e_bf1, e_w2, e_bf2, e_g2, e_be2,
     sa_wqkv, sa_bqkv, sa_wo, sa_bo, d_g1, d_be1,
     ca_wqkv, ca_bqkv, ca_wo, ca_bo, d_g2, d_be2,
     d_w1, d_bf1, d_w2, d_bf2, d_g3, d_be3,
     fc_w, fc_b, o_ref) = refs

    B, S, D = xs_ref.shape
    T = xt_ref.shape[1]
    H = NHEAD
    hd = D // H
    scale = 1.0 / math.sqrt(hd)

    # Residual streams with batch folded into the row dim (rows are b-major).
    x = xs_ref[...].reshape(B * S, D)          # encoder stream [B*S, D]
    y = xt_ref[...].reshape(B * T, D)          # decoder stream [B*T, D]

    src_pad = sp_ref[...] > 0.5                # [B, S] bool, True = pad token
    trg_pad = tp_ref[...] > 0.5                # [B, T]

    # Masks built in-kernel (True = masked out).
    enc_mask = src_pad[:, None, :]                                   # [B,1,S]
    rows = jax.lax.broadcasted_iota(jnp.int32, (T, T), 0)
    cols = jax.lax.broadcasted_iota(jnp.int32, (T, T), 1)
    dec_mask = jnp.logical_or(cols > rows, trg_pad[:, None, :])      # [B,T,T]
    cross_mask = src_pad[:, None, :]                                 # [B,1,S]

    def layer_norm(z, g, b):
        mu = jnp.mean(z, axis=-1, keepdims=True)
        zc = z - mu
        var = jnp.mean(zc * zc, axis=-1, keepdims=True)
        return zc * jax.lax.rsqrt(var + LN_EPS) * g + b

    def softmax(s):
        s = s - jnp.max(s, axis=-1, keepdims=True)
        e = jnp.exp(s)
        return e * pl.reciprocal(jnp.sum(e, axis=-1, keepdims=True), approx=True)

    def mha(xq2, xkv2, nq, nk, mask, wqkv, bqkv, wo, bo, is_self):
        # wqkv: [D, 3D], bqkv: [1, 3D], wo: [D, D], bo: [1, D]
        if is_self:
            qkv = jnp.dot(xq2, wqkv, preferred_element_type=jnp.float32) + bqkv
            q, k, v = qkv[:, :D], qkv[:, D:2 * D], qkv[:, 2 * D:]
        else:  # cross-attention: Q from decoder rows, K/V from encoder memory
            q = jnp.dot(xq2, wqkv[:, :D],
                        preferred_element_type=jnp.float32) + bqkv[:, :D]
            kv = jnp.dot(xkv2, wqkv[:, D:],
                         preferred_element_type=jnp.float32) + bqkv[:, D:]
            k, v = kv[:, :D], kv[:, D:]
        q3 = q.reshape(B, nq, D)
        k3 = k.reshape(B, nk, D)
        v3 = v.reshape(B, nk, D)
        heads = []
        for h in range(H):                      # static unroll, H = 2
            sl = slice(h * hd, (h + 1) * hd)
            s = jnp.einsum('bqd,bkd->bqk', q3[:, :, sl], k3[:, :, sl],
                           preferred_element_type=jnp.float32) * scale
            s = jnp.where(mask, NEG, s)
            p = softmax(s)
            heads.append(jnp.einsum('bqk,bkd->bqd', p, v3[:, :, sl],
                                    preferred_element_type=jnp.float32))
        ctx = jnp.concatenate(heads, axis=-1).reshape(B * nq, D)
        return jnp.dot(ctx, wo, preferred_element_type=jnp.float32) + bo

    def ffn(z, w1, b1, w2, b2):
        h = jnp.maximum(jnp.dot(z, w1, preferred_element_type=jnp.float32) + b1, 0.0)
        return jnp.dot(h, w2, preferred_element_type=jnp.float32) + b2

    # ---- transformer encoder (post-LN, ReLU FFN) ----
    for l in range(NLAYERS):
        a = mha(x, x, S, S, enc_mask, e_wqkv[l], e_bqkv[l], e_wo[l], e_bo[l], True)
        x = layer_norm(x + a, e_g1[l], e_be1[l])
        f = ffn(x, e_w1[l], e_bf1[l], e_w2[l], e_bf2[l])
        x = layer_norm(x + f, e_g2[l], e_be2[l])
    memory = x

    # ---- transformer decoder ----
    for l in range(NLAYERS):
        a = mha(y, y, T, T, dec_mask, sa_wqkv[l], sa_bqkv[l], sa_wo[l], sa_bo[l], True)
        y = layer_norm(y + a, d_g1[l], d_be1[l])
        a = mha(y, memory, T, S, cross_mask,
                ca_wqkv[l], ca_bqkv[l], ca_wo[l], ca_bo[l], False)
        y = layer_norm(y + a, d_g2[l], d_be2[l])
        f = ffn(y, d_w1[l], d_bf1[l], d_w2[l], d_bf2[l])
        y = layer_norm(y + f, d_g3[l], d_be3[l])

    # ---- fc_out + log_softmax ----
    logits = jnp.dot(y, fc_w[...], preferred_element_type=jnp.float32) + fc_b[...]
    m = jnp.max(logits, axis=-1, keepdims=True)
    z = logits - m
    lse = jnp.log(jnp.sum(jnp.exp(z), axis=-1, keepdims=True))
    o_ref[...] = (z - lse).reshape(B, T, VOCAB_SIZE)


# ----------------------------- parameter init -------------------------------
def init_params(key):
    keys = iter(jax.random.split(key, 64))

    def nrm(shape, std=0.05):
        return jax.random.normal(next(keys), shape, jnp.float32) * std

    L, D, Hh, V = NLAYERS, EMBED_DIM, HIDDEN_DIM, VOCAB_SIZE

    def attn_p():   # weights stacked over layers, QKV fused along last dim
        return dict(wqkv=nrm((L, D, 3 * D)), bqkv=nrm((L, 1, 3 * D)),
                    wo=nrm((L, D, D)), bo=nrm((L, 1, D)))

    def ln_p():
        return dict(g=jnp.ones((L, 1, D), jnp.float32),
                    b=jnp.zeros((L, 1, D), jnp.float32))

    def ffn_p():
        return dict(w1=nrm((L, D, Hh)), b1=nrm((L, 1, Hh)),
                    w2=nrm((L, Hh, D)), b2=nrm((L, 1, D)))

    emb = nrm((V, D), 1.0)
    emb = emb.at[PADDING_IDX].set(0.0)   # nn.Embedding zeroes the padding row

    # sinusoidal positional encoding (same formula as PositionalEncoding)
    pos = jnp.arange(MAX_SEQ_LEN, dtype=jnp.float32)[:, None]
    div = jnp.exp(jnp.arange(0, D, 2, dtype=jnp.float32) * (-math.log(10000.0) / D))
    pe = jnp.zeros((MAX_SEQ_LEN, D), jnp.float32)
    pe = pe.at[:, 0::2].set(jnp.sin(pos * div))
    pe = pe.at[:, 1::2].set(jnp.cos(pos * div))

    return dict(
        embedding=emb, pe=pe,
        enc_attn=attn_p(), enc_ln1=ln_p(), enc_ffn=ffn_p(), enc_ln2=ln_p(),
        dec_sa=attn_p(), dec_ln1=ln_p(), dec_ca=attn_p(), dec_ln2=ln_p(),
        dec_ffn=ffn_p(), dec_ln3=ln_p(),
        fc_out=dict(w=nrm((D, V)), b=nrm((1, V))),
    )


# --------------------------------- forward ----------------------------------
def forward(params, src, trg):
    """src, trg: [max_seq_len, batch_size] int32 token ids (PyTorch layout)."""
    S, B = src.shape
    T = trg.shape[0]
    sqrt_d = math.sqrt(EMBED_DIM)

    # make_len_mask: (inp == 0).T -> [B, S] pad bits, passed to kernel as f32
    src_pad = (src == 0).T.astype(jnp.float32)
    trg_pad = (trg == 0).T.astype(jnp.float32)

    emb, pe = params['embedding'], params['pe']
    # embedding * sqrt(d) + positional encoding (glue: gather + broadcast add)
    xs = jnp.take(emb, src, axis=0) * sqrt_d + pe[:S][:, None, :]    # [S, B, D]
    xt = jnp.take(emb, trg, axis=0) * sqrt_d + pe[:T][:, None, :]    # [T, B, D]
    # TODO(synk): dropout (p=0.5) is stochastic; implemented as identity (eval mode).
    xs = jnp.transpose(xs, (1, 0, 2)).astype(jnp.float32)            # [B, S, D]
    xt = jnp.transpose(xt, (1, 0, 2)).astype(jnp.float32)            # [B, T, D]

    ea, el1 = params['enc_attn'], params['enc_ln1']
    ef, el2 = params['enc_ffn'], params['enc_ln2']
    sa, dl1 = params['dec_sa'], params['dec_ln1']
    ca, dl2 = params['dec_ca'], params['dec_ln2']
    df, dl3 = params['dec_ffn'], params['dec_ln3']
    fc = params['fc_out']

    args = (xs, xt, src_pad, trg_pad,
            ea['wqkv'], ea['bqkv'], ea['wo'], ea['bo'], el1['g'], el1['b'],
            ef['w1'], ef['b1'], ef['w2'], ef['b2'], el2['g'], el2['b'],
            sa['wqkv'], sa['bqkv'], sa['wo'], sa['bo'], dl1['g'], dl1['b'],
            ca['wqkv'], ca['bqkv'], ca['wo'], ca['bo'], dl2['g'], dl2['b'],
            df['w1'], df['b1'], df['w2'], df['b2'], dl3['g'], dl3['b'],
            fc['w'], fc['b'])

    vmem = pl.BlockSpec(memory_space=pltpu.MemorySpace.VMEM)
    out = pl.pallas_call(
        _fused_forward_kernel,
        out_shape=jax.ShapeDtypeStruct((B, T, VOCAB_SIZE), jnp.float32),
        in_specs=[vmem] * len(args),
        out_specs=vmem,
    )(*args)                                                          # [B, T, V]

    # match PyTorch `output.view(-1, vocab_size)` of a [T, B, V] tensor
    return jnp.transpose(out, (1, 0, 2)).reshape(T * B, VOCAB_SIZE)


# ----------------------------------- main ------------------------------------
if __name__ == "__main__":
    key = jax.random.PRNGKey(0)
    pkey, skey, tkey = jax.random.split(key, 3)
    params = init_params(pkey)

    # tokens in [1, vocab) so no padding rows (avoids fully-masked softmax rows,
    # which would be NaN in PyTorch as well)
    src = jax.random.randint(skey, (MAX_SEQ_LEN, BATCH), 1, VOCAB_SIZE, dtype=jnp.int32)
    trg = jax.random.randint(tkey, (MAX_SEQ_LEN, BATCH), 1, VOCAB_SIZE, dtype=jnp.int32)

    pred = jax.jit(forward)(params, src, trg)
    pred = jax.block_until_ready(pred)

    assert pred.shape == (MAX_SEQ_LEN * BATCH, VOCAB_SIZE), pred.shape
    assert bool(jnp.all(jnp.isfinite(pred)))
    # log-softmax rows must exponentiate to probability distributions
    assert bool(jnp.allclose(jnp.sum(jnp.exp(pred), axis=-1), 1.0, atol=1e-3))

    print("KERNEL_OK")
</pallas_src>

<mosaic_0001>
module attributes {stable_mosaic.version = 11 : i64} {
  func.func @_fused_forward_kernel(%arg0: memref<2x8x16xf32, #tpu.memory_space<vmem>>, %arg1: memref<2x8x16xf32, #tpu.memory_space<vmem>>, %arg2: memref<2x8xf32, #tpu.memory_space<vmem>>, %arg3: memref<2x8xf32, #tpu.memory_space<vmem>>, %arg4: memref<2x16x48xf32, #tpu.memory_space<vmem>>, %arg5: memref<2x1x48xf32, #tpu.memory_space<vmem>>, %arg6: memref<2x16x16xf32, #tpu.memory_space<vmem>>, %arg7: memref<2x1x16xf32, #tpu.memory_space<vmem>>, %arg8: memref<2x1x16xf32, #tpu.memory_space<vmem>>, %arg9: memref<2x1x16xf32, #tpu.memory_space<vmem>>, %arg10: memref<2x16x32xf32, #tpu.memory_space<vmem>>, %arg11: memref<2x1x32xf32, #tpu.memory_space<vmem>>, %arg12: memref<2x32x16xf32, #tpu.memory_space<vmem>>, %arg13: memref<2x1x16xf32, #tpu.memory_space<vmem>>, %arg14: memref<2x1x16xf32, #tpu.memory_space<vmem>>, %arg15: memref<2x1x16xf32, #tpu.memory_space<vmem>>, %arg16: memref<2x16x48xf32, #tpu.memory_space<vmem>>, %arg17: memref<2x1x48xf32, #tpu.memory_space<vmem>>, %arg18: memref<2x16x16xf32, #tpu.memory_space<vmem>>, %arg19: memref<2x1x16xf32, #tpu.memory_space<vmem>>, %arg20: memref<2x1x16xf32, #tpu.memory_space<vmem>>, %arg21: memref<2x1x16xf32, #tpu.memory_space<vmem>>, %arg22: memref<2x16x48xf32, #tpu.memory_space<vmem>>, %arg23: memref<2x1x48xf32, #tpu.memory_space<vmem>>, %arg24: memref<2x16x16xf32, #tpu.memory_space<vmem>>, %arg25: memref<2x1x16xf32, #tpu.memory_space<vmem>>, %arg26: memref<2x1x16xf32, #tpu.memory_space<vmem>>, %arg27: memref<2x1x16xf32, #tpu.memory_space<vmem>>, %arg28: memref<2x16x32xf32, #tpu.memory_space<vmem>>, %arg29: memref<2x1x32xf32, #tpu.memory_space<vmem>>, %arg30: memref<2x32x16xf32, #tpu.memory_space<vmem>>, %arg31: memref<2x1x16xf32, #tpu.memory_space<vmem>>, %arg32: memref<2x1x16xf32, #tpu.memory_space<vmem>>, %arg33: memref<2x1x16xf32, #tpu.memory_space<vmem>>, %arg34: memref<16x32xf32, #tpu.memory_space<vmem>>, %arg35: memref<1x32xf32, #tpu.memory_space<vmem>>, %arg36: memref<2x8x32xf32, #tpu.memory_space<vmem>>) attributes {dimension_semantics = [], scalar_prefetch = 0 : i64, scratch_operands = 0 : i64, tpu.core_type = #tpu.core_type<tc>} {
    %c0 = arith.constant 0 : index
    %c0_0 = arith.constant 0 : index
    %c0_1 = arith.constant 0 : index
    %0 = vector.load %arg0[%c0, %c0_0, %c0_1] : memref<2x8x16xf32, #tpu.memory_space<vmem>>, vector<2x8x16xf32>
    %1 = vector.shape_cast %0 : vector<2x8x16xf32> to vector<16x16xf32>
    %c0_2 = arith.constant 0 : index
    %c0_3 = arith.constant 0 : index
    %c0_4 = arith.constant 0 : index
    %2 = vector.load %arg1[%c0_2, %c0_3, %c0_4] : memref<2x8x16xf32, #tpu.memory_space<vmem>>, vector<2x8x16xf32>
    %3 = vector.shape_cast %2 : vector<2x8x16xf32> to vector<16x16xf32>
    %c0_5 = arith.constant 0 : index
    %c0_6 = arith.constant 0 : index
    %4 = vector.load %arg2[%c0_5, %c0_6] : memref<2x8xf32, #tpu.memory_space<vmem>>, vector<2x8xf32>
    %cst = arith.constant 5.000000e-01 : f32
    %5 = vector.broadcast %cst : f32 to vector<2x8xf32>
    %6 = arith.cmpf ogt, %4, %5 : vector<2x8xf32>
    %c0_7 = arith.constant 0 : index
    %c0_8 = arith.constant 0 : index
    %7 = vector.load %arg3[%c0_7, %c0_8] : memref<2x8xf32, #tpu.memory_space<vmem>>, vector<2x8xf32>
    %cst_9 = arith.constant 5.000000e-01 : f32
    %8 = vector.broadcast %cst_9 : f32 to vector<2x8xf32>
    %9 = arith.cmpf ogt, %7, %8 : vector<2x8xf32>
    %10 = vector.shape_cast %6 : vector<2x8xi1> to vector<2x1x8xi1>
    %11 = tpu.iota {dimensions = array<i32: 0>} : vector<8x8xi32>
    %12 = tpu.iota {dimensions = array<i32: 1>} : vector<8x8xi32>
    %13 = arith.cmpi sgt, %12, %11 : vector<8x8xi32>
    %14 = vector.shape_cast %9 : vector<2x8xi1> to vector<2x1x8xi1>
    %15 = vector.shape_cast %13 : vector<8x8xi1> to vector<1x8x8xi1>
    %16 = vector.broadcast %15 : vector<1x8x8xi1> to vector<2x8x8xi1>
    %17 = vector.broadcast %14 : vector<2x1x8xi1> to vector<2x8x8xi1>
    %18 = arith.ori %16, %17 : vector<2x8x8xi1>
    %19 = vector.shape_cast %6 : vector<2x8xi1> to vector<2x1x8xi1>
    %c0_10 = arith.constant 0 : index
    %c0_11 = arith.constant 0 : index
    %c0_12 = arith.constant 0 : index
    %20 = vector.load %arg4[%c0_10, %c0_11, %c0_12] : memref<2x16x48xf32, #tpu.memory_space<vmem>>, vector<1x16x48xf32>
    %21 = vector.shape_cast %20 : vector<1x16x48xf32> to vector<16x48xf32>
    %c0_13 = arith.constant 0 : index
    %c0_14 = arith.constant 0 : index
    %c0_15 = arith.constant 0 : index
    %22 = vector.load %arg5[%c0_13, %c0_14, %c0_15] : memref<2x1x48xf32, #tpu.memory_space<vmem>>, vector<1x1x48xf32>
    %23 = vector.shape_cast %22 : vector<1x1x48xf32> to vector<1x48xf32>
    %c0_16 = arith.constant 0 : index
    %c0_17 = arith.constant 0 : index
    %c0_18 = arith.constant 0 : index
    %24 = vector.load %arg6[%c0_16, %c0_17, %c0_18] : memref<2x16x16xf32, #tpu.memory_space<vmem>>, vector<1x16x16xf32>
    %25 = vector.shape_cast %24 : vector<1x16x16xf32> to vector<16x16xf32>
    %c0_19 = arith.constant 0 : index
    %c0_20 = arith.constant 0 : index
    %c0_21 = arith.constant 0 : index
    %26 = vector.load %arg7[%c0_19, %c0_20, %c0_21] : memref<2x1x16xf32, #tpu.memory_space<vmem>>, vector<1x1x16xf32>
    %27 = vector.shape_cast %26 : vector<1x1x16xf32> to vector<1x16xf32>
    %cst_22 = arith.constant dense<0.000000e+00> : vector<16x48xf32>
    %28 = tpu.matmul %1, %21, %cst_22 {dimension_numbers = #tpu.dot_dimension_numbers<[1], [0], [0], [1], [0, 0, 1, 1], [], []>} : vector<16x16xf32>, vector<16x48xf32>, vector<16x48xf32> -> vector<16x48xf32>
    %29 = vector.broadcast %23 : vector<1x48xf32> to vector<16x48xf32>
    %30 = arith.addf %28, %29 : vector<16x48xf32>
    %31 = vector.extract_strided_slice %30 {offsets = [0, 0], sizes = [16, 16], strides = [1, 1]} : vector<16x48xf32> to vector<16x16xf32>
    %32 = vector.extract_strided_slice %30 {offsets = [0, 16], sizes = [16, 16], strides = [1, 1]} : vector<16x48xf32> to vector<16x16xf32>
    %33 = vector.extract_strided_slice %30 {offsets = [0, 32], sizes = [16, 16], strides = [1, 1]} : vector<16x48xf32> to vector<16x16xf32>
    %34 = vector.shape_cast %31 : vector<16x16xf32> to vector<2x8x16xf32>
    %35 = vector.shape_cast %32 : vector<16x16xf32> to vector<2x8x16xf32>
    %36 = vector.shape_cast %33 : vector<16x16xf32> to vector<2x8x16xf32>
    %37 = vector.extract_strided_slice %34 {offsets = [0, 0, 0], sizes = [2, 8, 8], strides = [1, 1, 1]} : vector<2x8x16xf32> to vector<2x8x8xf32>
    %38 = vector.extract_strided_slice %35 {offsets = [0, 0, 0], sizes = [2, 8, 8], strides = [1, 1, 1]} : vector<2x8x16xf32> to vector<2x8x8xf32>
    "tpu.trace_start"() <{level = 10 : i32, message = "bqd,bkd->bqk"}> : () -> ()
    %cst_23 = arith.constant dense<0.000000e+00> : vector<2x8x8xf32>
    %39 = tpu.matmul %37, %38, %cst_23 {dimension_numbers = #tpu.dot_dimension_numbers<[2], [2], [1], [1], [0, 0, 0, 1, 1, 1], [0], [0]>} : vector<2x8x8xf32>, vector<2x8x8xf32>, vector<2x8x8xf32> -> vector<2x8x8xf32>
    "tpu.trace_stop"() : () -> ()
    %cst_24 = arith.constant 0.353553385 : f32
    %40 = vector.broadcast %cst_24 : f32 to vector<2x8x8xf32>
    %41 = arith.mulf %39, %40 : vector<2x8x8xf32>
    %cst_25 = arith.constant -1.000000e+09 : f32
    %42 = vector.shape_cast %10 : vector<2x1x8xi1> to vector<2x1x8xi1>
    %43 = vector.broadcast %42 : vector<2x1x8xi1> to vector<2x8x8xi1>
    %44 = vector.broadcast %cst_25 : f32 to vector<2x8x8xf32>
    %45 = arith.select %43, %44, %41 : vector<2x8x8xi1>, vector<2x8x8xf32>
    %cst_26 = arith.constant dense<0xFF800000> : vector<2x8xf32>
    %46 = vector.multi_reduction <maximumf>, %45, %cst_26 [2] : vector<2x8x8xf32> to vector<2x8xf32>
    %47 = vector.shape_cast %46 : vector<2x8xf32> to vector<2x8x1xf32>
    %48 = vector.broadcast %47 : vector<2x8x1xf32> to vector<2x8x8xf32>
    %49 = arith.subf %45, %48 : vector<2x8x8xf32>
    %50 = math.exp %49 : vector<2x8x8xf32>
    %cst_27 = arith.constant dense<0.000000e+00> : vector<2x8xf32>
    %51 = vector.multi_reduction <add>, %50, %cst_27 [2] : vector<2x8x8xf32> to vector<2x8xf32>
    %52 = vector.shape_cast %51 : vector<2x8xf32> to vector<2x8x1xf32>
    %53 = tpu.reciprocal %52 {approx = true} : vector<2x8x1xf32> -> vector<2x8x1xf32>
    %54 = vector.broadcast %53 : vector<2x8x1xf32> to vector<2x8x8xf32>
    %55 = arith.mulf %50, %54 : vector<2x8x8xf32>
    %56 = vector.extract_strided_slice %36 {offsets = [0, 0, 0], sizes = [2, 8, 8], strides = [1, 1, 1]} : vector<2x8x16xf32> to vector<2x8x8xf32>
    "tpu.trace_start"() <{level = 10 : i32, message = "bqk,bkd->bqd"}> : () -> ()
    %cst_28 = arith.constant dense<0.000000e+00> : vector<2x8x8xf32>
    %57 = tpu.matmul %55, %56, %cst_28 {dimension_numbers = #tpu.dot_dimension_numbers<[2], [1], [1], [2], [0, 0, 0, 1, 1, 2], [0], [0]>} : vector<2x8x8xf32>, vector<2x8x8xf32>, vector<2x8x8xf32> -> vector<2x8x8xf32>
    "tpu.trace_stop"() : () -> ()
    %58 = vector.extract_strided_slice %34 {offsets = [0, 0, 8], sizes = [2, 8, 8], strides = [1, 1, 1]} : vector<2x8x16xf32> to vector<2x8x8xf32>
    %59 = vector.extract_strided_slice %35 {offsets = [0, 0, 8], sizes = [2, 8, 8], strides = [1, 1, 1]} : vector<2x8x16xf32> to vector<2x8x8xf32>
    "tpu.trace_start"() <{level = 10 : i32, message = "bqd,bkd->bqk"}> : () -> ()
    %cst_29 = arith.constant dense<0.000000e+00> : vector<2x8x8xf32>
    %60 = tpu.matmul %58, %59, %cst_29 {dimension_numbers = #tpu.dot_dimension_numbers<[2], [2], [1], [1], [0, 0, 0, 1, 1, 1], [0], [0]>} : vector<2x8x8xf32>, vector<2x8x8xf32>, vector<2x8x8xf32> -> vector<2x8x8xf32>
    "tpu.trace_stop"() : () -> ()
    %cst_30 = arith.constant 0.353553385 : f32
    %61 = vector.broadcast %cst_30 : f32 to vector<2x8x8xf32>
    %62 = arith.mulf %60, %61 : vector<2x8x8xf32>
    %cst_31 = arith.constant -1.000000e+09 : f32
    %63 = vector.shape_cast %10 : vector<2x1x8xi1> to vector<2x1x8xi1>
    %64 = vector.broadcast %63 : vector<2x1x8xi1> to vector<2x8x8xi1>
    %65 = vector.broadcast %cst_31 : f32 to vector<2x8x8xf32>
    %66 = arith.select %64, %65, %62 : vector<2x8x8xi1>, vector<2x8x8xf32>
    %cst_32 = arith.constant dense<0xFF800000> : vector<2x8xf32>
    %67 = vector.multi_reduction <maximumf>, %66, %cst_32 [2] : vector<2x8x8xf32> to vector<2x8xf32>
    %68 = vector.shape_cast %67 : vector<2x8xf32> to vector<2x8x1xf32>
    %69 = vector.broadcast %68 : vector<2x8x1xf32> to vector<2x8x8xf32>
    %70 = arith.subf %66, %69 : vector<2x8x8xf32>
    %71 = math.exp %70 : vector<2x8x8xf32>
    %cst_33 = arith.constant dense<0.000000e+00> : vector<2x8xf32>
    %72 = vector.multi_reduction <add>, %71, %cst_33 [2] : vector<2x8x8xf32> to vector<2x8xf32>
    %73 = vector.shape_cast %72 : vector<2x8xf32> to vector<2x8x1xf32>
    %74 = tpu.reciprocal %73 {approx = true} : vector<2x8x1xf32> -> vector<2x8x1xf32>
    %75 = vector.broadcast %74 : vector<2x8x1xf32> to vector<2x8x8xf32>
    %76 = arith.mulf %71, %75 : vector<2x8x8xf32>
    %77 = vector.extract_strided_slice %36 {offsets = [0, 0, 8], sizes = [2, 8, 8], strides = [1, 1, 1]} : vector<2x8x16xf32> to vector<2x8x8xf32>
    "tpu.trace_start"() <{level = 10 : i32, message = "bqk,bkd->bqd"}> : () -> ()
    %cst_34 = arith.constant dense<0.000000e+00> : vector<2x8x8xf32>
    %78 = tpu.matmul %76, %77, %cst_34 {dimension_numbers = #tpu.dot_dimension_numbers<[2], [1], [1], [2], [0, 0, 0, 1, 1, 2], [0], [0]>} : vector<2x8x8xf32>, vector<2x8x8xf32>, vector<2x8x8xf32> -> vector<2x8x8xf32>
    "tpu.trace_stop"() : () -> ()
    %79 = tpu.concatenate %57, %78 in 2 : vector<2x8x8xf32>, vector<2x8x8xf32> -> vector<2x8x16xf32>
    %80 = vector.shape_cast %79 : vector<2x8x16xf32> to vector<16x16xf32>
    %cst_35 = arith.constant dense<0.000000e+00> : vector<16x16xf32>
    %81 = tpu.matmul %80, %25, %cst_35 {dimension_numbers = #tpu.dot_dimension_numbers<[1], [0], [0], [1], [0, 0, 1, 1], [], []>} : vector<16x16xf32>, vector<16x16xf32>, vector<16x16xf32> -> vector<16x16xf32>
    %82 = vector.broadcast %27 : vector<1x16xf32> to vector<16x16xf32>
    %83 = arith.addf %81, %82 : vector<16x16xf32>
    %84 = arith.addf %1, %83 : vector<16x16xf32>
    %c0_36 = arith.constant 0 : index
    %c0_37 = arith.constant 0 : index
    %c0_38 = arith.constant 0 : index
    %85 = vector.load %arg8[%c0_36, %c0_37, %c0_38] : memref<2x1x16xf32, #tpu.memory_space<vmem>>, vector<1x1x16xf32>
    %86 = vector.shape_cast %85 : vector<1x1x16xf32> to vector<1x16xf32>
    %c0_39 = arith.constant 0 : index
    %c0_40 = arith.constant 0 : index
    %c0_41 = arith.constant 0 : index
    %87 = vector.load %arg9[%c0_39, %c0_40, %c0_41] : memref<2x1x16xf32, #tpu.memory_space<vmem>>, vector<1x1x16xf32>
    %88 = vector.shape_cast %87 : vector<1x1x16xf32> to vector<1x16xf32>
    %cst_42 = arith.constant dense<0.000000e+00> : vector<16xf32>
    %89 = vector.multi_reduction <add>, %84, %cst_42 [1] : vector<16x16xf32> to vector<16xf32>
    %90 = vector.shape_cast %89 : vector<16xf32> to vector<16x1xf32>
    %cst_43 = arith.constant 1.600000e+01 : f32
    %91 = vector.broadcast %cst_43 : f32 to vector<16x1xf32>
    %92 = arith.divf %90, %91 : vector<16x1xf32>
    %93 = vector.broadcast %92 : vector<16x1xf32> to vector<16x16xf32>
    %94 = arith.subf %84, %93 : vector<16x16xf32>
    %95 = arith.mulf %94, %94 : vector<16x16xf32>
    %cst_44 = arith.constant dense<0.000000e+00> : vector<16xf32>
    %96 = vector.multi_reduction <add>, %95, %cst_44 [1] : vector<16x16xf32> to vector<16xf32>
    %97 = vector.shape_cast %96 : vector<16xf32> to vector<16x1xf32>
    %cst_45 = arith.constant 1.600000e+01 : f32
    %98 = vector.broadcast %cst_45 : f32 to vector<16x1xf32>
    %99 = arith.divf %97, %98 : vector<16x1xf32>
    %cst_46 = arith.constant 9.99999974E-6 : f32
    %100 = vector.broadcast %cst_46 : f32 to vector<16x1xf32>
    %101 = arith.addf %99, %100 : vector<16x1xf32>
    %102 = math.rsqrt %101 : vector<16x1xf32>
    %103 = vector.broadcast %102 : vector<16x1xf32> to vector<16x16xf32>
    %104 = arith.mulf %94, %103 : vector<16x16xf32>
    %105 = vector.broadcast %86 : vector<1x16xf32> to vector<16x16xf32>
    %106 = arith.mulf %104, %105 : vector<16x16xf32>
    %107 = vector.broadcast %88 : vector<1x16xf32> to vector<16x16xf32>
    %108 = arith.addf %106, %107 : vector<16x16xf32>
    %c0_47 = arith.constant 0 : index
    %c0_48 = arith.constant 0 : index
    %c0_49 = arith.constant 0 : index
    %109 = vector.load %arg10[%c0_47, %c0_48, %c0_49] : memref<2x16x32xf32, #tpu.memory_space<vmem>>, vector<1x16x32xf32>
    %110 = vector.shape_cast %109 : vector<1x16x32xf32> to vector<16x32xf32>
    %c0_50 = arith.constant 0 : index
    %c0_51 = arith.constant 0 : index
    %c0_52 = arith.constant 0 : index
    %111 = vector.load %arg11[%c0_50, %c0_51, %c0_52] : memref<2x1x32xf32, #tpu.memory_space<vmem>>, vector<1x1x32xf32>
    %112 = vector.shape_cast %111 : vector<1x1x32xf32> to vector<1x32xf32>
    %c0_53 = arith.constant 0 : index
    %c0_54 = arith.constant 0 : index
    %c0_55 = arith.constant 0 : index
    %113 = vector.load %arg12[%c0_53, %c0_54, %c0_55] : memref<2x32x16xf32, #tpu.memory_space<vmem>>, vector<1x32x16xf32>
    %114 = vector.shape_cast %113 : vector<1x32x16xf32> to vector<32x16xf32>
    %c0_56 = arith.constant 0 : index
    %c0_57 = arith.constant 0 : index
    %c0_58 = arith.constant 0 : index
    %115 = vector.load %arg13[%c0_56, %c0_57, %c0_58] : memref<2x1x16xf32, #tpu.memory_space<vmem>>, vector<1x1x16xf32>
    %116 = vector.shape_cast %115 : vector<1x1x16xf32> to vector<1x16xf32>
    %cst_59 = arith.constant dense<0.000000e+00> : vector<16x32xf32>
    %117 = tpu.matmul %108, %110, %cst_59 {dimension_numbers = #tpu.dot_dimension_numbers<[1], [0], [0], [1], [0, 0, 1, 1], [], []>} : vector<16x16xf32>, vector<16x32xf32>, vector<16x32xf32> -> vector<16x32xf32>
    %118 = vector.broadcast %112 : vector<1x32xf32> to vector<16x32xf32>
    %119 = arith.addf %117, %118 : vector<16x32xf32>
    %cst_60 = arith.constant 0.000000e+00 : f32
    %120 = vector.broadcast %cst_60 : f32 to vector<16x32xf32>
    %121 = arith.maximumf %119, %120 : vector<16x32xf32>
    %cst_61 = arith.constant dense<0.000000e+00> : vector<16x16xf32>
    %122 = tpu.matmul %121, %114, %cst_61 {dimension_numbers = #tpu.dot_dimension_numbers<[1], [0], [0], [1], [0, 0, 1, 1], [], []>} : vector<16x32xf32>, vector<32x16xf32>, vector<16x16xf32> -> vector<16x16xf32>
    %123 = vector.broadcast %116 : vector<1x16xf32> to vector<16x16xf32>
    %124 = arith.addf %122, %123 : vector<16x16xf32>
    %125 = arith.addf %108, %124 : vector<16x16xf32>
    %c0_62 = arith.constant 0 : index
    %c0_63 = arith.constant 0 : index
    %c0_64 = arith.constant 0 : index
    %126 = vector.load %arg14[%c0_62, %c0_63, %c0_64] : memref<2x1x16xf32, #tpu.memory_space<vmem>>, vector<1x1x16xf32>
    %127 = vector.shape_cast %126 : vector<1x1x16xf32> to vector<1x16xf32>
    %c0_65 = arith.constant 0 : index
    %c0_66 = arith.constant 0 : index
    %c0_67 = arith.constant 0 : index
    %128 = vector.load %arg15[%c0_65, %c0_66, %c0_67] : memref<2x1x16xf32, #tpu.memory_space<vmem>>, vector<1x1x16xf32>
    %129 = vector.shape_cast %128 : vector<1x1x16xf32> to vector<1x16xf32>
    %cst_68 = arith.constant dense<0.000000e+00> : vector<16xf32>
    %130 = vector.multi_reduction <add>, %125, %cst_68 [1] : vector<16x16xf32> to vector<16xf32>
    %131 = vector.shape_cast %130 : vector<16xf32> to vector<16x1xf32>
    %cst_69 = arith.constant 1.600000e+01 : f32
    %132 = vector.broadcast %cst_69 : f32 to vector<16x1xf32>
    %133 = arith.divf %131, %132 : vector<16x1xf32>
    %134 = vector.broadcast %133 : vector<16x1xf32> to vector<16x16xf32>
    %135 = arith.subf %125, %134 : vector<16x16xf32>
    %136 = arith.mulf %135, %135 : vector<16x16xf32>
    %cst_70 = arith.constant dense<0.000000e+00> : vector<16xf32>
    %137 = vector.multi_reduction <add>, %136, %cst_70 [1] : vector<16x16xf32> to vector<16xf32>
    %138 = vector.shape_cast %137 : vector<16xf32> to vector<16x1xf32>
    %cst_71 = arith.constant 1.600000e+01 : f32
    %139 = vector.broadcast %cst_71 : f32 to vector<16x1xf32>
    %140 = arith.divf %138, %139 : vector<16x1xf32>
    %cst_72 = arith.constant 9.99999974E-6 : f32
    %141 = vector.broadcast %cst_72 : f32 to vector<16x1xf32>
    %142 = arith.addf %140, %141 : vector<16x1xf32>
    %143 = math.rsqrt %142 : vector<16x1xf32>
    %144 = vector.broadcast %143 : vector<16x1xf32> to vector<16x16xf32>
    %145 = arith.mulf %135, %144 : vector<16x16xf32>
    %146 = vector.broadcast %127 : vector<1x16xf32> to vector<16x16xf32>
    %147 = arith.mulf %145, %146 : vector<16x16xf32>
    %148 = vector.broadcast %129 : vector<1x16xf32> to vector<16x16xf32>
    %149 = arith.addf %147, %148 : vector<16x16xf32>
    %c1 = arith.constant 1 : index
    %c0_73 = arith.constant 0 : index
    %c0_74 = arith.constant 0 : index
    %150 = vector.load %arg4[%c1, %c0_73, %c0_74] : memref<2x16x48xf32, #tpu.memory_space<vmem>>, vector<1x16x48xf32>
    %151 = vector.shape_cast %150 : vector<1x16x48xf32> to vector<16x48xf32>
    %c1_75 = arith.constant 1 : index
    %c0_76 = arith.constant 0 : index
    %c0_77 = arith.constant 0 : index
    %152 = vector.load %arg5[%c1_75, %c0_76, %c0_77] : memref<2x1x48xf32, #tpu.memory_space<vmem>>, vector<1x1x48xf32>
    %153 = vector.shape_cast %152 : vector<1x1x48xf32> to vector<1x48xf32>
    %c1_78 = arith.constant 1 : index
    %c0_79 = arith.constant 0 : index
    %c0_80 = arith.constant 0 : index
    %154 = vector.load %arg6[%c1_78, %c0_79, %c0_80] : memref<2x16x16xf32, #tpu.memory_space<vmem>>, vector<1x16x16xf32>
    %155 = vector.shape_cast %154 : vector<1x16x16xf32> to vector<16x16xf32>
    %c1_81 = arith.constant 1 : index
    %c0_82 = arith.constant 0 : index
    %c0_83 = arith.constant 0 : index
    %156 = vector.load %arg7[%c1_81, %c0_82, %c0_83] : memref<2x1x16xf32, #tpu.memory_space<vmem>>, vector<1x1x16xf32>
    %157 = vector.shape_cast %156 : vector<1x1x16xf32> to vector<1x16xf32>
    %cst_84 = arith.constant dense<0.000000e+00> : vector<16x48xf32>
    %158 = tpu.matmul %149, %151, %cst_84 {dimension_numbers = #tpu.dot_dimension_numbers<[1], [0], [0], [1], [0, 0, 1, 1], [], []>} : vector<16x16xf32>, vector<16x48xf32>, vector<16x48xf32> -> vector<16x48xf32>
    %159 = vector.broadcast %153 : vector<1x48xf32> to vector<16x48xf32>
    %160 = arith.addf %158, %159 : vector<16x48xf32>
    %161 = vector.extract_strided_slice %160 {offsets = [0, 0], sizes = [16, 16], strides = [1, 1]} : vector<16x48xf32> to vector<16x16xf32>
    %162 = vector.extract_strided_slice %160 {offsets = [0, 16], sizes = [16, 16], strides = [1, 1]} : vector<16x48xf32> to vector<16x16xf32>
    %163 = vector.extract_strided_slice %160 {offsets = [0, 32], sizes = [16, 16], strides = [1, 1]} : vector<16x48xf32> to vector<16x16xf32>
    %164 = vector.shape_cast %161 : vector<16x16xf32> to vector<2x8x16xf32>
    %165 = vector.shape_cast %162 : vector<16x16xf32> to vector<2x8x16xf32>
    %166 = vector.shape_cast %163 : vector<16x16xf32> to vector<2x8x16xf32>
    %167 = vector.extract_strided_slice %164 {offsets = [0, 0, 0], sizes = [2, 8, 8], strides = [1, 1, 1]} : vector<2x8x16xf32> to vector<2x8x8xf32>
    %168 = vector.extract_strided_slice %165 {offsets = [0, 0, 0], sizes = [2, 8, 8], strides = [1, 1, 1]} : vector<2x8x16xf32> to vector<2x8x8xf32>
    "tpu.trace_start"() <{level = 10 : i32, message = "bqd,bkd->bqk"}> : () -> ()
    %cst_85 = arith.constant dense<0.000000e+00> : vector<2x8x8xf32>
    %169 = tpu.matmul %167, %168, %cst_85 {dimension_numbers = #tpu.dot_dimension_numbers<[2], [2], [1], [1], [0, 0, 0, 1, 1, 1], [0], [0]>} : vector<2x8x8xf32>, vector<2x8x8xf32>, vector<2x8x8xf32> -> vector<2x8x8xf32>
    "tpu.trace_stop"() : () -> ()
    %cst_86 = arith.constant 0.353553385 : f32
    %170 = vector.broadcast %cst_86 : f32 to vector<2x8x8xf32>
    %171 = arith.mulf %169, %170 : vector<2x8x8xf32>
    %cst_87 = arith.constant -1.000000e+09 : f32
    %172 = vector.shape_cast %10 : vector<2x1x8xi1> to vector<2x1x8xi1>
    %173 = vector.broadcast %172 : vector<2x1x8xi1> to vector<2x8x8xi1>
    %174 = vector.broadcast %cst_87 : f32 to vector<2x8x8xf32>
    %175 = arith.select %173, %174, %171 : vector<2x8x8xi1>, vector<2x8x8xf32>
    %cst_88 = arith.constant dense<0xFF800000> : vector<2x8xf32>
    %176 = vector.multi_reduction <maximumf>, %175, %cst_88 [2] : vector<2x8x8xf32> to vector<2x8xf32>
    %177 = vector.shape_cast %176 : vector<2x8xf32> to vector<2x8x1xf32>
    %178 = vector.broadcast %177 : vector<2x8x1xf32> to vector<2x8x8xf32>
    %179 = arith.subf %175, %178 : vector<2x8x8xf32>
    %180 = math.exp %179 : vector<2x8x8xf32>
    %cst_89 = arith.constant dense<0.000000e+00> : vector<2x8xf32>
    %181 = vector.multi_reduction <add>, %180, %cst_89 [2] : vector<2x8x8xf32> to vector<2x8xf32>
    %182 = vector.shape_cast %181 : vector<2x8xf32> to vector<2x8x1xf32>
    %183 = tpu.reciprocal %182 {approx = true} : vector<2x8x1xf32> -> vector<2x8x1xf32>
    %184 = vector.broadcast %183 : vector<2x8x1xf32> to vector<2x8x8xf32>
    %185 = arith.mulf %180, %184 : vector<2x8x8xf32>
    %186 = vector.extract_strided_slice %166 {offsets = [0, 0, 0], sizes = [2, 8, 8], strides = [1, 1, 1]} : vector<2x8x16xf32> to vector<2x8x8xf32>
    "tpu.trace_start"() <{level = 10 : i32, message = "bqk,bkd->bqd"}> : () -> ()
    %cst_90 = arith.constant dense<0.000000e+00> : vector<2x8x8xf32>
    %187 = tpu.matmul %185, %186, %cst_90 {dimension_numbers = #tpu.dot_dimension_numbers<[2], [1], [1], [2], [0, 0, 0, 1, 1, 2], [0], [0]>} : vector<2x8x8xf32>, vector<2x8x8xf32>, vector<2x8x8xf32> -> vector<2x8x8xf32>
    "tpu.trace_stop"() : () -> ()
    %188 = vector.extract_strided_slice %164 {offsets = [0, 0, 8], sizes = [2, 8, 8], strides = [1, 1, 1]} : vector<2x8x16xf32> to vector<2x8x8xf32>
    %189 = vector.extract_strided_slice %165 {offsets = [0, 0, 8], sizes = [2, 8, 8], strides = [1, 1, 1]} : vector<2x8x16xf32> to vector<2x8x8xf32>
    "tpu.trace_start"() <{level = 10 : i32, message = "bqd,bkd->bqk"}> : () -> ()
    %cst_91 = arith.constant dense<0.000000e+00> : vector<2x8x8xf32>
    %190 = tpu.matmul %188, %189, %cst_91 {dimension_numbers = #tpu.dot_dimension_numbers<[2], [2], [1], [1], [0, 0, 0, 1, 1, 1], [0], [0]>} : vector<2x8x8xf32>, vector<2x8x8xf32>, vector<2x8x8xf32> -> vector<2x8x8xf32>
    "tpu.trace_stop"() : () -> ()
    %cst_92 = arith.constant 0.353553385 : f32
    %191 = vector.broadcast %cst_92 : f32 to vector<2x8x8xf32>
    %192 = arith.mulf %190, %191 : vector<2x8x8xf32>
    %cst_93 = arith.constant -1.000000e+09 : f32
    %193 = vector.shape_cast %10 : vector<2x1x8xi1> to vector<2x1x8xi1>
    %194 = vector.broadcast %193 : vector<2x1x8xi1> to vector<2x8x8xi1>
    %195 = vector.broadcast %cst_93 : f32 to vector<2x8x8xf32>
    %196 = arith.select %194, %195, %192 : vector<2x8x8xi1>, vector<2x8x8xf32>
    %cst_94 = arith.constant dense<0xFF800000> : vector<2x8xf32>
    %197 = vector.multi_reduction <maximumf>, %196, %cst_94 [2] : vector<2x8x8xf32> to vector<2x8xf32>
    %198 = vector.shape_cast %197 : vector<2x8xf32> to vector<2x8x1xf32>
    %199 = vector.broadcast %198 : vector<2x8x1xf32> to vector<2x8x8xf32>
    %200 = arith.subf %196, %199 : vector<2x8x8xf32>
    %201 = math.exp %200 : vector<2x8x8xf32>
    %cst_95 = arith.constant dense<0.000000e+00> : vector<2x8xf32>
    %202 = vector.multi_reduction <add>, %201, %cst_95 [2] : vector<2x8x8xf32> to vector<2x8xf32>
    %203 = vector.shape_cast %202 : vector<2x8xf32> to vector<2x8x1xf32>
    %204 = tpu.reciprocal %203 {approx = true} : vector<2x8x1xf32> -> vector<2x8x1xf32>
    %205 = vector.broadcast %204 : vector<2x8x1xf32> to vector<2x8x8xf32>
    %206 = arith.mulf %201, %205 : vector<2x8x8xf32>
    %207 = vector.extract_strided_slice %166 {offsets = [0, 0, 8], sizes = [2, 8, 8], strides = [1, 1, 1]} : vector<2x8x16xf32> to vector<2x8x8xf32>
    "tpu.trace_start"() <{level = 10 : i32, message = "bqk,bkd->bqd"}> : () -> ()
    %cst_96 = arith.constant dense<0.000000e+00> : vector<2x8x8xf32>
    %208 = tpu.matmul %206, %207, %cst_96 {dimension_numbers = #tpu.dot_dimension_numbers<[2], [1], [1], [2], [0, 0, 0, 1, 1, 2], [0], [0]>} : vector<2x8x8xf32>, vector<2x8x8xf32>, vector<2x8x8xf32> -> vector<2x8x8xf32>
    "tpu.trace_stop"() : () -> ()
    %209 = tpu.concatenate %187, %208 in 2 : vector<2x8x8xf32>, vector<2x8x8xf32> -> vector<2x8x16xf32>
    %210 = vector.shape_cast %209 : vector<2x8x16xf32> to vector<16x16xf32>
    %cst_97 = arith.constant dense<0.000000e+00> : vector<16x16xf32>
    %211 = tpu.matmul %210, %155, %cst_97 {dimension_numbers = #tpu.dot_dimension_numbers<[1], [0], [0], [1], [0, 0, 1, 1], [], []>} : vector<16x16xf32>, vector<16x16xf32>, vector<16x16xf32> -> vector<16x16xf32>
    %212 = vector.broadcast %157 : vector<1x16xf32> to vector<16x16xf32>
    %213 = arith.addf %211, %212 : vector<16x16xf32>
    %214 = arith.addf %149, %213 : vector<16x16xf32>
    %c1_98 = arith.constant 1 : index
    %c0_99 = arith.constant 0 : index
    %c0_100 = arith.constant 0 : index
    %215 = vector.load %arg8[%c1_98, %c0_99, %c0_100] : memref<2x1x16xf32, #tpu.memory_space<vmem>>, vector<1x1x16xf32>
    %216 = vector.shape_cast %215 : vector<1x1x16xf32> to vector<1x16xf32>
    %c1_101 = arith.constant 1 : index
    %c0_102 = arith.constant 0 : index
    %c0_103 = arith.constant 0 : index
    %217 = vector.load %arg9[%c1_101, %c0_102, %c0_103] : memref<2x1x16xf32, #tpu.memory_space<vmem>>, vector<1x1x16xf32>
    %218 = vector.shape_cast %217 : vector<1x1x16xf32> to vector<1x16xf32>
    %cst_104 = arith.constant dense<0.000000e+00> : vector<16xf32>
    %219 = vector.multi_reduction <add>, %214, %cst_104 [1] : vector<16x16xf32> to vector<16xf32>
    %220 = vector.shape_cast %219 : vector<16xf32> to vector<16x1xf32>
    %cst_105 = arith.constant 1.600000e+01 : f32
    %221 = vector.broadcast %cst_105 : f32 to vector<16x1xf32>
    %222 = arith.divf %220, %221 : vector<16x1xf32>
    %223 = vector.broadcast %222 : vector<16x1xf32> to vector<16x16xf32>
    %224 = arith.subf %214, %223 : vector<16x16xf32>
    %225 = arith.mulf %224, %224 : vector<16x16xf32>
    %cst_106 = arith.constant dense<0.000000e+00> : vector<16xf32>
    %226 = vector.multi_reduction <add>, %225, %cst_106 [1] : vector<16x16xf32> to vector<16xf32>
    %227 = vector.shape_cast %226 : vector<16xf32> to vector<16x1xf32>
    %cst_107 = arith.constant 1.600000e+01 : f32
    %228 = vector.broadcast %cst_107 : f32 to vector<16x1xf32>
    %229 = arith.divf %227, %228 : vector<16x1xf32>
    %cst_108 = arith.constant 9.99999974E-6 : f32
    %230 = vector.broadcast %cst_108 : f32 to vector<16x1xf32>
    %231 = arith.addf %229, %230 : vector<16x1xf32>
    %232 = math.rsqrt %231 : vector<16x1xf32>
    %233 = vector.broadcast %232 : vector<16x1xf32> to vector<16x16xf32>
    %234 = arith.mulf %224, %233 : vector<16x16xf32>
    %235 = vector.broadcast %216 : vector<1x16xf32> to vector<16x16xf32>
    %236 = arith.mulf %234, %235 : vector<16x16xf32>
    %237 = vector.broadcast %218 : vector<1x16xf32> to vector<16x16xf32>
    %238 = arith.addf %236, %237 : vector<16x16xf32>
    %c1_109 = arith.constant 1 : index
    %c0_110 = arith.constant 0 : index
    %c0_111 = arith.constant 0 : index
    %239 = vector.load %arg10[%c1_109, %c0_110, %c0_111] : memref<2x16x32xf32, #tpu.memory_space<vmem>>, vector<1x16x32xf32>
    %240 = vector.shape_cast %239 : vector<1x16x32xf32> to vector<16x32xf32>
    %c1_112 = arith.constant 1 : index
    %c0_113 = arith.constant 0 : index
    %c0_114 = arith.constant 0 : index
    %241 = vector.load %arg11[%c1_112, %c0_113, %c0_114] : memref<2x1x32xf32, #tpu.memory_space<vmem>>, vector<1x1x32xf32>
    %242 = vector.shape_cast %241 : vector<1x1x32xf32> to vector<1x32xf32>
    %c1_115 = arith.constant 1 : index
    %c0_116 = arith.constant 0 : index
    %c0_117 = arith.constant 0 : index
    %243 = vector.load %arg12[%c1_115, %c0_116, %c0_117] : memref<2x32x16xf32, #tpu.memory_space<vmem>>, vector<1x32x16xf32>
    %244 = vector.shape_cast %243 : vector<1x32x16xf32> to vector<32x16xf32>
    %c1_118 = arith.constant 1 : index
    %c0_119 = arith.constant 0 : index
    %c0_120 = arith.constant 0 : index
    %245 = vector.load %arg13[%c1_118, %c0_119, %c0_120] : memref<2x1x16xf32, #tpu.memory_space<vmem>>, vector<1x1x16xf32>
    %246 = vector.shape_cast %245 : vector<1x1x16xf32> to vector<1x16xf32>
    %cst_121 = arith.constant dense<0.000000e+00> : vector<16x32xf32>
    %247 = tpu.matmul %238, %240, %cst_121 {dimension_numbers = #tpu.dot_dimension_numbers<[1], [0], [0], [1], [0, 0, 1, 1], [], []>} : vector<16x16xf32>, vector<16x32xf32>, vector<16x32xf32> -> vector<16x32xf32>
    %248 = vector.broadcast %242 : vector<1x32xf32> to vector<16x32xf32>
    %249 = arith.addf %247, %248 : vector<16x32xf32>
    %cst_122 = arith.constant 0.000000e+00 : f32
    %250 = vector.broadcast %cst_122 : f32 to vector<16x32xf32>
    %251 = arith.maximumf %249, %250 : vector<16x32xf32>
    %cst_123 = arith.constant dense<0.000000e+00> : vector<16x16xf32>
    %252 = tpu.matmul %251, %244, %cst_123 {dimension_numbers = #tpu.dot_dimension_numbers<[1], [0], [0], [1], [0, 0, 1, 1], [], []>} : vector<16x32xf32>, vector<32x16xf32>, vector<16x16xf32> -> vector<16x16xf32>
    %253 = vector.broadcast %246 : vector<1x16xf32> to vector<16x16xf32>
    %254 = arith.addf %252, %253 : vector<16x16xf32>
    %255 = arith.addf %238, %254 : vector<16x16xf32>
    %c1_124 = arith.constant 1 : index
    %c0_125 = arith.constant 0 : index
    %c0_126 = arith.constant 0 : index
    %256 = vector.load %arg14[%c1_124, %c0_125, %c0_126] : memref<2x1x16xf32, #tpu.memory_space<vmem>>, vector<1x1x16xf32>
    %257 = vector.shape_cast %256 : vector<1x1x16xf32> to vector<1x16xf32>
    %c1_127 = arith.constant 1 : index
    %c0_128 = arith.constant 0 : index
    %c0_129 = arith.constant 0 : index
    %258 = vector.load %arg15[%c1_127, %c0_128, %c0_129] : memref<2x1x16xf32, #tpu.memory_space<vmem>>, vector<1x1x16xf32>
    %259 = vector.shape_cast %258 : vector<1x1x16xf32> to vector<1x16xf32>
    %cst_130 = arith.constant dense<0.000000e+00> : vector<16xf32>
    %260 = vector.multi_reduction <add>, %255, %cst_130 [1] : vector<16x16xf32> to vector<16xf32>
    %261 = vector.shape_cast %260 : vector<16xf32> to vector<16x1xf32>
    %cst_131 = arith.constant 1.600000e+01 : f32
    %262 = vector.broadcast %cst_131 : f32 to vector<16x1xf32>
    %263 = arith.divf %261, %262 : vector<16x1xf32>
    %264 = vector.broadcast %263 : vector<16x1xf32> to vector<16x16xf32>
    %265 = arith.subf %255, %264 : vector<16x16xf32>
    %266 = arith.mulf %265, %265 : vector<16x16xf32>
    %cst_132 = arith.constant dense<0.000000e+00> : vector<16xf32>
    %267 = vector.multi_reduction <add>, %266, %cst_132 [1] : vector<16x16xf32> to vector<16xf32>
    %268 = vector.shape_cast %267 : vector<16xf32> to vector<16x1xf32>
    %cst_133 = arith.constant 1.600000e+01 : f32
    %269 = vector.broadcast %cst_133 : f32 to vector<16x1xf32>
    %270 = arith.divf %268, %269 : vector<16x1xf32>
    %cst_134 = arith.constant 9.99999974E-6 : f32
    %271 = vector.broadcast %cst_134 : f32 to vector<16x1xf32>
    %272 = arith.addf %270, %271 : vector<16x1xf32>
    %273 = math.rsqrt %272 : vector<16x1xf32>
    %274 = vector.broadcast %273 : vector<16x1xf32> to vector<16x16xf32>
    %275 = arith.mulf %265, %274 : vector<16x16xf32>
    %276 = vector.broadcast %257 : vector<1x16xf32> to vector<16x16xf32>
    %277 = arith.mulf %275, %276 : vector<16x16xf32>
    %278 = vector.broadcast %259 : vector<1x16xf32> to vector<16x16xf32>
    %279 = arith.addf %277, %278 : vector<16x16xf32>
    %c0_135 = arith.constant 0 : index
    %c0_136 = arith.constant 0 : index
    %c0_137 = arith.constant 0 : index
    %280 = vector.load %arg16[%c0_135, %c0_136, %c0_137] : memref<2x16x48xf32, #tpu.memory_space<vmem>>, vector<1x16x48xf32>
    %281 = vector.shape_cast %280 : vector<1x16x48xf32> to vector<16x48xf32>
    %c0_138 = arith.constant 0 : index
    %c0_139 = arith.constant 0 : index
    %c0_140 = arith.constant 0 : index
    %282 = vector.load %arg17[%c0_138, %c0_139, %c0_140] : memref<2x1x48xf32, #tpu.memory_space<vmem>>, vector<1x1x48xf32>
    %283 = vector.shape_cast %282 : vector<1x1x48xf32> to vector<1x48xf32>
    %c0_141 = arith.constant 0 : index
    %c0_142 = arith.constant 0 : index
    %c0_143 = arith.constant 0 : index
    %284 = vector.load %arg18[%c0_141, %c0_142, %c0_143] : memref<2x16x16xf32, #tpu.memory_space<vmem>>, vector<1x16x16xf32>
    %285 = vector.shape_cast %284 : vector<1x16x16xf32> to vector<16x16xf32>
    %c0_144 = arith.constant 0 : index
    %c0_145 = arith.constant 0 : index
    %c0_146 = arith.constant 0 : index
    %286 = vector.load %arg19[%c0_144, %c0_145, %c0_146] : memref<2x1x16xf32, #tpu.memory_space<vmem>>, vector<1x1x16xf32>
    %287 = vector.shape_cast %286 : vector<1x1x16xf32> to vector<1x16xf32>
    %cst_147 = arith.constant dense<0.000000e+00> : vector<16x48xf32>
    %288 = tpu.matmul %3, %281, %cst_147 {dimension_numbers = #tpu.dot_dimension_numbers<[1], [0], [0], [1], [0, 0, 1, 1], [], []>} : vector<16x16xf32>, vector<16x48xf32>, vector<16x48xf32> -> vector<16x48xf32>
    %289 = vector.broadcast %283 : vector<1x48xf32> to vector<16x48xf32>
    %290 = arith.addf %288, %289 : vector<16x48xf32>
    %291 = vector.extract_strided_slice %290 {offsets = [0, 0], sizes = [16, 16], strides = [1, 1]} : vector<16x48xf32> to vector<16x16xf32>
    %292 = vector.extract_strided_slice %290 {offsets = [0, 16], sizes = [16, 16], strides = [1, 1]} : vector<16x48xf32> to vector<16x16xf32>
    %293 = vector.extract_strided_slice %290 {offsets = [0, 32], sizes = [16, 16], strides = [1, 1]} : vector<16x48xf32> to vector<16x16xf32>
    %294 = vector.shape_cast %291 : vector<16x16xf32> to vector<2x8x16xf32>
    %295 = vector.shape_cast %292 : vector<16x16xf32> to vector<2x8x16xf32>
    %296 = vector.shape_cast %293 : vector<16x16xf32> to vector<2x8x16xf32>
    %297 = vector.extract_strided_slice %294 {offsets = [0, 0, 0], sizes = [2, 8, 8], strides = [1, 1, 1]} : vector<2x8x16xf32> to vector<2x8x8xf32>
    %298 = vector.extract_strided_slice %295 {offsets = [0, 0, 0], sizes = [2, 8, 8], strides = [1, 1, 1]} : vector<2x8x16xf32> to vector<2x8x8xf32>
    "tpu.trace_start"() <{level = 10 : i32, message = "bqd,bkd->bqk"}> : () -> ()
    %cst_148 = arith.constant dense<0.000000e+00> : vector<2x8x8xf32>
    %299 = tpu.matmul %297, %298, %cst_148 {dimension_numbers = #tpu.dot_dimension_numbers<[2], [2], [1], [1], [0, 0, 0, 1, 1, 1], [0], [0]>} : vector<2x8x8xf32>, vector<2x8x8xf32>, vector<2x8x8xf32> -> vector<2x8x8xf32>
    "tpu.trace_stop"() : () -> ()
    %cst_149 = arith.constant 0.353553385 : f32
    %300 = vector.broadcast %cst_149 : f32 to vector<2x8x8xf32>
    %301 = arith.mulf %299, %300 : vector<2x8x8xf32>
    %cst_150 = arith.constant -1.000000e+09 : f32
    %302 = vector.broadcast %cst_150 : f32 to vector<2x8x8xf32>
    %303 = arith.select %18, %302, %301 : vector<2x8x8xi1>, vector<2x8x8xf32>
    %cst_151 = arith.constant dense<0xFF800000> : vector<2x8xf32>
    %304 = vector.multi_reduction <maximumf>, %303, %cst_151 [2] : vector<2x8x8xf32> to vector<2x8xf32>
    %305 = vector.shape_cast %304 : vector<2x8xf32> to vector<2x8x1xf32>
    %306 = vector.broadcast %305 : vector<2x8x1xf32> to vector<2x8x8xf32>
    %307 = arith.subf %303, %306 : vector<2x8x8xf32>
    %308 = math.exp %307 : vector<2x8x8xf32>
    %cst_152 = arith.constant dense<0.000000e+00> : vector<2x8xf32>
    %309 = vector.multi_reduction <add>, %308, %cst_152 [2] : vector<2x8x8xf32> to vector<2x8xf32>
    %310 = vector.shape_cast %309 : vector<2x8xf32> to vector<2x8x1xf32>
    %311 = tpu.reciprocal %310 {approx = true} : vector<2x8x1xf32> -> vector<2x8x1xf32>
    %312 = vector.broadcast %311 : vector<2x8x1xf32> to vector<2x8x8xf32>
    %313 = arith.mulf %308, %312 : vector<2x8x8xf32>
    %314 = vector.extract_strided_slice %296 {offsets = [0, 0, 0], sizes = [2, 8, 8], strides = [1, 1, 1]} : vector<2x8x16xf32> to vector<2x8x8xf32>
    "tpu.trace_start"() <{level = 10 : i32, message = "bqk,bkd->bqd"}> : () -> ()
    %cst_153 = arith.constant dense<0.000000e+00> : vector<2x8x8xf32>
    %315 = tpu.matmul %313, %314, %cst_153 {dimension_numbers = #tpu.dot_dimension_numbers<[2], [1], [1], [2], [0, 0, 0, 1, 1, 2], [0], [0]>} : vector<2x8x8xf32>, vector<2x8x8xf32>, vector<2x8x8xf32> -> vector<2x8x8xf32>
    "tpu.trace_stop"() : () -> ()
    %316 = vector.extract_strided_slice %294 {offsets = [0, 0, 8], sizes = [2, 8, 8], strides = [1, 1, 1]} : vector<2x8x16xf32> to vector<2x8x8xf32>
    %317 = vector.extract_strided_slice %295 {offsets = [0, 0, 8], sizes = [2, 8, 8], strides = [1, 1, 1]} : vector<2x8x16xf32> to vector<2x8x8xf32>
    "tpu.trace_start"() <{level = 10 : i32, message = "bqd,bkd->bqk"}> : () -> ()
    %cst_154 = arith.constant dense<0.000000e+00> : vector<2x8x8xf32>
    %318 = tpu.matmul %316, %317, %cst_154 {dimension_numbers = #tpu.dot_dimension_numbers<[2], [2], [1], [1], [0, 0, 0, 1, 1, 1], [0], [0]>} : vector<2x8x8xf32>, vector<2x8x8xf32>, vector<2x8x8xf32> -> vector<2x8x8xf32>
    "tpu.trace_stop"() : () -> ()
    %cst_155 = arith.constant 0.353553385 : f32
    %319 = vector.broadcast %cst_155 : f32 to vector<2x8x8xf32>
    %320 = arith.mulf %318, %319 : vector<2x8x8xf32>
    %cst_156 = arith.constant -1.000000e+09 : f32
    %321 = vector.broadcast %cst_156 : f32 to vector<2x8x8xf32>
    %322 = arith.select %18, %321, %320 : vector<2x8x8xi1>, vector<2x8x8xf32>
    %cst_157 = arith.constant dense<0xFF800000> : vector<2x8xf32>
    %323 = vector.multi_reduction <maximumf>, %322, %cst_157 [2] : vector<2x8x8xf32> to vector<2x8xf32>
    %324 = vector.shape_cast %323 : vector<2x8xf32> to vector<2x8x1xf32>
    %325 = vector.broadcast %324 : vector<2x8x1xf32> to vector<2x8x8xf32>
    %326 = arith.subf %322, %325 : vector<2x8x8xf32>
    %327 = math.exp %326 : vector<2x8x8xf32>
    %cst_158 = arith.constant dense<0.000000e+00> : vector<2x8xf32>
    %328 = vector.multi_reduction <add>, %327, %cst_158 [2] : vector<2x8x8xf32> to vector<2x8xf32>
    %329 = vector.shape_cast %328 : vector<2x8xf32> to vector<2x8x1xf32>
    %330 = tpu.reciprocal %329 {approx = true} : vector<2x8x1xf32> -> vector<2x8x1xf32>
    %331 = vector.broadcast %330 : vector<2x8x1xf32> to vector<2x8x8xf32>
    %332 = arith.mulf %327, %331 : vector<2x8x8xf32>
    %333 = vector.extract_strided_slice %296 {offsets = [0, 0, 8], sizes = [2, 8, 8], strides = [1, 1, 1]} : vector<2x8x16xf32> to vector<2x8x8xf32>
    "tpu.trace_start"() <{level = 10 : i32, message = "bqk,bkd->bqd"}> : () -> ()
    %cst_159 = arith.constant dense<0.000000e+00> : vector<2x8x8xf32>
    %334 = tpu.matmul %332, %333, %cst_159 {dimension_numbers = #tpu.dot_dimension_numbers<[2], [1], [1], [2], [0, 0, 0, 1, 1, 2], [0], [0]>} : vector<2x8x8xf32>, vector<2x8x8xf32>, vector<2x8x8xf32> -> vector<2x8x8xf32>
    "tpu.trace_stop"() : () -> ()
    %335 = tpu.concatenate %315, %334 in 2 : vector<2x8x8xf32>, vector<2x8x8xf32> -> vector<2x8x16xf32>
    %336 = vector.shape_cast %335 : vector<2x8x16xf32> to vector<16x16xf32>
    %cst_160 = arith.constant dense<0.000000e+00> : vector<16x16xf32>
    %337 = tpu.matmul %336, %285, %cst_160 {dimension_numbers = #tpu.dot_dimension_numbers<[1], [0], [0], [1], [0, 0, 1, 1], [], []>} : vector<16x16xf32>, vector<16x16xf32>, vector<16x16xf32> -> vector<16x16xf32>
    %338 = vector.broadcast %287 : vector<1x16xf32> to vector<16x16xf32>
    %339 = arith.addf %337, %338 : vector<16x16xf32>
    %340 = arith.addf %3, %339 : vector<16x16xf32>
    %c0_161 = arith.constant 0 : index
    %c0_162 = arith.constant 0 : index
    %c0_163 = arith.constant 0 : index
    %341 = vector.load %arg20[%c0_161, %c0_162, %c0_163] : memref<2x1x16xf32, #tpu.memory_space<vmem>>, vector<1x1x16xf32>
    %342 = vector.shape_cast %341 : vector<1x1x16xf32> to vector<1x16xf32>
    %c0_164 = arith.constant 0 : index
    %c0_165 = arith.constant 0 : index
    %c0_166 = arith.constant 0 : index
    %343 = vector.load %arg21[%c0_164, %c0_165, %c0_166] : memref<2x1x16xf32, #tpu.memory_space<vmem>>, vector<1x1x16xf32>
    %344 = vector.shape_cast %343 : vector<1x1x16xf32> to vector<1x16xf32>
    %cst_167 = arith.constant dense<0.000000e+00> : vector<16xf32>
    %345 = vector.multi_reduction <add>, %340, %cst_167 [1] : vector<16x16xf32> to vector<16xf32>
    %346 = vector.shape_cast %345 : vector<16xf32> to vector<16x1xf32>
    %cst_168 = arith.constant 1.600000e+01 : f32
    %347 = vector.broadcast %cst_168 : f32 to vector<16x1xf32>
    %348 = arith.divf %346, %347 : vector<16x1xf32>
    %349 = vector.broadcast %348 : vector<16x1xf32> to vector<16x16xf32>
    %350 = arith.subf %340, %349 : vector<16x16xf32>
    %351 = arith.mulf %350, %350 : vector<16x16xf32>
    %cst_169 = arith.constant dense<0.000000e+00> : vector<16xf32>
    %352 = vector.multi_reduction <add>, %351, %cst_169 [1] : vector<16x16xf32> to vector<16xf32>
    %353 = vector.shape_cast %352 : vector<16xf32> to vector<16x1xf32>
    %cst_170 = arith.constant 1.600000e+01 : f32
    %354 = vector.broadcast %cst_170 : f32 to vector<16x1xf32>
    %355 = arith.divf %353, %354 : vector<16x1xf32>
    %cst_171 = arith.constant 9.99999974E-6 : f32
    %356 = vector.broadcast %cst_171 : f32 to vector<16x1xf32>
    %357 = arith.addf %355, %356 : vector<16x1xf32>
    %358 = math.rsqrt %357 : vector<16x1xf32>
    %359 = vector.broadcast %358 : vector<16x1xf32> to vector<16x16xf32>
    %360 = arith.mulf %350, %359 : vector<16x16xf32>
    %361 = vector.broadcast %342 : vector<1x16xf32> to vector<16x16xf32>
    %362 = arith.mulf %360, %361 : vector<16x16xf32>
    %363 = vector.broadcast %344 : vector<1x16xf32> to vector<16x16xf32>
    %364 = arith.addf %362, %363 : vector<16x16xf32>
    %c0_172 = arith.constant 0 : index
    %c0_173 = arith.constant 0 : index
    %c0_174 = arith.constant 0 : index
    %365 = vector.load %arg22[%c0_172, %c0_173, %c0_174] : memref<2x16x48xf32, #tpu.memory_space<vmem>>, vector<1x16x48xf32>
    %366 = vector.shape_cast %365 : vector<1x16x48xf32> to vector<16x48xf32>
    %c0_175 = arith.constant 0 : index
    %c0_176 = arith.constant 0 : index
    %c0_177 = arith.constant 0 : index
    %367 = vector.load %arg23[%c0_175, %c0_176, %c0_177] : memref<2x1x48xf32, #tpu.memory_space<vmem>>, vector<1x1x48xf32>
    %368 = vector.shape_cast %367 : vector<1x1x48xf32> to vector<1x48xf32>
    %c0_178 = arith.constant 0 : index
    %c0_179 = arith.constant 0 : index
    %c0_180 = arith.constant 0 : index
    %369 = vector.load %arg24[%c0_178, %c0_179, %c0_180] : memref<2x16x16xf32, #tpu.memory_space<vmem>>, vector<1x16x16xf32>
    %370 = vector.shape_cast %369 : vector<1x16x16xf32> to vector<16x16xf32>
    %c0_181 = arith.constant 0 : index
    %c0_182 = arith.constant 0 : index
    %c0_183 = arith.constant 0 : index
    %371 = vector.load %arg25[%c0_181, %c0_182, %c0_183] : memref<2x1x16xf32, #tpu.memory_space<vmem>>, vector<1x1x16xf32>
    %372 = vector.shape_cast %371 : vector<1x1x16xf32> to vector<1x16xf32>
    %373 = vector.extract_strided_slice %366 {offsets = [0, 0], sizes = [16, 16], strides = [1, 1]} : vector<16x48xf32> to vector<16x16xf32>
    %cst_184 = arith.constant dense<0.000000e+00> : vector<16x16xf32>
    %374 = tpu.matmul %364, %373, %cst_184 {dimension_numbers = #tpu.dot_dimension_numbers<[1], [0], [0], [1], [0, 0, 1, 1], [], []>} : vector<16x16xf32>, vector<16x16xf32>, vector<16x16xf32> -> vector<16x16xf32>
    %375 = vector.extract_strided_slice %368 {offsets = [0, 0], sizes = [1, 16], strides = [1, 1]} : vector<1x48xf32> to vector<1x16xf32>
    %376 = vector.broadcast %375 : vector<1x16xf32> to vector<16x16xf32>
    %377 = arith.addf %374, %376 : vector<16x16xf32>
    %378 = vector.extract_strided_slice %366 {offsets = [0, 16], sizes = [16, 32], strides = [1, 1]} : vector<16x48xf32> to vector<16x32xf32>
    %cst_185 = arith.constant dense<0.000000e+00> : vector<16x32xf32>
    %379 = tpu.matmul %279, %378, %cst_185 {dimension_numbers = #tpu.dot_dimension_numbers<[1], [0], [0], [1], [0, 0, 1, 1], [], []>} : vector<16x16xf32>, vector<16x32xf32>, vector<16x32xf32> -> vector<16x32xf32>
    %380 = vector.extract_strided_slice %368 {offsets = [0, 16], sizes = [1, 32], strides = [1, 1]} : vector<1x48xf32> to vector<1x32xf32>
    %381 = vector.broadcast %380 : vector<1x32xf32> to vector<16x32xf32>
    %382 = arith.addf %379, %381 : vector<16x32xf32>
    %383 = vector.extract_strided_slice %382 {offsets = [0, 0], sizes = [16, 16], strides = [1, 1]} : vector<16x32xf32> to vector<16x16xf32>
    %384 = vector.extract_strided_slice %382 {offsets = [0, 16], sizes = [16, 16], strides = [1, 1]} : vector<16x32xf32> to vector<16x16xf32>
    %385 = vector.shape_cast %377 : vector<16x16xf32> to vector<2x8x16xf32>
    %386 = vector.shape_cast %383 : vector<16x16xf32> to vector<2x8x16xf32>
    %387 = vector.shape_cast %384 : vector<16x16xf32> to vector<2x8x16xf32>
    %388 = vector.extract_strided_slice %385 {offsets = [0, 0, 0], sizes = [2, 8, 8], strides = [1, 1, 1]} : vector<2x8x16xf32> to vector<2x8x8xf32>
    %389 = vector.extract_strided_slice %386 {offsets = [0, 0, 0], sizes = [2, 8, 8], strides = [1, 1, 1]} : vector<2x8x16xf32> to vector<2x8x8xf32>
    "tpu.trace_start"() <{level = 10 : i32, message = "bqd,bkd->bqk"}> : () -> ()
    %cst_186 = arith.constant dense<0.000000e+00> : vector<2x8x8xf32>
    %390 = tpu.matmul %388, %389, %cst_186 {dimension_numbers = #tpu.dot_dimension_numbers<[2], [2], [1], [1], [0, 0, 0, 1, 1, 1], [0], [0]>} : vector<2x8x8xf32>, vector<2x8x8xf32>, vector<2x8x8xf32> -> vector<2x8x8xf32>
    "tpu.trace_stop"() : () -> ()
    %cst_187 = arith.constant 0.353553385 : f32
    %391 = vector.broadcast %cst_187 : f32 to vector<2x8x8xf32>
    %392 = arith.mulf %390, %391 : vector<2x8x8xf32>
    %cst_188 = arith.constant -1.000000e+09 : f32
    %393 = vector.shape_cast %19 : vector<2x1x8xi1> to vector<2x1x8xi1>
    %394 = vector.broadcast %393 : vector<2x1x8xi1> to vector<2x8x8xi1>
    %395 = vector.broadcast %cst_188 : f32 to vector<2x8x8xf32>
    %396 = arith.select %394, %395, %392 : vector<2x8x8xi1>, vector<2x8x8xf32>
    %cst_189 = arith.constant dense<0xFF800000> : vector<2x8xf32>
    %397 = vector.multi_reduction <maximumf>, %396, %cst_189 [2] : vector<2x8x8xf32> to vector<2x8xf32>
    %398 = vector.shape_cast %397 : vector<2x8xf32> to vector<2x8x1xf32>
    %399 = vector.broadcast %398 : vector<2x8x1xf32> to vector<2x8x8xf32>
    %400 = arith.subf %396, %399 : vector<2x8x8xf32>
    %401 = math.exp %400 : vector<2x8x8xf32>
    %cst_190 = arith.constant dense<0.000000e+00> : vector<2x8xf32>
    %402 = vector.multi_reduction <add>, %401, %cst_190 [2] : vector<2x8x8xf32> to vector<2x8xf32>
    %403 = vector.shape_cast %402 : vector<2x8xf32> to vector<2x8x1xf32>
    %404 = tpu.reciprocal %403 {approx = true} : vector<2x8x1xf32> -> vector<2x8x1xf32>
    %405 = vector.broadcast %404 : vector<2x8x1xf32> to vector<2x8x8xf32>
    %406 = arith.mulf %401, %405 : vector<2x8x8xf32>
    %407 = vector.extract_strided_slice %387 {offsets = [0, 0, 0], sizes = [2, 8, 8], strides = [1, 1, 1]} : vector<2x8x16xf32> to vector<2x8x8xf32>
    "tpu.trace_start"() <{level = 10 : i32, message = "bqk,bkd->bqd"}> : () -> ()
    %cst_191 = arith.constant dense<0.000000e+00> : vector<2x8x8xf32>
    %408 = tpu.matmul %406, %407, %cst_191 {dimension_numbers = #tpu.dot_dimension_numbers<[2], [1], [1], [2], [0, 0, 0, 1, 1, 2], [0], [0]>} : vector<2x8x8xf32>, vector<2x8x8xf32>, vector<2x8x8xf32> -> vector<2x8x8xf32>
    "tpu.trace_stop"() : () -> ()
    %409 = vector.extract_strided_slice %385 {offsets = [0, 0, 8], sizes = [2, 8, 8], strides = [1, 1, 1]} : vector<2x8x16xf32> to vector<2x8x8xf32>
    %410 = vector.extract_strided_slice %386 {offsets = [0, 0, 8], sizes = [2, 8, 8], strides = [1, 1, 1]} : vector<2x8x16xf32> to vector<2x8x8xf32>
    "tpu.trace_start"() <{level = 10 : i32, message = "bqd,bkd->bqk"}> : () -> ()
    %cst_192 = arith.constant dense<0.000000e+00> : vector<2x8x8xf32>
    %411 = tpu.matmul %409, %410, %cst_192 {dimension_numbers = #tpu.dot_dimension_numbers<[2], [2], [1], [1], [0, 0, 0, 1, 1, 1], [0], [0]>} : vector<2x8x8xf32>, vector<2x8x8xf32>, vector<2x8x8xf32> -> vector<2x8x8xf32>
    "tpu.trace_stop"() : () -> ()
    %cst_193 = arith.constant 0.353553385 : f32
    %412 = vector.broadcast %cst_193 : f32 to vector<2x8x8xf32>
    %413 = arith.mulf %411, %412 : vector<2x8x8xf32>
    %cst_194 = arith.constant -1.000000e+09 : f32
    %414 = vector.shape_cast %19 : vector<2x1x8xi1> to vector<2x1x8xi1>
    %415 = vector.broadcast %414 : vector<2x1x8xi1> to vector<2x8x8xi1>
    %416 = vector.broadcast %cst_194 : f32 to vector<2x8x8xf32>
    %417 = arith.select %415, %416, %413 : vector<2x8x8xi1>, vector<2x8x8xf32>
    %cst_195 = arith.constant dense<0xFF800000> : vector<2x8xf32>
    %418 = vector.multi_reduction <maximumf>, %417, %cst_195 [2] : vector<2x8x8xf32> to vector<2x8xf32>
    %419 = vector.shape_cast %418 : vector<2x8xf32> to vector<2x8x1xf32>
    %420 = vector.broadcast %419 : vector<2x8x1xf32> to vector<2x8x8xf32>
    %421 = arith.subf %417, %420 : vector<2x8x8xf32>
    %422 = math.exp %421 : vector<2x8x8xf32>
    %cst_196 = arith.constant dense<0.000000e+00> : vector<2x8xf32>
    %423 = vector.multi_reduction <add>, %422, %cst_196 [2] : vector<2x8x8xf32> to vector<2x8xf32>
    %424 = vector.shape_cast %423 : vector<2x8xf32> to vector<2x8x1xf32>
    %425 = tpu.reciprocal %424 {approx = true} : vector<2x8x1xf32> -> vector<2x8x1xf32>
    %426 = vector.broadcast %425 : vector<2x8x1xf32> to vector<2x8x8xf32>
    %427 = arith.mulf %422, %426 : vector<2x8x8xf32>
    %428 = vector.extract_strided_slice %387 {offsets = [0, 0, 8], sizes = [2, 8, 8], strides = [1, 1, 1]} : vector<2x8x16xf32> to vector<2x8x8xf32>
    "tpu.trace_start"() <{level = 10 : i32, message = "bqk,bkd->bqd"}> : () -> ()
    %cst_197 = arith.constant dense<0.000000e+00> : vector<2x8x8xf32>
    %429 = tpu.matmul %427, %428, %cst_197 {dimension_numbers = #tpu.dot_dimension_numbers<[2], [1], [1], [2], [0, 0, 0, 1, 1, 2], [0], [0]>} : vector<2x8x8xf32>, vector<2x8x8xf32>, vector<2x8x8xf32> -> vector<2x8x8xf32>
    "tpu.trace_stop"() : () -> ()
    %430 = tpu.concatenate %408, %429 in 2 : vector<2x8x8xf32>, vector<2x8x8xf32> -> vector<2x8x16xf32>
    %431 = vector.shape_cast %430 : vector<2x8x16xf32> to vector<16x16xf32>
    %cst_198 = arith.constant dense<0.000000e+00> : vector<16x16xf32>
    %432 = tpu.matmul %431, %370, %cst_198 {dimension_numbers = #tpu.dot_dimension_numbers<[1], [0], [0], [1], [0, 0, 1, 1], [], []>} : vector<16x16xf32>, vector<16x16xf32>, vector<16x16xf32> -> vector<16x16xf32>
    %433 = vector.broadcast %372 : vector<1x16xf32> to vector<16x16xf32>
    %434 = arith.addf %432, %433 : vector<16x16xf32>
    %435 = arith.addf %364, %434 : vector<16x16xf32>
    %c0_199 = arith.constant 0 : index
    %c0_200 = arith.constant 0 : index
    %c0_201 = arith.constant 0 : index
    %436 = vector.load %arg26[%c0_199, %c0_200, %c0_201] : memref<2x1x16xf32, #tpu.memory_space<vmem>>, vector<1x1x16xf32>
    %437 = vector.shape_cast %436 : vector<1x1x16xf32> to vector<1x16xf32>
    %c0_202 = arith.constant 0 : index
    %c0_203 = arith.constant 0 : index
    %c0_204 = arith.constant 0 : index
    %438 = vector.load %arg27[%c0_202, %c0_203, %c0_204] : memref<2x1x16xf32, #tpu.memory_space<vmem>>, vector<1x1x16xf32>
    %439 = vector.shape_cast %438 : vector<1x1x16xf32> to vector<1x16xf32>
    %cst_205 = arith.constant dense<0.000000e+00> : vector<16xf32>
    %440 = vector.multi_reduction <add>, %435, %cst_205 [1] : vector<16x16xf32> to vector<16xf32>
    %441 = vector.shape_cast %440 : vector<16xf32> to vector<16x1xf32>
    %cst_206 = arith.constant 1.600000e+01 : f32
    %442 = vector.broadcast %cst_206 : f32 to vector<16x1xf32>
    %443 = arith.divf %441, %442 : vector<16x1xf32>
    %444 = vector.broadcast %443 : vector<16x1xf32> to vector<16x16xf32>
    %445 = arith.subf %435, %444 : vector<16x16xf32>
    %446 = arith.mulf %445, %445 : vector<16x16xf32>
    %cst_207 = arith.constant dense<0.000000e+00> : vector<16xf32>
    %447 = vector.multi_reduction <add>, %446, %cst_207 [1] : vector<16x16xf32> to vector<16xf32>
    %448 = vector.shape_cast %447 : vector<16xf32> to vector<16x1xf32>
    %cst_208 = arith.constant 1.600000e+01 : f32
    %449 = vector.broadcast %cst_208 : f32 to vector<16x1xf32>
    %450 = arith.divf %448, %449 : vector<16x1xf32>
    %cst_209 = arith.constant 9.99999974E-6 : f32
    %451 = vector.broadcast %cst_209 : f32 to vector<16x1xf32>
    %452 = arith.addf %450, %451 : vector<16x1xf32>
    %453 = math.rsqrt %452 : vector<16x1xf32>
    %454 = vector.broadcast %453 : vector<16x1xf32> to vector<16x16xf32>
    %455 = arith.mulf %445, %454 : vector<16x16xf32>
    %456 = vector.broadcast %437 : vector<1x16xf32> to vector<16x16xf32>
    %457 = arith.mulf %455, %456 : vector<16x16xf32>
    %458 = vector.broadcast %439 : vector<1x16xf32> to vector<16x16xf32>
    %459 = arith.addf %457, %458 : vector<16x16xf32>
    %c0_210 = arith.constant 0 : index
    %c0_211 = arith.constant 0 : index
    %c0_212 = arith.constant 0 : index
    %460 = vector.load %arg28[%c0_210, %c0_211, %c0_212] : memref<2x16x32xf32, #tpu.memory_space<vmem>>, vector<1x16x32xf32>
    %461 = vector.shape_cast %460 : vector<1x16x32xf32> to vector<16x32xf32>
    %c0_213 = arith.constant 0 : index
    %c0_214 = arith.constant 0 : index
    %c0_215 = arith.constant 0 : index
    %462 = vector.load %arg29[%c0_213, %c0_214, %c0_215] : memref<2x1x32xf32, #tpu.memory_space<vmem>>, vector<1x1x32xf32>
    %463 = vector.shape_cast %462 : vector<1x1x32xf32> to vector<1x32xf32>
    %c0_216 = arith.constant 0 : index
    %c0_217 = arith.constant 0 : index
    %c0_218 = arith.constant 0 : index
    %464 = vector.load %arg30[%c0_216, %c0_217, %c0_218] : memref<2x32x16xf32, #tpu.memory_space<vmem>>, vector<1x32x16xf32>
    %465 = vector.shape_cast %464 : vector<1x32x16xf32> to vector<32x16xf32>
    %c0_219 = arith.constant 0 : index
    %c0_220 = arith.constant 0 : index
    %c0_221 = arith.constant 0 : index
    %466 = vector.load %arg31[%c0_219, %c0_220, %c0_221] : memref<2x1x16xf32, #tpu.memory_space<vmem>>, vector<1x1x16xf32>
    %467 = vector.shape_cast %466 : vector<1x1x16xf32> to vector<1x16xf32>
    %cst_222 = arith.constant dense<0.000000e+00> : vector<16x32xf32>
    %468 = tpu.matmul %459, %461, %cst_222 {dimension_numbers = #tpu.dot_dimension_numbers<[1], [0], [0], [1], [0, 0, 1, 1], [], []>} : vector<16x16xf32>, vector<16x32xf32>, vector<16x32xf32> -> vector<16x32xf32>
    %469 = vector.broadcast %463 : vector<1x32xf32> to vector<16x32xf32>
    %470 = arith.addf %468, %469 : vector<16x32xf32>
    %cst_223 = arith.constant 0.000000e+00 : f32
    %471 = vector.broadcast %cst_223 : f32 to vector<16x32xf32>
    %472 = arith.maximumf %470, %471 : vector<16x32xf32>
    %cst_224 = arith.constant dense<0.000000e+00> : vector<16x16xf32>
    %473 = tpu.matmul %472, %465, %cst_224 {dimension_numbers = #tpu.dot_dimension_numbers<[1], [0], [0], [1], [0, 0, 1, 1], [], []>} : vector<16x32xf32>, vector<32x16xf32>, vector<16x16xf32> -> vector<16x16xf32>
    %474 = vector.broadcast %467 : vector<1x16xf32> to vector<16x16xf32>
    %475 = arith.addf %473, %474 : vector<16x16xf32>
    %476 = arith.addf %459, %475 : vector<16x16xf32>
    %c0_225 = arith.constant 0 : index
    %c0_226 = arith.constant 0 : index
    %c0_227 = arith.constant 0 : index
    %477 = vector.load %arg32[%c0_225, %c0_226, %c0_227] : memref<2x1x16xf32, #tpu.memory_space<vmem>>, vector<1x1x16xf32>
    %478 = vector.shape_cast %477 : vector<1x1x16xf32> to vector<1x16xf32>
    %c0_228 = arith.constant 0 : index
    %c0_229 = arith.constant 0 : index
    %c0_230 = arith.constant 0 : index
    %479 = vector.load %arg33[%c0_228, %c0_229, %c0_230] : memref<2x1x16xf32, #tpu.memory_space<vmem>>, vector<1x1x16xf32>
    %480 = vector.shape_cast %479 : vector<1x1x16xf32> to vector<1x16xf32>
    %cst_231 = arith.constant dense<0.000000e+00> : vector<16xf32>
    %481 = vector.multi_reduction <add>, %476, %cst_231 [1] : vector<16x16xf32> to vector<16xf32>
    %482 = vector.shape_cast %481 : vector<16xf32> to vector<16x1xf32>
    %cst_232 = arith.constant 1.600000e+01 : f32
    %483 = vector.broadcast %cst_232 : f32 to vector<16x1xf32>
    %484 = arith.divf %482, %483 : vector<16x1xf32>
    %485 = vector.broadcast %484 : vector<16x1xf32> to vector<16x16xf32>
    %486 = arith.subf %476, %485 : vector<16x16xf32>
    %487 = arith.mulf %486, %486 : vector<16x16xf32>
    %cst_233 = arith.constant dense<0.000000e+00> : vector<16xf32>
    %488 = vector.multi_reduction <add>, %487, %cst_233 [1] : vector<16x16xf32> to vector<16xf32>
    %489 = vector.shape_cast %488 : vector<16xf32> to vector<16x1xf32>
    %cst_234 = arith.constant 1.600000e+01 : f32
    %490 = vector.broadcast %cst_234 : f32 to vector<16x1xf32>
    %491 = arith.divf %489, %490 : vector<16x1xf32>
    %cst_235 = arith.constant 9.99999974E-6 : f32
    %492 = vector.broadcast %cst_235 : f32 to vector<16x1xf32>
    %493 = arith.addf %491, %492 : vector<16x1xf32>
    %494 = math.rsqrt %493 : vector<16x1xf32>
    %495 = vector.broadcast %494 : vector<16x1xf32> to vector<16x16xf32>
    %496 = arith.mulf %486, %495 : vector<16x16xf32>
    %497 = vector.broadcast %478 : vector<1x16xf32> to vector<16x16xf32>
    %498 = arith.mulf %496, %497 : vector<16x16xf32>
    %499 = vector.broadcast %480 : vector<1x16xf32> to vector<16x16xf32>
    %500 = arith.addf %498, %499 : vector<16x16xf32>
    %c1_236 = arith.constant 1 : index
    %c0_237 = arith.constant 0 : index
    %c0_238 = arith.constant 0 : index
    %501 = vector.load %arg16[%c1_236, %c0_237, %c0_238] : memref<2x16x48xf32, #tpu.memory_space<vmem>>, vector<1x16x48xf32>
    %502 = vector.shape_cast %501 : vector<1x16x48xf32> to vector<16x48xf32>
    %c1_239 = arith.constant 1 : index
    %c0_240 = arith.constant 0 : index
    %c0_241 = arith.constant 0 : index
    %503 = vector.load %arg17[%c1_239, %c0_240, %c0_241] : memref<2x1x48xf32, #tpu.memory_space<vmem>>, vector<1x1x48xf32>
    %504 = vector.shape_cast %503 : vector<1x1x48xf32> to vector<1x48xf32>
    %c1_242 = arith.constant 1 : index
    %c0_243 = arith.constant 0 : index
    %c0_244 = arith.constant 0 : index
    %505 = vector.load %arg18[%c1_242, %c0_243, %c0_244] : memref<2x16x16xf32, #tpu.memory_space<vmem>>, vector<1x16x16xf32>
    %506 = vector.shape_cast %505 : vector<1x16x16xf32> to vector<16x16xf32>
    %c1_245 = arith.constant 1 : index
    %c0_246 = arith.constant 0 : index
    %c0_247 = arith.constant 0 : index
    %507 = vector.load %arg19[%c1_245, %c0_246, %c0_247] : memref<2x1x16xf32, #tpu.memory_space<vmem>>, vector<1x1x16xf32>
    %508 = vector.shape_cast %507 : vector<1x1x16xf32> to vector<1x16xf32>
    %cst_248 = arith.constant dense<0.000000e+00> : vector<16x48xf32>
    %509 = tpu.matmul %500, %502, %cst_248 {dimension_numbers = #tpu.dot_dimension_numbers<[1], [0], [0], [1], [0, 0, 1, 1], [], []>} : vector<16x16xf32>, vector<16x48xf32>, vector<16x48xf32> -> vector<16x48xf32>
    %510 = vector.broadcast %504 : vector<1x48xf32> to vector<16x48xf32>
    %511 = arith.addf %509, %510 : vector<16x48xf32>
    %512 = vector.extract_strided_slice %511 {offsets = [0, 0], sizes = [16, 16], strides = [1, 1]} : vector<16x48xf32> to vector<16x16xf32>
    %513 = vector.extract_strided_slice %511 {offsets = [0, 16], sizes = [16, 16], strides = [1, 1]} : vector<16x48xf32> to vector<16x16xf32>
    %514 = vector.extract_strided_slice %511 {offsets = [0, 32], sizes = [16, 16], strides = [1, 1]} : vector<16x48xf32> to vector<16x16xf32>
    %515 = vector.shape_cast %512 : vector<16x16xf32> to vector<2x8x16xf32>
    %516 = vector.shape_cast %513 : vector<16x16xf32> to vector<2x8x16xf32>
    %517 = vector.shape_cast %514 : vector<16x16xf32> to vector<2x8x16xf32>
    %518 = vector.extract_strided_slice %515 {offsets = [0, 0, 0], sizes = [2, 8, 8], strides = [1, 1, 1]} : vector<2x8x16xf32> to vector<2x8x8xf32>
    %519 = vector.extract_strided_slice %516 {offsets = [0, 0, 0], sizes = [2, 8, 8], strides = [1, 1, 1]} : vector<2x8x16xf32> to vector<2x8x8xf32>
    "tpu.trace_start"() <{level = 10 : i32, message = "bqd,bkd->bqk"}> : () -> ()
    %cst_249 = arith.constant dense<0.000000e+00> : vector<2x8x8xf32>
    %520 = tpu.matmul %518, %519, %cst_249 {dimension_numbers = #tpu.dot_dimension_numbers<[2], [2], [1], [1], [0, 0, 0, 1, 1, 1], [0], [0]>} : vector<2x8x8xf32>, vector<2x8x8xf32>, vector<2x8x8xf32> -> vector<2x8x8xf32>
    "tpu.trace_stop"() : () -> ()
    %cst_250 = arith.constant 0.353553385 : f32
    %521 = vector.broadcast %cst_250 : f32 to vector<2x8x8xf32>
    %522 = arith.mulf %520, %521 : vector<2x8x8xf32>
    %cst_251 = arith.constant -1.000000e+09 : f32
    %523 = vector.broadcast %cst_251 : f32 to vector<2x8x8xf32>
    %524 = arith.select %18, %523, %522 : vector<2x8x8xi1>, vector<2x8x8xf32>
    %cst_252 = arith.constant dense<0xFF800000> : vector<2x8xf32>
    %525 = vector.multi_reduction <maximumf>, %524, %cst_252 [2] : vector<2x8x8xf32> to vector<2x8xf32>
    %526 = vector.shape_cast %525 : vector<2x8xf32> to vector<2x8x1xf32>
    %527 = vector.broadcast %526 : vector<2x8x1xf32> to vector<2x8x8xf32>
    %528 = arith.subf %524, %527 : vector<2x8x8xf32>
    %529 = math.exp %528 : vector<2x8x8xf32>
    %cst_253 = arith.constant dense<0.000000e+00> : vector<2x8xf32>
    %530 = vector.multi_reduction <add>, %529, %cst_253 [2] : vector<2x8x8xf32> to vector<2x8xf32>
    %531 = vector.shape_cast %530 : vector<2x8xf32> to vector<2x8x1xf32>
    %532 = tpu.reciprocal %531 {approx = true} : vector<2x8x1xf32> -> vector<2x8x1xf32>
    %533 = vector.broadcast %532 : vector<2x8x1xf32> to vector<2x8x8xf32>
    %534 = arith.mulf %529, %533 : vector<2x8x8xf32>
    %535 = vector.extract_strided_slice %517 {offsets = [0, 0, 0], sizes = [2, 8, 8], strides = [1, 1, 1]} : vector<2x8x16xf32> to vector<2x8x8xf32>
    "tpu.trace_start"() <{level = 10 : i32, message = "bqk,bkd->bqd"}> : () -> ()
    %cst_254 = arith.constant dense<0.000000e+00> : vector<2x8x8xf32>
    %536 = tpu.matmul %534, %535, %cst_254 {dimension_numbers = #tpu.dot_dimension_numbers<[2], [1], [1], [2], [0, 0, 0, 1, 1, 2], [0], [0]>} : vector<2x8x8xf32>, vector<2x8x8xf32>, vector<2x8x8xf32> -> vector<2x8x8xf32>
    "tpu.trace_stop"() : () -> ()
    %537 = vector.extract_strided_slice %515 {offsets = [0, 0, 8], sizes = [2, 8, 8], strides = [1, 1, 1]} : vector<2x8x16xf32> to vector<2x8x8xf32>
    %538 = vector.extract_strided_slice %516 {offsets = [0, 0, 8], sizes = [2, 8, 8], strides = [1, 1, 1]} : vector<2x8x16xf32> to vector<2x8x8xf32>
    "tpu.trace_start"() <{level = 10 : i32, message = "bqd,bkd->bqk"}> : () -> ()
    %cst_255 = arith.constant dense<0.000000e+00> : vector<2x8x8xf32>
    %539 = tpu.matmul %537, %538, %cst_255 {dimension_numbers = #tpu.dot_dimension_numbers<[2], [2], [1], [1], [0, 0, 0, 1, 1, 1], [0], [0]>} : vector<2x8x8xf32>, vector<2x8x8xf32>, vector<2x8x8xf32> -> vector<2x8x8xf32>
    "tpu.trace_stop"() : () -> ()
    %cst_256 = arith.constant 0.353553385 : f32
    %540 = vector.broadcast %cst_256 : f32 to vector<2x8x8xf32>
    %541 = arith.mulf %539, %540 : vector<2x8x8xf32>
    %cst_257 = arith.constant -1.000000e+09 : f32
    %542 = vector.broadcast %cst_257 : f32 to vector<2x8x8xf32>
    %543 = arith.select %18, %542, %541 : vector<2x8x8xi1>, vector<2x8x8xf32>
    %cst_258 = arith.constant dense<0xFF800000> : vector<2x8xf32>
    %544 = vector.multi_reduction <maximumf>, %543, %cst_258 [2] : vector<2x8x8xf32> to vector<2x8xf32>
    %545 = vector.shape_cast %544 : vector<2x8xf32> to vector<2x8x1xf32>
    %546 = vector.broadcast %545 : vector<2x8x1xf32> to vector<2x8x8xf32>
    %547 = arith.subf %543, %546 : vector<2x8x8xf32>
    %548 = math.exp %547 : vector<2x8x8xf32>
    %cst_259 = arith.constant dense<0.000000e+00> : vector<2x8xf32>
    %549 = vector.multi_reduction <add>, %548, %cst_259 [2] : vector<2x8x8xf32> to vector<2x8xf32>
    %550 = vector.shape_cast %549 : vector<2x8xf32> to vector<2x8x1xf32>
    %551 = tpu.reciprocal %550 {approx = true} : vector<2x8x1xf32> -> vector<2x8x1xf32>
    %552 = vector.broadcast %551 : vector<2x8x1xf32> to vector<2x8x8xf32>
    %553 = arith.mulf %548, %552 : vector<2x8x8xf32>
    %554 = vector.extract_strided_slice %517 {offsets = [0, 0, 8], sizes = [2, 8, 8], strides = [1, 1, 1]} : vector<2x8x16xf32> to vector<2x8x8xf32>
    "tpu.trace_start"() <{level = 10 : i32, message = "bqk,bkd->bqd"}> : () -> ()
    %cst_260 = arith.constant dense<0.000000e+00> : vector<2x8x8xf32>
    %555 = tpu.matmul %553, %554, %cst_260 {dimension_numbers = #tpu.dot_dimension_numbers<[2], [1], [1], [2], [0, 0, 0, 1, 1, 2], [0], [0]>} : vector<2x8x8xf32>, vector<2x8x8xf32>, vector<2x8x8xf32> -> vector<2x8x8xf32>
    "tpu.trace_stop"() : () -> ()
    %556 = tpu.concatenate %536, %555 in 2 : vector<2x8x8xf32>, vector<2x8x8xf32> -> vector<2x8x16xf32>
    %557 = vector.shape_cast %556 : vector<2x8x16xf32> to vector<16x16xf32>
    %cst_261 = arith.constant dense<0.000000e+00> : vector<16x16xf32>
    %558 = tpu.matmul %557, %506, %cst_261 {dimension_numbers = #tpu.dot_dimension_numbers<[1], [0], [0], [1], [0, 0, 1, 1], [], []>} : vector<16x16xf32>, vector<16x16xf32>, vector<16x16xf32> -> vector<16x16xf32>
    %559 = vector.broadcast %508 : vector<1x16xf32> to vector<16x16xf32>
    %560 = arith.addf %558, %559 : vector<16x16xf32>
    %561 = arith.addf %500, %560 : vector<16x16xf32>
    %c1_262 = arith.constant 1 : index
    %c0_263 = arith.constant 0 : index
    %c0_264 = arith.constant 0 : index
    %562 = vector.load %arg20[%c1_262, %c0_263, %c0_264] : memref<2x1x16xf32, #tpu.memory_space<vmem>>, vector<1x1x16xf32>
    %563 = vector.shape_cast %562 : vector<1x1x16xf32> to vector<1x16xf32>
    %c1_265 = arith.constant 1 : index
    %c0_266 = arith.constant 0 : index
    %c0_267 = arith.constant 0 : index
    %564 = vector.load %arg21[%c1_265, %c0_266, %c0_267] : memref<2x1x16xf32, #tpu.memory_space<vmem>>, vector<1x1x16xf32>
    %565 = vector.shape_cast %564 : vector<1x1x16xf32> to vector<1x16xf32>
    %cst_268 = arith.constant dense<0.000000e+00> : vector<16xf32>
    %566 = vector.multi_reduction <add>, %561, %cst_268 [1] : vector<16x16xf32> to vector<16xf32>
    %567 = vector.shape_cast %566 : vector<16xf32> to vector<16x1xf32>
    %cst_269 = arith.constant 1.600000e+01 : f32
    %568 = vector.broadcast %cst_269 : f32 to vector<16x1xf32>
    %569 = arith.divf %567, %568 : vector<16x1xf32>
    %570 = vector.broadcast %569 : vector<16x1xf32> to vector<16x16xf32>
    %571 = arith.subf %561, %570 : vector<16x16xf32>
    %572 = arith.mulf %571, %571 : vector<16x16xf32>
    %cst_270 = arith.constant dense<0.000000e+00> : vector<16xf32>
    %573 = vector.multi_reduction <add>, %572, %cst_270 [1] : vector<16x16xf32> to vector<16xf32>
    %574 = vector.shape_cast %573 : vector<16xf32> to vector<16x1xf32>
    %cst_271 = arith.constant 1.600000e+01 : f32
    %575 = vector.broadcast %cst_271 : f32 to vector<16x1xf32>
    %576 = arith.divf %574, %575 : vector<16x1xf32>
    %cst_272 = arith.constant 9.99999974E-6 : f32
    %577 = vector.broadcast %cst_272 : f32 to vector<16x1xf32>
    %578 = arith.addf %576, %577 : vector<16x1xf32>
    %579 = math.rsqrt %578 : vector<16x1xf32>
    %580 = vector.broadcast %579 : vector<16x1xf32> to vector<16x16xf32>
    %581 = arith.mulf %571, %580 : vector<16x16xf32>
    %582 = vector.broadcast %563 : vector<1x16xf32> to vector<16x16xf32>
    %583 = arith.mulf %581, %582 : vector<16x16xf32>
    %584 = vector.broadcast %565 : vector<1x16xf32> to vector<16x16xf32>
    %585 = arith.addf %583, %584 : vector<16x16xf32>
    %c1_273 = arith.constant 1 : index
    %c0_274 = arith.constant 0 : index
    %c0_275 = arith.constant 0 : index
    %586 = vector.load %arg22[%c1_273, %c0_274, %c0_275] : memref<2x16x48xf32, #tpu.memory_space<vmem>>, vector<1x16x48xf32>
    %587 = vector.shape_cast %586 : vector<1x16x48xf32> to vector<16x48xf32>
    %c1_276 = arith.constant 1 : index
    %c0_277 = arith.constant 0 : index
    %c0_278 = arith.constant 0 : index
    %588 = vector.load %arg23[%c1_276, %c0_277, %c0_278] : memref<2x1x48xf32, #tpu.memory_space<vmem>>, vector<1x1x48xf32>
    %589 = vector.shape_cast %588 : vector<1x1x48xf32> to vector<1x48xf32>
    %c1_279 = arith.constant 1 : index
    %c0_280 = arith.constant 0 : index
    %c0_281 = arith.constant 0 : index
    %590 = vector.load %arg24[%c1_279, %c0_280, %c0_281] : memref<2x16x16xf32, #tpu.memory_space<vmem>>, vector<1x16x16xf32>
    %591 = vector.shape_cast %590 : vector<1x16x16xf32> to vector<16x16xf32>
    %c1_282 = arith.constant 1 : index
    %c0_283 = arith.constant 0 : index
    %c0_284 = arith.constant 0 : index
    %592 = vector.load %arg25[%c1_282, %c0_283, %c0_284] : memref<2x1x16xf32, #tpu.memory_space<vmem>>, vector<1x1x16xf32>
    %593 = vector.shape_cast %592 : vector<1x1x16xf32> to vector<1x16xf32>
    %594 = vector.extract_strided_slice %587 {offsets = [0, 0], sizes = [16, 16], strides = [1, 1]} : vector<16x48xf32> to vector<16x16xf32>
    %cst_285 = arith.constant dense<0.000000e+00> : vector<16x16xf32>
    %595 = tpu.matmul %585, %594, %cst_285 {dimension_numbers = #tpu.dot_dimension_numbers<[1], [0], [0], [1], [0, 0, 1, 1], [], []>} : vector<16x16xf32>, vector<16x16xf32>, vector<16x16xf32> -> vector<16x16xf32>
    %596 = vector.extract_strided_slice %589 {offsets = [0, 0], sizes = [1, 16], strides = [1, 1]} : vector<1x48xf32> to vector<1x16xf32>
    %597 = vector.broadcast %596 : vector<1x16xf32> to vector<16x16xf32>
    %598 = arith.addf %595, %597 : vector<16x16xf32>
    %599 = vector.extract_strided_slice %587 {offsets = [0, 16], sizes = [16, 32], strides = [1, 1]} : vector<16x48xf32> to vector<16x32xf32>
    %cst_286 = arith.constant dense<0.000000e+00> : vector<16x32xf32>
    %600 = tpu.matmul %279, %599, %cst_286 {dimension_numbers = #tpu.dot_dimension_numbers<[1], [0], [0], [1], [0, 0, 1, 1], [], []>} : vector<16x16xf32>, vector<16x32xf32>, vector<16x32xf32> -> vector<16x32xf32>
    %601 = vector.extract_strided_slice %589 {offsets = [0, 16], sizes = [1, 32], strides = [1, 1]} : vector<1x48xf32> to vector<1x32xf32>
    %602 = vector.broadcast %601 : vector<1x32xf32> to vector<16x32xf32>
    %603 = arith.addf %600, %602 : vector<16x32xf32>
    %604 = vector.extract_strided_slice %603 {offsets = [0, 0], sizes = [16, 16], strides = [1, 1]} : vector<16x32xf32> to vector<16x16xf32>
    %605 = vector.extract_strided_slice %603 {offsets = [0, 16], sizes = [16, 16], strides = [1, 1]} : vector<16x32xf32> to vector<16x16xf32>
    %606 = vector.shape_cast %598 : vector<16x16xf32> to vector<2x8x16xf32>
    %607 = vector.shape_cast %604 : vector<16x16xf32> to vector<2x8x16xf32>
    %608 = vector.shape_cast %605 : vector<16x16xf32> to vector<2x8x16xf32>
    %609 = vector.extract_strided_slice %606 {offsets = [0, 0, 0], sizes = [2, 8, 8], strides = [1, 1, 1]} : vector<2x8x16xf32> to vector<2x8x8xf32>
    %610 = vector.extract_strided_slice %607 {offsets = [0, 0, 0], sizes = [2, 8, 8], strides = [1, 1, 1]} : vector<2x8x16xf32> to vector<2x8x8xf32>
    "tpu.trace_start"() <{level = 10 : i32, message = "bqd,bkd->bqk"}> : () -> ()
    %cst_287 = arith.constant dense<0.000000e+00> : vector<2x8x8xf32>
    %611 = tpu.matmul %609, %610, %cst_287 {dimension_numbers = #tpu.dot_dimension_numbers<[2], [2], [1], [1], [0, 0, 0, 1, 1, 1], [0], [0]>} : vector<2x8x8xf32>, vector<2x8x8xf32>, vector<2x8x8xf32> -> vector<2x8x8xf32>
    "tpu.trace_stop"() : () -> ()
    %cst_288 = arith.constant 0.353553385 : f32
    %612 = vector.broadcast %cst_288 : f32 to vector<2x8x8xf32>
    %613 = arith.mulf %611, %612 : vector<2x8x8xf32>
    %cst_289 = arith.constant -1.000000e+09 : f32
    %614 = vector.shape_cast %19 : vector<2x1x8xi1> to vector<2x1x8xi1>
    %615 = vector.broadcast %614 : vector<2x1x8xi1> to vector<2x8x8xi1>
    %616 = vector.broadcast %cst_289 : f32 to vector<2x8x8xf32>
    %617 = arith.select %615, %616, %613 : vector<2x8x8xi1>, vector<2x8x8xf32>
    %cst_290 = arith.constant dense<0xFF800000> : vector<2x8xf32>
    %618 = vector.multi_reduction <maximumf>, %617, %cst_290 [2] : vector<2x8x8xf32> to vector<2x8xf32>
    %619 = vector.shape_cast %618 : vector<2x8xf32> to vector<2x8x1xf32>
    %620 = vector.broadcast %619 : vector<2x8x1xf32> to vector<2x8x8xf32>
    %621 = arith.subf %617, %620 : vector<2x8x8xf32>
    %622 = math.exp %621 : vector<2x8x8xf32>
    %cst_291 = arith.constant dense<0.000000e+00> : vector<2x8xf32>
    %623 = vector.multi_reduction <add>, %622, %cst_291 [2] : vector<2x8x8xf32> to vector<2x8xf32>
    %624 = vector.shape_cast %623 : vector<2x8xf32> to vector<2x8x1xf32>
    %625 = tpu.reciprocal %624 {approx = true} : vector<2x8x1xf32> -> vector<2x8x1xf32>
    %626 = vector.broadcast %625 : vector<2x8x1xf32> to vector<2x8x8xf32>
    %627 = arith.mulf %622, %626 : vector<2x8x8xf32>
    %628 = vector.extract_strided_slice %608 {offsets = [0, 0, 0], sizes = [2, 8, 8], strides = [1, 1, 1]} : vector<2x8x16xf32> to vector<2x8x8xf32>
    "tpu.trace_start"() <{level = 10 : i32, message = "bqk,bkd->bqd"}> : () -> ()
    %cst_292 = arith.constant dense<0.000000e+00> : vector<2x8x8xf32>
    %629 = tpu.matmul %627, %628, %cst_292 {dimension_numbers = #tpu.dot_dimension_numbers<[2], [1], [1], [2], [0, 0, 0, 1, 1, 2], [0], [0]>} : vector<2x8x8xf32>, vector<2x8x8xf32>, vector<2x8x8xf32> -> vector<2x8x8xf32>
    "tpu.trace_stop"() : () -> ()
    %630 = vector.extract_strided_slice %606 {offsets = [0, 0, 8], sizes = [2, 8, 8], strides = [1, 1, 1]} : vector<2x8x16xf32> to vector<2x8x8xf32>
    %631 = vector.extract_strided_slice %607 {offsets = [0, 0, 8], sizes = [2, 8, 8], strides = [1, 1, 1]} : vector<2x8x16xf32> to vector<2x8x8xf32>
    "tpu.trace_start"() <{level = 10 : i32, message = "bqd,bkd->bqk"}> : () -> ()
    %cst_293 = arith.constant dense<0.000000e+00> : vector<2x8x8xf32>
    %632 = tpu.matmul %630, %631, %cst_293 {dimension_numbers = #tpu.dot_dimension_numbers<[2], [2], [1], [1], [0, 0, 0, 1, 1, 1], [0], [0]>} : vector<2x8x8xf32>, vector<2x8x8xf32>, vector<2x8x8xf32> -> vector<2x8x8xf32>
    "tpu.trace_stop"() : () -> ()
    %cst_294 = arith.constant 0.353553385 : f32
    %633 = vector.broadcast %cst_294 : f32 to vector<2x8x8xf32>
    %634 = arith.mulf %632, %633 : vector<2x8x8xf32>
    %cst_295 = arith.constant -1.000000e+09 : f32
    %635 = vector.shape_cast %19 : vector<2x1x8xi1> to vector<2x1x8xi1>
    %636 = vector.broadcast %635 : vector<2x1x8xi1> to vector<2x8x8xi1>
    %637 = vector.broadcast %cst_295 : f32 to vector<2x8x8xf32>
    %638 = arith.select %636, %637, %634 : vector<2x8x8xi1>, vector<2x8x8xf32>
    %cst_296 = arith.constant dense<0xFF800000> : vector<2x8xf32>
    %639 = vector.multi_reduction <maximumf>, %638, %cst_296 [2] : vector<2x8x8xf32> to vector<2x8xf32>
    %640 = vector.shape_cast %639 : vector<2x8xf32> to vector<2x8x1xf32>
    %641 = vector.broadcast %640 : vector<2x8x1xf32> to vector<2x8x8xf32>
    %642 = arith.subf %638, %641 : vector<2x8x8xf32>
    %643 = math.exp %642 : vector<2x8x8xf32>
    %cst_297 = arith.constant dense<0.000000e+00> : vector<2x8xf32>
    %644 = vector.multi_reduction <add>, %643, %cst_297 [2] : vector<2x8x8xf32> to vector<2x8xf32>
    %645 = vector.shape_cast %644 : vector<2x8xf32> to vector<2x8x1xf32>
    %646 = tpu.reciprocal %645 {approx = true} : vector<2x8x1xf32> -> vector<2x8x1xf32>
    %647 = vector.broadcast %646 : vector<2x8x1xf32> to vector<2x8x8xf32>
    %648 = arith.mulf %643, %647 : vector<2x8x8xf32>
    %649 = vector.extract_strided_slice %608 {offsets = [0, 0, 8], sizes = [2, 8, 8], strides = [1, 1, 1]} : vector<2x8x16xf32> to vector<2x8x8xf32>
    "tpu.trace_start"() <{level = 10 : i32, message = "bqk,bkd->bqd"}> : () -> ()
    %cst_298 = arith.constant dense<0.000000e+00> : vector<2x8x8xf32>
    %650 = tpu.matmul %648, %649, %cst_298 {dimension_numbers = #tpu.dot_dimension_numbers<[2], [1], [1], [2], [0, 0, 0, 1, 1, 2], [0], [0]>} : vector<2x8x8xf32>, vector<2x8x8xf32>, vector<2x8x8xf32> -> vector<2x8x8xf32>
    "tpu.trace_stop"() : () -> ()
    %651 = tpu.concatenate %629, %650 in 2 : vector<2x8x8xf32>, vector<2x8x8xf32> -> vector<2x8x16xf32>
    %652 = vector.shape_cast %651 : vector<2x8x16xf32> to vector<16x16xf32>
    %cst_299 = arith.constant dense<0.000000e+00> : vector<16x16xf32>
    %653 = tpu.matmul %652, %591, %cst_299 {dimension_numbers = #tpu.dot_dimension_numbers<[1], [0], [0], [1], [0, 0, 1, 1], [], []>} : vector<16x16xf32>, vector<16x16xf32>, vector<16x16xf32> -> vector<16x16xf32>
    %654 = vector.broadcast %593 : vector<1x16xf32> to vector<16x16xf32>
    %655 = arith.addf %653, %654 : vector<16x16xf32>
    %656 = arith.addf %585, %655 : vector<16x16xf32>
    %c1_300 = arith.constant 1 : index
    %c0_301 = arith.constant 0 : index
    %c0_302 = arith.constant 0 : index
    %657 = vector.load %arg26[%c1_300, %c0_301, %c0_302] : memref<2x1x16xf32, #tpu.memory_space<vmem>>, vector<1x1x16xf32>
    %658 = vector.shape_cast %657 : vector<1x1x16xf32> to vector<1x16xf32>
    %c1_303 = arith.constant 1 : index
    %c0_304 = arith.constant 0 : index
    %c0_305 = arith.constant 0 : index
    %659 = vector.load %arg27[%c1_303, %c0_304, %c0_305] : memref<2x1x16xf32, #tpu.memory_space<vmem>>, vector<1x1x16xf32>
    %660 = vector.shape_cast %659 : vector<1x1x16xf32> to vector<1x16xf32>
    %cst_306 = arith.constant dense<0.000000e+00> : vector<16xf32>
    %661 = vector.multi_reduction <add>, %656, %cst_306 [1] : vector<16x16xf32> to vector<16xf32>
    %662 = vector.shape_cast %661 : vector<16xf32> to vector<16x1xf32>
    %cst_307 = arith.constant 1.600000e+01 : f32
    %663 = vector.broadcast %cst_307 : f32 to vector<16x1xf32>
    %664 = arith.divf %662, %663 : vector<16x1xf32>
    %665 = vector.broadcast %664 : vector<16x1xf32> to vector<16x16xf32>
    %666 = arith.subf %656, %665 : vector<16x16xf32>
    %667 = arith.mulf %666, %666 : vector<16x16xf32>
    %cst_308 = arith.constant dense<0.000000e+00> : vector<16xf32>
    %668 = vector.multi_reduction <add>, %667, %cst_308 [1] : vector<16x16xf32> to vector<16xf32>
    %669 = vector.shape_cast %668 : vector<16xf32> to vector<16x1xf32>
    %cst_309 = arith.constant 1.600000e+01 : f32
    %670 = vector.broadcast %cst_309 : f32 to vector<16x1xf32>
    %671 = arith.divf %669, %670 : vector<16x1xf32>
    %cst_310 = arith.constant 9.99999974E-6 : f32
    %672 = vector.broadcast %cst_310 : f32 to vector<16x1xf32>
    %673 = arith.addf %671, %672 : vector<16x1xf32>
    %674 = math.rsqrt %673 : vector<16x1xf32>
    %675 = vector.broadcast %674 : vector<16x1xf32> to vector<16x16xf32>
    %676 = arith.mulf %666, %675 : vector<16x16xf32>
    %677 = vector.broadcast %658 : vector<1x16xf32> to vector<16x16xf32>
    %678 = arith.mulf %676, %677 : vector<16x16xf32>
    %679 = vector.broadcast %660 : vector<1x16xf32> to vector<16x16xf32>
    %680 = arith.addf %678, %679 : vector<16x16xf32>
    %c1_311 = arith.constant 1 : index
    %c0_312 = arith.constant 0 : index
    %c0_313 = arith.constant 0 : index
    %681 = vector.load %arg28[%c1_311, %c0_312, %c0_313] : memref<2x16x32xf32, #tpu.memory_space<vmem>>, vector<1x16x32xf32>
    %682 = vector.shape_cast %681 : vector<1x16x32xf32> to vector<16x32xf32>
    %c1_314 = arith.constant 1 : index
    %c0_315 = arith.constant 0 : index
    %c0_316 = arith.constant 0 : index
    %683 = vector.load %arg29[%c1_314, %c0_315, %c0_316] : memref<2x1x32xf32, #tpu.memory_space<vmem>>, vector<1x1x32xf32>
    %684 = vector.shape_cast %683 : vector<1x1x32xf32> to vector<1x32xf32>
    %c1_317 = arith.constant 1 : index
    %c0_318 = arith.constant 0 : index
    %c0_319 = arith.constant 0 : index
    %685 = vector.load %arg30[%c1_317, %c0_318, %c0_319] : memref<2x32x16xf32, #tpu.memory_space<vmem>>, vector<1x32x16xf32>
    %686 = vector.shape_cast %685 : vector<1x32x16xf32> to vector<32x16xf32>
    %c1_320 = arith.constant 1 : index
    %c0_321 = arith.constant 0 : index
    %c0_322 = arith.constant 0 : index
    %687 = vector.load %arg31[%c1_320, %c0_321, %c0_322] : memref<2x1x16xf32, #tpu.memory_space<vmem>>, vector<1x1x16xf32>
    %688 = vector.shape_cast %687 : vector<1x1x16xf32> to vector<1x16xf32>
    %cst_323 = arith.constant dense<0.000000e+00> : vector<16x32xf32>
    %689 = tpu.matmul %680, %682, %cst_323 {dimension_numbers = #tpu.dot_dimension_numbers<[1], [0], [0], [1], [0, 0, 1, 1], [], []>} : vector<16x16xf32>, vector<16x32xf32>, vector<16x32xf32> -> vector<16x32xf32>
    %690 = vector.broadcast %684 : vector<1x32xf32> to vector<16x32xf32>
    %691 = arith.addf %689, %690 : vector<16x32xf32>
    %cst_324 = arith.constant 0.000000e+00 : f32
    %692 = vector.broadcast %cst_324 : f32 to vector<16x32xf32>
    %693 = arith.maximumf %691, %692 : vector<16x32xf32>
    %cst_325 = arith.constant dense<0.000000e+00> : vector<16x16xf32>
    %694 = tpu.matmul %693, %686, %cst_325 {dimension_numbers = #tpu.dot_dimension_numbers<[1], [0], [0], [1], [0, 0, 1, 1], [], []>} : vector<16x32xf32>, vector<32x16xf32>, vector<16x16xf32> -> vector<16x16xf32>
    %695 = vector.broadcast %688 : vector<1x16xf32> to vector<16x16xf32>
    %696 = arith.addf %694, %695 : vector<16x16xf32>
    %697 = arith.addf %680, %696 : vector<16x16xf32>
    %c1_326 = arith.constant 1 : index
    %c0_327 = arith.constant 0 : index
    %c0_328 = arith.constant 0 : index
    %698 = vector.load %arg32[%c1_326, %c0_327, %c0_328] : memref<2x1x16xf32, #tpu.memory_space<vmem>>, vector<1x1x16xf32>
    %699 = vector.shape_cast %698 : vector<1x1x16xf32> to vector<1x16xf32>
    %c1_329 = arith.constant 1 : index
    %c0_330 = arith.constant 0 : index
    %c0_331 = arith.constant 0 : index
    %700 = vector.load %arg33[%c1_329, %c0_330, %c0_331] : memref<2x1x16xf32, #tpu.memory_space<vmem>>, vector<1x1x16xf32>
    %701 = vector.shape_cast %700 : vector<1x1x16xf32> to vector<1x16xf32>
    %cst_332 = arith.constant dense<0.000000e+00> : vector<16xf32>
    %702 = vector.multi_reduction <add>, %697, %cst_332 [1] : vector<16x16xf32> to vector<16xf32>
    %703 = vector.shape_cast %702 : vector<16xf32> to vector<16x1xf32>
    %cst_333 = arith.constant 1.600000e+01 : f32
    %704 = vector.broadcast %cst_333 : f32 to vector<16x1xf32>
    %705 = arith.divf %703, %704 : vector<16x1xf32>
    %706 = vector.broadcast %705 : vector<16x1xf32> to vector<16x16xf32>
    %707 = arith.subf %697, %706 : vector<16x16xf32>
    %708 = arith.mulf %707, %707 : vector<16x16xf32>
    %cst_334 = arith.constant dense<0.000000e+00> : vector<16xf32>
    %709 = vector.multi_reduction <add>, %708, %cst_334 [1] : vector<16x16xf32> to vector<16xf32>
    %710 = vector.shape_cast %709 : vector<16xf32> to vector<16x1xf32>
    %cst_335 = arith.constant 1.600000e+01 : f32
    %711 = vector.broadcast %cst_335 : f32 to vector<16x1xf32>
    %712 = arith.divf %710, %711 : vector<16x1xf32>
    %cst_336 = arith.constant 9.99999974E-6 : f32
    %713 = vector.broadcast %cst_336 : f32 to vector<16x1xf32>
    %714 = arith.addf %712, %713 : vector<16x1xf32>
    %715 = math.rsqrt %714 : vector<16x1xf32>
    %716 = vector.broadcast %715 : vector<16x1xf32> to vector<16x16xf32>
    %717 = arith.mulf %707, %716 : vector<16x16xf32>
    %718 = vector.broadcast %699 : vector<1x16xf32> to vector<16x16xf32>
    %719 = arith.mulf %717, %718 : vector<16x16xf32>
    %720 = vector.broadcast %701 : vector<1x16xf32> to vector<16x16xf32>
    %721 = arith.addf %719, %720 : vector<16x16xf32>
    %c0_337 = arith.constant 0 : index
    %c0_338 = arith.constant 0 : index
    %722 = vector.load %arg34[%c0_337, %c0_338] : memref<16x32xf32, #tpu.memory_space<vmem>>, vector<16x32xf32>
    %cst_339 = arith.constant dense<0.000000e+00> : vector<16x32xf32>
    %723 = tpu.matmul %721, %722, %cst_339 {dimension_numbers = #tpu.dot_dimension_numbers<[1], [0], [0], [1], [0, 0, 1, 1], [], []>} : vector<16x16xf32>, vector<16x32xf32>, vector<16x32xf32> -> vector<16x32xf32>
    %c0_340 = arith.constant 0 : index
    %c0_341 = arith.constant 0 : index
    %724 = vector.load %arg35[%c0_340, %c0_341] : memref<1x32xf32, #tpu.memory_space<vmem>>, vector<1x32xf32>
    %725 = vector.broadcast %724 : vector<1x32xf32> to vector<16x32xf32>
    %726 = arith.addf %723, %725 : vector<16x32xf32>
    %cst_342 = arith.constant dense<0xFF800000> : vector<16xf32>
    %727 = vector.multi_reduction <maximumf>, %726, %cst_342 [1] : vector<16x32xf32> to vector<16xf32>
    %728 = vector.shape_cast %727 : vector<16xf32> to vector<16x1xf32>
    %729 = vector.broadcast %728 : vector<16x1xf32> to vector<16x32xf32>
    %730 = arith.subf %726, %729 : vector<16x32xf32>
    %731 = math.exp %730 : vector<16x32xf32>
    %cst_343 = arith.constant dense<0.000000e+00> : vector<16xf32>
    %732 = vector.multi_reduction <add>, %731, %cst_343 [1] : vector<16x32xf32> to vector<16xf32>
    %733 = vector.shape_cast %732 : vector<16xf32> to vector<16x1xf32>
    %734 = math.log %733 : vector<16x1xf32>
    %735 = vector.broadcast %734 : vector<16x1xf32> to vector<16x32xf32>
    %736 = arith.subf %730, %735 : vector<16x32xf32>
    %737 = vector.shape_cast %736 : vector<16x32xf32> to vector<2x8x32xf32>
    %c0_344 = arith.constant 0 : index
    %c0_345 = arith.constant 0 : index
    %c0_346 = arith.constant 0 : index
    %738 = vector.load %arg36[%c0_344, %c0_345, %c0_346] : memref<2x8x32xf32, #tpu.memory_space<vmem>>, vector<2x8x32xf32>
    tpu.vector_store %arg36[%c0_344, %c0_345, %c0_346], %737 {strides = array<i32>} : memref<2x8x32xf32, #tpu.memory_space<vmem>>, vector<2x8x32xf32>,
    return
  }
}

</mosaic_0001>

<bundles_post_ra>
// kernel: forward.1
= control target key start
LH: loop header
LB: loop body
LE: loop exit
PB: predicated region body
PF: predicated region fallthrough
CT: control target
= control target key end

     0   :  { %s3773_s3 = smov 4   ;;  %s3774_s10 = smov 5   ;;  %vm187_vm0 = vcmask 130048   ;;  %vm220_vm1 = vcmask 64512   ;;  %v3779_v16 = vmov 0   ;;  %vm641_vm13 = vcmask 261120   ;;  %s4658_s0 = inlined_call_operand.smem [shape: u32[37], index: -1, kind: input, shape index: {}] }
   0x1   :  { %s3824_s6 = sld [smem:[%s4658_s0 + %s3773_s3]]   ;;  %s3775_s14 = smov 104  }
   0x2   :  { %s1_s9 = sld [smem:[%s4658_s0]]   ;;  %s3776_s15 = smov 112  }
   0x3   :  { %s3832_s13 = sld [smem:[%s4658_s0 + %s3774_s10]]   ;;  %s3777_s16 = smov 120  }
   0x4   :  { %s3778_s17 = smov 2   ;;  %s3780_s21 = smov 96  }
   0x5   :  { %s3311_s20 = sld [smem:[%s4658_s0 + %s3778_s17]]   ;;  %s3781_s22 = smov 88  }
   0x6   :  { %s3782_s23 = smov 6   ;;  %s3783_s27 = smov 7  }
   0x7   :  { %v179_v0 = vld [vmem:[%s3824_s6 + $0x8] sm:$0xff]  ;;  %v178_v1 = vld [vmem:[%s3824_s6] sm:$0xff]  ;;  %s3914_s26 = sld [smem:[%s4658_s0 + %s3782_s23]]   ;;  %s3784_s1 = smov 8  }
   0x8   :  { %208 = vmatpush.msra.mxu0 %v179_v0  ;;  %v3836_v2 = vld [vmem:[%s1_s9] sm:$0xff]  ;;  %v3840_v3 = vld [vmem:[%s1_s9 + $0x8] sm:$0xff]  ;;  %s3920_s30 = sld [smem:[%s4658_s0 + %s3783_s27]]   ;;  %s3786_s5 = smov 9  }
   0x9   :  { %v3586_v4 = vld [vmem:[%s3832_s13] ss:$0 sm:$0xff]  ;;  %s3936_s4 = sld [smem:[%s4658_s0 + %s3784_s1]]   ;;  %s3787_s10 = smov 11  }
   0xa   :  { %209 = vmatpush.msra.mxu0 %v178_v1  ;;  %s3947_s9 = sld [smem:[%s4658_s0 + %s3786_s5]]   ;;  %s3788_s18 = smov 10  }
   0xb   :  { %3346 = vmatmul.msk.f32.vlgmr.msra.gmra.mxu0 %vm187_vm0, %v3836_v2  ;;  %v154_v15 = vld [vmem:[%s3311_s20] sm:$0x3]  ;;  %s3954_s17 = sld [smem:[%s4658_s0 + %s3787_s10]]   ;;  %s3789_s24 = smov 12  }
   0xc   :  { %vm155_vm2 = vcmp.gt.f32.partialorder %v154_v15, 0.5  ;;  %s3959_s23 = sld [smem:[%s4658_s0 + %s3788_s18]]   ;;  %s3790_s29 = smov 13  }
   0xd   :  { %v158_v17 = vsel %vm155_vm2, 1, %v3779_v16  ;;  %s3967_s28 = sld [smem:[%s4658_s0 + %s3789_s24]]   ;;  %s3791_s7 = smov 14  }
   0xe   :  { %v275_v18 = vperm.slane %v158_v17, 0  ;;  %v159_v22 = vrot.slane %v158_v17, 1  ;;  %v182_v17 = vld [vmem:[%s3914_s26 + $0x8] sm:$0xff]  ;;  %s3978_s5 = sld [smem:[%s4658_s0 + %s3790_s29]]   ;;  %s3792_s12 = smov 15  }
   0xf   :  { %s3991_s11 = sld [smem:[%s4658_s0 + %s3791_s7]]   ;;  %s3794_s27 = smov 1  }
  0x10   :  { %vm3875_vm3 = vcmp.eq.s32.totalorder %v275_v18, 1  ;;  %vm160_vm4 = vcmp.ne.s32.totalorder %v159_v22, 0  ;;  %s3999_s20 = sld [smem:[%s4658_s0 + %s3792_s12]]   ;;  %s3799_s24 = smov 20  }
  0x11   :  { %v274_v26 = vsel %vm160_vm4, 1, %v3779_v16  ;;  %s3310_s3 = sld [smem:[%s4658_s0 + %s3794_s27]]   ;;  %s3806_s12 = smov 27  }
  0x12   :  { %v276_v29 = vperm.slane %v274_v26, 0  ;;  %s4250_s2 = sld [smem:[%s4658_s0 + %s3799_s24]]   ;;  %s3804_s24 = smov 24  }
  0x13   :  { %3347 = vmatmul.msk.f32.gmra.mxu0 %vm187_vm0, %v3840_v3  ;;  %s3808_s27 = smov 28   ;;  %s3811_s29 = smov 32  }
  0x14   :  { %vm3886_vm5 = vcmp.eq.s32.totalorder %v276_v29, 1  ;;  %s4400_s7 = sld [smem:[%s4658_s0 + %s3808_s27]]  }
  0x88   :  { %v211_v5 = vpop.f32.mrf.mxu0 }
  0x89   :  { %v3845_v6 = vadd.f32 %v3586_v4, %v211_v5 }
  0x8b   :  { %357 = vrot.lane.b32.xlu1 %v3845_v6, %s3775_s14  ;;  %218 = vrot.lane.b32.xlu0 %v3845_v6, %s3776_s15 }
  0x90   :  { %v214_v7 = vpop.f32.mrf.mxu0 }
  0x91   :  { %v3851_v8 = vadd.f32 %v3586_v4, %v214_v7 }
  0x93   :  { %385 = vrot.lane.b32.xlu2 %v3851_v8, %s3775_s14  ;;  %355 = vrot.lane.b32.xlu1 %v3845_v6, %s3777_s16  ;;  %v3551_v40 = vpack.i.bf16 %v3851_v8, %v3845_v6 }
  0x94   :  { %246 = vrot.lane.b32.xlu0 %v3851_v8, %s3776_s15 }
  0x9b   :  { %383 = vrot.lane.b32.xlu2 %v3851_v8, %s3777_s16 }
  0xed   :  { %v386_v12 = vpop.permute.xlu2 %385 }
  0xf5   :  { %v384_v14 = vpop.permute.xlu2 %383 }
  0xfd   :  { %v358_v9 = vpop.permute.xlu1 %357  ;;  %v219_v10 = vpop.permute.xlu0 %218 }
  0xfe   :  { %3348 = vmatpush.xpose.msk.msra.mxu1 %vm220_vm1, %v219_v10 }
 0x101   :  { %3349 = vmatmul.msk.f32.vlgmr.msra.gmra.mxu1 %vm220_vm1, %v3845_v6 }
 0x102   :  { %3354 = vmatpush.xpose.msk.msrb.mxu1 %vm220_vm1, %v358_v9 }
 0x105   :  { %v356_v13 = vpop.permute.xlu1 %355 }
 0x106   :  { %v247_v11 = vpop.permute.xlu0 %246  ;;  %522 = vmatpush.msra.mxu1 %v182_v17 }
 0x107   :  { %3350 = vmatpush.xpose.msk.msra.mxu2 %vm220_vm1, %v247_v11 }
 0x109   :  { %3355 = vmatmul.msk.f32.vlgmr.msrb.gmra.mxu1 %vm220_vm1, %v356_v13 }
 0x10a   :  { %3351 = vmatmul.msk.f32.vlgmr.msra.gmra.mxu2 %vm220_vm1, %v3851_v8 }
 0x10b   :  { %3356 = vmatpush.xpose.msk.msrb.mxu2 %vm220_vm1, %v386_v12 }
 0x112   :  { %3357 = vmatmul.msk.f32.vlgmr.msrb.gmra.mxu2 %vm220_vm1, %v384_v14 }
 0x17e   :  { %v242_v19 = vpop.f32.mrf.mxu1 }
 0x17f   :  { %v272_v21 = vmul.f32 0.35355338, %v242_v19 }
 0x181   :  { %v279_v23 = vsel %vm3875_vm3, -1e+09, %v272_v21 }
 0x182   :  { %v281_v24 = vsel %vm220_vm1, %v279_v23, -inf }
 0x183   :  { %282 = vmax.xlane.f32.xlu0 %v281_v24 }
 0x186   :  { %v380_v25 = vpop.f32.mrf.mxu1 }
 0x187   :  { %v411_v27 = vmul.f32 0.35355338, %v380_v25 }
 0x189   :  { %v413_v28 = vsel %vm3875_vm3, -1e+09, %v411_v27 }
 0x18a   :  { %v415_v30 = vsel %vm220_vm1, %v413_v28, -inf }
 0x18b   :  { %416 = vmax.xlane.f32.xlu2 %v415_v30 }
 0x18d   :  { %v269_v31 = vpop.f32.mrf.mxu2 }
 0x18e   :  { %v273_v33 = vmul.f32 0.35355338, %v269_v31 }
 0x190   :  { %v280_v34 = vsel %vm3886_vm5, -1e+09, %v273_v33 }
 0x191   :  { %v284_v35 = vsel %vm220_vm1, %v280_v34, -inf }
 0x192   :  { %285 = vmax.xlane.f32.xlu1 %v284_v35 }
 0x195   :  { %v408_v36 = vpop.f32.mrf.mxu2 }
 0x196   :  { %v412_v37 = vmul.f32 0.35355338, %v408_v36 }
 0x198   :  { %v414_v38 = vsel %vm3886_vm5, -1e+09, %v412_v37 }
 0x199   :  { %v418_v39 = vsel %vm220_vm1, %v414_v38, -inf }
 0x19a   :  { %419 = vmax.xlane.f32.xlu2 %v418_v39 }
 0x1b2   :  { %3552 = vrot.lane.b32.xlu2 %v3551_v40, %s3780_s21 }
 0x1f6   :  { %v283_v41 = vpop.xlane.xlu0 %282 }
 0x1f7   :  { %v287_v42 = vsub.f32 %v279_v23, %v283_v41  ;;  %v181_v23 = vld [vmem:[%s3914_s26] sm:$0xff] }
 0x1f8   :  { %523 = vmatpush.msra.mxu1 %v181_v23 }
 0x1f9   :  { %v289_v43 = vmul.f32 1.442695, %v287_v42 }
 0x1fb   :  { %3627 = vpow2.f32 %v289_v43 }
 0x1fe   :  { %v417_v44 = vpop.xlane.xlu2 %416 }
 0x1ff   :  { %v421_v45 = vsub.f32 %v413_v28, %v417_v44  ;;  %v3587_v28 = vld [vmem:[%s3920_s30] ss:$0 sm:$0xff] }
 0x201   :  { %v3628_v46 = vpop.eup %3627  ;;  %v423_v47 = vmul.f32 1.442695, %v421_v45 }
 0x202   :  { %v293_v48 = vsel %vm220_vm1, %v3628_v46, 0.0 }
 0x203   :  { %3629 = vpow2.f32 %v423_v47  ;;  %294 = vadd.xlane.f32.xlu0 %v293_v48 }
 0x205   :  { %v286_v49 = vpop.xlane.xlu1 %285 }
 0x206   :  { %v288_v50 = vsub.f32 %v280_v34, %v286_v49 }
 0x208   :  { %v291_v51 = vmul.f32 1.442695, %v288_v50 }
 0x209   :  { %v3630_v52 = vpop.eup %3629 }
 0x20a   :  { %3631 = vpow2.f32 %v291_v51  ;;  %v427_v53 = vsel %vm220_vm1, %v3630_v52, 0.0 }
 0x20b   :  { %428 = vadd.xlane.f32.xlu0 %v427_v53  ;;  %v597_v53 = vld [vmem:[%s3959_s23 + $0x8] sm:$0xff] }
 0x20c   :  { %627 = vmatpush.msra.mxu2 %v597_v53  ;;  %v3367_v53 = vld [vmem:[%s3824_s6 + $0x18] sm:$0xff] }
 0x20d   :  { %v420_v54 = vpop.xlane.xlu2 %419 }
 0x20e   :  { %v422_v55 = vsub.f32 %v414_v38, %v420_v54  ;;  %v3785_v38 = vmov 16.0   ;;  %v596_v54 = vld [vmem:[%s3959_s23] sm:$0xff] }
 0x20f   :  { %628 = vmatpush.msra.mxu2 %v596_v54  ;;  %v3366_v54 = vld [vmem:[%s3824_s6 + $0x10] sm:$0xff]  ;;  %s3793_s6 = smov 16  }
 0x210   :  { %v3632_v56 = vpop.eup %3631  ;;  %v425_v57 = vmul.f32 1.442695, %v422_v55  ;;  %s4079_s25 = sld [smem:[%s4658_s0 + %s3793_s6]]  }
 0x211   :  { %v296_v58 = vsel %vm220_vm1, %v3632_v56, 0.0 }
 0x212   :  { %3633 = vpow2.f32 %v425_v57  ;;  %297 = vadd.xlane.f32.xlu1 %v296_v58 }
 0x215   :  { %v3553_v59 = vpop.permute.xlu2 %3552 }
 0x216   :  { %v3554_v60 = vunpack.i.l.bf16 %v3553_v59  ;;  %v3555_v61 = vunpack.i.h.bf16 %v3553_v59 }
 0x218   :  { %v3634_v62 = vpop.eup %3633  ;;  %324 = vmatpush.msra.mxu3 %v3554_v60 }
 0x219   :  { %v430_v63 = vsel %vm220_vm1, %v3634_v62, 0.0 }
 0x21a   :  { %350 = vmatpush.msrb.mxu3 %v3555_v61  ;;  %431 = vadd.xlane.f32.xlu0 %v430_v63  ;;  %v602_v63 = vld [vmem:[%s3967_s28 + $0x18] sm:$0xff] }
 0x22b   :  { %437 = vrot.lane.b32.xlu1 %v3845_v6, %s3781_s22 }
 0x22e   :  { %463 = vrot.lane.b32.xlu0 %v3851_v8, %s3781_s22 }
 0x276   :  { %v295_v0 = vpop.xlane.xlu0 %294 }
 0x277   :  { %3635 = vrcp.f32 %v295_v0 }
 0x27d   :  { %v3636_v1 = vpop.eup %3635 }
 0x27e   :  { %v301_v4 = vmul.f32 %v3636_v1, %v3628_v46  ;;  %v429_v9 = vpop.xlane.xlu0 %428  ;;  %v3588_v1 = vld [vmem:[%s3936_s4] ss:$0 sm:$0xff] }
 0x280   :  { %3352 = vmatmul.msk.f32.vlgmr.msra.gmra.mxu3 %vm220_vm1, %v301_v4 }
 0x285   :  { %v298_v5 = vpop.xlane.xlu1 %297 }
 0x286   :  { %3637 = vrcp.f32 %v298_v5 }
 0x287   :  { %3639 = vrcp.f32 %v429_v9 }
 0x28c   :  { %v3638_v7 = vpop.eup %3637 }
 0x28d   :  { %v302_v10 = vmul.f32 %v3638_v7, %v3632_v56  ;;  %v432_v11 = vpop.xlane.xlu0 %431  ;;  %v3640_v6 = vpop.eup %3639 }
 0x28e   :  { %3641 = vrcp.f32 %v432_v11  ;;  %v435_v13 = vmul.f32 %v3640_v6, %v3630_v52 }
 0x28f   :  { %3353 = vmatmul.msk.f32.vlgmr.msrb.gmra.mxu3 %vm220_vm1, %v302_v10  ;;  %3643 = vrcp.f32 %v3785_v38  ;;  %v3589_v10 = vld [vmem:[%s3947_s9] ss:$0 sm:$0xff] }
 0x294   :  { %v3642_v12 = vpop.eup %3641 }
 0x295   :  { %v436_v15 = vmul.f32 %v3642_v12, %v3634_v62  ;;  %v3644_v39 = vpop.eup %3643 }
 0x296   :  { %vm546_vm6 = vweird.f32 %v3644_v39 }
 0x29d   :  { %v438_v8 = vpop.permute.xlu1 %437 }
 0x29e   :  { %458 = vmatpush.msra.mxu3 %v438_v8 }
 0x29f   :  { %3358 = vmatmul.msk.f32.vlgmr.msra.gmra.mxu3 %vm220_vm1, %v435_v13 }
 0x2a0   :  { %v464_v14 = vpop.permute.xlu0 %463  ;;  %660 = vmatpush.msrb.mxu3 %v602_v63 }
 0x2a1   :  { %484 = vmatpush.msrb.mxu0 %v464_v14 }
 0x2a2   :  { %3359 = vmatmul.msk.f32.vlgmr.msrb.gmra.mxu0 %vm220_vm1, %v436_v15 }
 0x2a3   :  { %762 = vmatpush.msra.mxu0 %v3367_v53 }
 0x2a5   :  { %763 = vmatpush.msra.mxu0 %v3366_v54 }
 0x303   :  { %v326_v18 = vpop.f32.mrf.mxu3 }
 0x312   :  { %v352_v19 = vpop.f32.mrf.mxu3 }
 0x31f   :  { %v486_v21 = vpop.f32.mrf.mxu0 }
 0x320   :  { %493 = vrot.lane.b32.xlu1 %v486_v21, %s3784_s1 }
 0x322   :  { %v460_v22 = vpop.f32.mrf.mxu3 }
 0x323   :  { %491 = vrot.lane.b32.xlu2 %v460_v22, %s3784_s1 }
 0x37d   :  { %v492_v24 = vpop.permute.xlu2 %491 }
 0x37e   :  { %v497_v25 = vsel %vm220_vm1, %v326_v18, %v492_v24  ;;  %v601_v24 = vld [vmem:[%s3967_s28 + $0x10] sm:$0xff] }
 0x37f   :  { %3360 = vmatmul.msk.f32.vlgmr.msra.gmra.mxu1 %vm187_vm0, %v497_v25  ;;  %661 = vmatpush.msrb.mxu3 %v601_v24  ;;  %v600_v25 = vld [vmem:[%s3967_s28 + $0x8] sm:$0xff] }
 0x381   :  { %662 = vmatpush.msrb.mxu3 %v600_v25 }
 0x392   :  { %v494_v26 = vpop.permute.xlu1 %493 }
 0x393   :  { %v498_v27 = vsel %vm220_vm1, %v352_v19, %v494_v26  ;;  %v599_v26 = vld [vmem:[%s3967_s28] sm:$0xff] }
 0x394   :  { %3361 = vmatmul.msk.f32.gmra.mxu1 %vm187_vm0, %v498_v27  ;;  %663 = vmatpush.msrb.mxu3 %v599_v26  ;;  %v3590_v27 = vld [vmem:[%s3954_s17] ss:$0 sm:$0xff] }
 0x3fc   :  { %v525_v29 = vpop.f32.mrf.mxu1 }
 0x3fd   :  { %v526_v30 = vadd.f32 %v3587_v28, %v525_v29 }
 0x3ff   :  { %v531_v31 = vadd.f32 %v526_v30, %v3836_v2  ;;  %v542_v2 = vmul.f32 16.0, %v3644_v39 }
 0x401   :  { %v535_v33 = vsel %vm187_vm0, %v531_v31, 0.0  ;;  %v543_v40 = vsub.f32 1.0, %v542_v2 }
 0x402   :  { %536 = vadd.xlane.f32.xlu2 %v535_v33 }
 0x403   :  { %v544_v41 = vmul.f32 %v3644_v39, %v543_v40 }
 0x405   :  { %v545_v42 = vadd.f32 %v3644_v39, %v544_v41 }
 0x407   :  { %v3940_v43 = vsel %vm546_vm6, %v3644_v39, %v545_v42 }
 0x411   :  { %v528_v34 = vpop.f32.mrf.mxu1 }
 0x412   :  { %v529_v35 = vadd.f32 %v3587_v28, %v528_v34 }
 0x414   :  { %v532_v36 = vadd.f32 %v529_v35, %v3840_v3  ;;  %v3591_v35 = vld [vmem:[%s3978_s5] ss:$0 sm:$0xff] }
 0x416   :  { %v538_v37 = vsel %vm187_vm0, %v532_v36, 0.0 }
 0x417   :  { %539 = vadd.xlane.f32.xlu1 %v538_v37 }
 0x475   :  { %v537_v44 = vpop.xlane.xlu2 %536 }
 0x476   :  { %v548_v45 = vmul.f32 %v3940_v43, %v537_v44 }
 0x478   :  { %v550_v46 = vsub.f32 %v531_v31, %v548_v45 }
 0x47a   :  { %v552_v47 = vmul.f32 %v550_v46, %v550_v46 }
 0x47c   :  { %v554_v3 = vsel %vm187_vm0, %v552_v47, 0.0 }
 0x47d   :  { %555 = vadd.xlane.f32.xlu0 %v554_v3 }
 0x48a   :  { %v540_v48 = vpop.xlane.xlu1 %539 }
 0x48b   :  { %v549_v49 = vmul.f32 %v3940_v43, %v540_v48 }
 0x48d   :  { %v551_v50 = vsub.f32 %v532_v36, %v549_v49 }
 0x48f   :  { %v553_v51 = vmul.f32 %v551_v50, %v551_v50 }
 0x491   :  { %v557_v52 = vsel %vm187_vm0, %v553_v51, 0.0 }
 0x492   :  { %558 = vadd.xlane.f32.xlu2 %v557_v52 }
 0x4f0   :  { %v556_v55 = vpop.xlane.xlu0 %555 }
 0x4f1   :  { %v560_v56 = vmul.f32 %v556_v55, %v3940_v43 }
 0x4f3   :  { %v562_v57 = vadd.f32 1e-05, %v560_v56 }
 0x4f5   :  { %3645 = vrsqrt.f32 %v562_v57  ;;  %vm570_vm8 = vweird.f32 %v562_v57 }
 0x4fb   :  { %v3646_v58 = vpop.eup %3645 }
 0x4fc   :  { %v565_v59 = vmul.f32 %v3646_v58, %v562_v57  ;;  %vm571_vm7 = vweird.f32 %v3646_v58 }
 0x4fd   :  { %vm572_vm9 = vmor %vm570_vm8, %vm571_vm7 }
 0x4fe   :  { %v566_v60 = vmul.f32 %v3646_v58, %v565_v59 }
 0x500   :  { %v567_v61 = vmul.f32 0.5, %v566_v60 }
 0x502   :  { %v568_v62 = vsub.f32 1.5, %v567_v61 }
 0x504   :  { %v569_v0 = vmul.f32 %v3646_v58, %v568_v62 }
 0x505   :  { %v559_v4 = vpop.xlane.xlu2 %558 }
 0x506   :  { %v573_v5 = vsel %vm572_vm9, %v3646_v58, %v569_v0  ;;  %v561_v7 = vmul.f32 %v559_v4, %v3940_v43  ;;  %v3592_v0 = vld [vmem:[%s3991_s11] ss:$0 sm:$0xff] }
 0x507   :  { %v584_v9 = vmul.f32 %v573_v5, %v550_v46 }
 0x508   :  { %v563_v11 = vadd.f32 1e-05, %v561_v7 }
 0x509   :  { %v589_v6 = vmul.f32 %v3588_v1, %v584_v9  ;;  %v3593_v9 = vld [vmem:[%s3999_s20] ss:$0 sm:$0xff] }
 0x50a   :  { %3647 = vrsqrt.f32 %v563_v11  ;;  %vm580_vm11 = vweird.f32 %v563_v11 }
 0x50b   :  { %v594_v12 = vadd.f32 %v3589_v10, %v589_v6 }
 0x50d   :  { %3362 = vmatmul.msk.f32.vlgmr.msra.gmra.mxu2 %vm187_vm0, %v594_v12 }
 0x510   :  { %v3648_v13 = vpop.eup %3647 }
 0x511   :  { %v575_v8 = vmul.f32 %v3648_v13, %v563_v11  ;;  %vm581_vm10 = vweird.f32 %v3648_v13 }
 0x512   :  { %vm582_vm12 = vmor %vm580_vm11, %vm581_vm10 }
 0x513   :  { %v576_v14 = vmul.f32 %v3648_v13, %v575_v8 }
 0x515   :  { %v577_v15 = vmul.f32 0.5, %v576_v14 }
 0x517   :  { %v578_v17 = vsub.f32 1.5, %v577_v15 }
 0x519   :  { %v579_v18 = vmul.f32 %v3648_v13, %v578_v17 }
 0x51b   :  { %v583_v19 = vsel %vm582_vm12, %v3648_v13, %v579_v18 }
 0x51c   :  { %v585_v21 = vmul.f32 %v583_v19, %v551_v50 }
 0x51e   :  { %v590_v22 = vmul.f32 %v3588_v1, %v585_v21 }
 0x520   :  { %v595_v23 = vadd.f32 %v3589_v10, %v590_v22 }
 0x522   :  { %3363 = vmatmul.msk.f32.gmra.mxu2 %vm187_vm0, %v595_v23 }
 0x590   :  { %v630_v28 = vpop.f32.mrf.mxu2 }
 0x591   :  { %v631_v29 = vadd.f32 %v3590_v27, %v630_v28 }
 0x593   :  { %v636_v30 = vmax.f32 %v631_v29, 0.0 }
 0x595   :  { %3364 = vmatmul.msk.f32.vlgmr.msrb.gmra.mxu3 %vm641_vm13, %v636_v30 }
 0x5a5   :  { %v633_v31 = vpop.f32.mrf.mxu2 }
 0x5a6   :  { %v634_v33 = vadd.f32 %v3590_v27, %v633_v31 }
 0x5a8   :  { %v637_v34 = vmax.f32 %v634_v33, 0.0 }
 0x5aa   :  { %3365 = vmatmul.msk.f32.gmra.mxu3 %vm641_vm13, %v637_v34 }
 0x618   :  { %v665_v36 = vpop.f32.mrf.mxu3 }
 0x619   :  { %v666_v37 = vadd.f32 %v3591_v35, %v665_v36 }
 0x61b   :  { %v671_v38 = vadd.f32 %v666_v37, %v594_v12 }
 0x61d   :  { %v675_v39 = vsel %vm187_vm0, %v671_v38, 0.0 }
 0x61e   :  { %676 = vadd.xlane.f32.xlu1 %v675_v39 }
 0x62d   :  { %v668_v2 = vpop.f32.mrf.mxu3 }
 0x62e   :  { %v669_v40 = vadd.f32 %v3591_v35, %v668_v2 }
 0x630   :  { %v672_v41 = vadd.f32 %v669_v40, %v595_v23  ;;  %v3594_v23 = vld [vmem:[%s3832_s13 + $0x1] ss:$0 sm:$0xff] }
 0x632   :  { %v678_v42 = vsel %vm187_vm0, %v672_v41, 0.0 }
 0x633   :  { %679 = vadd.xlane.f32.xlu0 %v678_v42 }
 0x691   :  { %v677_v44 = vpop.xlane.xlu1 %676 }
 0x692   :  { %v681_v45 = vmul.f32 %v677_v44, %v3940_v43 }
 0x694   :  { %v683_v46 = vsub.f32 %v671_v38, %v681_v45 }
 0x696   :  { %v685_v47 = vmul.f32 %v683_v46, %v683_v46 }
 0x698   :  { %v687_v3 = vsel %vm187_vm0, %v685_v47, 0.0 }
 0x699   :  { %688 = vadd.xlane.f32.xlu2 %v687_v3 }
 0x6a6   :  { %v680_v48 = vpop.xlane.xlu0 %679 }
 0x6a7   :  { %v682_v49 = vmul.f32 %v680_v48, %v3940_v43 }
 0x6a9   :  { %v684_v50 = vsub.f32 %v672_v41, %v682_v49 }
 0x6ab   :  { %v686_v51 = vmul.f32 %v684_v50, %v684_v50 }
 0x6ad   :  { %v690_v52 = vsel %vm187_vm0, %v686_v51, 0.0 }
 0x6ae   :  { %691 = vadd.xlane.f32.xlu1 %v690_v52 }
 0x70c   :  { %v689_v55 = vpop.xlane.xlu2 %688 }
 0x70d   :  { %v693_v56 = vmul.f32 %v689_v55, %v3940_v43 }
 0x70f   :  { %v695_v57 = vadd.f32 1e-05, %v693_v56 }
 0x711   :  { %3649 = vrsqrt.f32 %v695_v57  ;;  %vm703_vm15 = vweird.f32 %v695_v57 }
 0x717   :  { %v3650_v58 = vpop.eup %3649 }
 0x718   :  { %v698_v59 = vmul.f32 %v3650_v58, %v695_v57  ;;  %vm704_vm14 = vweird.f32 %v3650_v58 }
 0x719   :  { %vm705_vm2 = vmor %vm703_vm15, %vm704_vm14 }
 0x71a   :  { %v699_v60 = vmul.f32 %v3650_v58, %v698_v59 }
 0x71c   :  { %v700_v61 = vmul.f32 0.5, %v699_v60 }
 0x71e   :  { %v701_v62 = vsub.f32 1.5, %v700_v61 }
 0x720   :  { %v702_v63 = vmul.f32 %v3650_v58, %v701_v62 }
 0x721   :  { %v692_v1 = vpop.xlane.xlu1 %691 }
 0x722   :  { %v706_v4 = vsel %vm705_vm2, %v3650_v58, %v702_v63  ;;  %v694_v5 = vmul.f32 %v692_v1, %v3940_v43 }
 0x723   :  { %v717_v7 = vmul.f32 %v706_v4, %v683_v46 }
 0x724   :  { %v696_v10 = vadd.f32 1e-05, %v694_v5 }
 0x725   :  { %v722_v11 = vmul.f32 %v3592_v0, %v717_v7 }
 0x726   :  { %3651 = vrsqrt.f32 %v696_v10  ;;  %vm713_vm6 = vweird.f32 %v696_v10 }
 0x727   :  { %v4009_v6 = vadd.f32 %v3593_v9, %v722_v11 }
 0x729   :  { %3372 = vmatmul.msk.f32.vlgmr.msra.gmra.mxu0 %vm187_vm0, %v4009_v6 }
 0x72c   :  { %v3652_v12 = vpop.eup %3651 }
 0x72d   :  { %v708_v13 = vmul.f32 %v3652_v12, %v696_v10  ;;  %vm714_vm4 = vweird.f32 %v3652_v12 }
 0x72e   :  { %vm715_vm7 = vmor %vm713_vm6, %vm714_vm4 }
 0x72f   :  { %v709_v8 = vmul.f32 %v3652_v12, %v708_v13 }
 0x731   :  { %v710_v14 = vmul.f32 0.5, %v709_v8 }
 0x733   :  { %v711_v15 = vsub.f32 1.5, %v710_v14 }
 0x735   :  { %v712_v17 = vmul.f32 %v3652_v12, %v711_v15 }
 0x737   :  { %v716_v18 = vsel %vm715_vm7, %v3652_v12, %v712_v17 }
 0x738   :  { %v718_v19 = vmul.f32 %v716_v18, %v684_v50 }
 0x73a   :  { %v723_v21 = vmul.f32 %v3592_v0, %v718_v19 }
 0x73c   :  { %v4013_v22 = vadd.f32 %v3593_v9, %v723_v21 }
 0x73e   :  { %3373 = vmatmul.msk.f32.gmra.mxu0 %vm187_vm0, %v4013_v22 }
 0x7a6   :  { %v765_v24 = vpop.f32.mrf.mxu0 }
 0x7a7   :  { %v4018_v25 = vadd.f32 %v3594_v23, %v765_v24 }
 0x7a9   :  { %905 = vrot.lane.b32.xlu1 %v4018_v25, %s3775_s14  ;;  %772 = vrot.lane.b32.xlu0 %v4018_v25, %s3776_s15 }
 0x7b1   :  { %903 = vrot.lane.b32.xlu0 %v4018_v25, %s3777_s16 }
 0x7bb   :  { %v768_v26 = vpop.f32.mrf.mxu0 }
 0x7bc   :  { %v4026_v27 = vadd.f32 %v3594_v23, %v768_v26 }
 0x7be   :  { %931 = vrot.lane.b32.xlu0 %v4026_v27, %s3777_s16  ;;  %799 = vrot.lane.b32.xlu2 %v4026_v27, %s3776_s15 }
 0x7c6   :  { %933 = vrot.lane.b32.xlu2 %v4026_v27, %s3775_s14 }
 0x818   :  { %v800_v28 = vpop.permute.xlu2 %799 }
 0x819   :  { %3376 = vmatpush.xpose.msk.msrb.mxu2 %vm220_vm1, %v800_v28  ;;  %v3370_v28 = vld [vmem:[%s3914_s26 + $0x18] sm:$0xff] }
 0x81b   :  { %v773_v29 = vpop.permute.xlu0 %772  ;;  %v906_v30 = vpop.permute.xlu1 %905 }
 0x81c   :  { %3374 = vmatpush.xpose.msk.msrb.mxu1 %vm220_vm1, %v773_v29  ;;  %3377 = vmatmul.msk.f32.vlgmr.msrb.gmra.mxu2 %vm220_vm1, %v4026_v27 }
 0x81f   :  { %3375 = vmatmul.msk.f32.vlgmr.msrb.gmra.mxu1 %vm220_vm1, %v4018_v25 }
 0x820   :  { %3380 = vmatpush.xpose.msk.msra.mxu1 %vm220_vm1, %v906_v30  ;;  %v934_v31 = vpop.permute.xlu2 %933 }
 0x821   :  { %3382 = vmatpush.xpose.msk.msra.mxu2 %vm220_vm1, %v934_v31 }
 0x823   :  { %v904_v33 = vpop.permute.xlu0 %903 }
 0x824   :  { %1070 = vmatpush.msrb.mxu1 %v3370_v28 }
 0x827   :  { %3381 = vmatmul.msk.f32.vlgmr.msra.gmra.mxu1 %vm220_vm1, %v904_v33 }
 0x830   :  { %v932_v34 = vpop.permute.xlu0 %931 }
 0x831   :  { %3383 = vmatmul.msk.f32.vlgmr.msra.gmra.mxu2 %vm220_vm1, %v932_v34  ;;  %v3369_v34 = vld [vmem:[%s3914_s26 + $0x10] sm:$0xff]  ;;  %s3795_s26 = smov 17  }
 0x832   :  { %1071 = vmatpush.msrb.mxu1 %v3369_v34  ;;  %s4101_s10 = sld [smem:[%s4658_s0 + %s3795_s26]]   ;;  %s3805_s26 = smov 26  }
 0x89c   :  { %v795_v35 = vpop.f32.mrf.mxu1 }
 0x89d   :  { %v825_v36 = vmul.f32 0.35355338, %v795_v35  ;;  %v1278_v35 = vld [vmem:[%s4079_s25 + $0x8] sm:$0xff] }
 0x89f   :  { %v822_v37 = vpop.f32.mrf.mxu2  ;;  %v827_v38 = vsel %vm3875_vm3, -1e+09, %v825_v36  ;;  %v1277_v36 = vld [vmem:[%s4079_s25] sm:$0xff] }
 0x8a0   :  { %v826_v39 = vmul.f32 0.35355338, %v822_v37  ;;  %v829_v2 = vsel %vm220_vm1, %v827_v38, -inf  ;;  %v4086_v37 = vld [vmem:[%s3310_s3] sm:$0xff] }
 0x8a1   :  { %830 = vmax.xlane.f32.xlu1 %v829_v2 }
 0x8a2   :  { %v828_v40 = vsel %vm3886_vm5, -1e+09, %v826_v39 }
 0x8a3   :  { %v832_v41 = vsel %vm220_vm1, %v828_v40, -inf }
 0x8a4   :  { %833 = vmax.xlane.f32.xlu0 %v832_v41  ;;  %v928_v42 = vpop.f32.mrf.mxu1 }
 0x8a5   :  { %v959_v44 = vmul.f32 0.35355338, %v928_v42  ;;  %v3595_v42 = vld [vmem:[%s3920_s30 + $0x1] ss:$0 sm:$0xff]  ;;  %s3796_s30 = smov 3  }
 0x8a6   :  { %s3312_s18 = sld [smem:[%s4658_s0 + %s3796_s30]]   ;;  %s3801_s30 = smov 21  }
 0x8a7   :  { %v961_v45 = vsel %vm3875_vm3, -1e+09, %v959_v44 }
 0x8a8   :  { %v963_v46 = vsel %vm220_vm1, %v961_v45, -inf }
 0x8a9   :  { %964 = vmax.xlane.f32.xlu2 %v963_v46 }
 0x8ac   :  { %v156_v28 = vld [vmem:[%s3312_s18] sm:$0x3]  ;;  %s4268_s18 = sld [smem:[%s4658_s0 + %s3801_s30]]   ;;  %s3809_s30 = smov 30  }
 0x8ad   :  { %vm157_vm11 = vcmp.gt.f32.partialorder %v156_v28, 0.5 }
 0x8b4   :  { %v956_v47 = vpop.f32.mrf.mxu2 }
 0x8b5   :  { %v960_v3 = vmul.f32 0.35355338, %v956_v47 }
 0x8b7   :  { %v962_v48 = vsel %vm3886_vm5, -1e+09, %v960_v3 }
 0x8b8   :  { %v966_v49 = vsel %vm220_vm1, %v962_v48, -inf }
 0x8b9   :  { %967 = vmax.xlane.f32.xlu1 %v966_v49 }
 0x8d2   :  { %851 = vrot.lane.b32.xlu1 %v4018_v25, %s3780_s21 }
 0x8da   :  { %1011 = vrot.lane.b32.xlu1 %v4026_v27, %s3781_s22 }
 0x914   :  { %v831_v50 = vpop.xlane.xlu1 %830 }
 0x915   :  { %v835_v51 = vsub.f32 %v827_v38, %v831_v50  ;;  %v4090_v38 = vld [vmem:[%s3310_s3 + $0x8] sm:$0xff]  ;;  %s3800_s3 = smov 22  }
 0x916   :  { %s4255_s8 = sld [smem:[%s4658_s0 + %s3800_s3]]  }
 0x917   :  { %v837_v52 = vmul.f32 1.442695, %v835_v51  ;;  %v834_v53 = vpop.xlane.xlu0 %833  ;;  %s4365_s3 = sld [smem:[%s4658_s0 + %s3804_s24]]  }
 0x918   :  { %v836_v54 = vsub.f32 %v828_v40, %v834_v53  ;;  %v3596_v53 = vld [vmem:[%s4101_s10] ss:$0 sm:$0xff] }
 0x919   :  { %3653 = vpow2.f32 %v837_v52 }
 0x91a   :  { %v839_v55 = vmul.f32 1.442695, %v836_v54 }
 0x91c   :  { %v965_v56 = vpop.xlane.xlu2 %964  ;;  %3655 = vpow2.f32 %v839_v55 }
 0x91d   :  { %v969_v57 = vsub.f32 %v961_v45, %v965_v56 }
 0x91f   :  { %v3654_v58 = vpop.eup %3653  ;;  %v971_v59 = vmul.f32 1.442695, %v969_v57 }
 0x920   :  { %v841_v60 = vsel %vm220_vm1, %v3654_v58, 0.0 }
 0x921   :  { %3657 = vpow2.f32 %v971_v59  ;;  %842 = vadd.xlane.f32.xlu2 %v841_v60  ;;  %v3391_v60 = vld [vmem:[%s3959_s23 + $0x18] sm:$0xff] }
 0x922   :  { %v3656_v61 = vpop.eup %3655  ;;  %1174 = vmatpush.msrb.mxu2 %v3391_v60 }
 0x923   :  { %v844_v0 = vsel %vm220_vm1, %v3656_v61, 0.0 }
 0x927   :  { %v3658_v62 = vpop.eup %3657 }
 0x928   :  { %v975_v63 = vsel %vm220_vm1, %v3658_v62, 0.0 }
 0x929   :  { %976 = vadd.xlane.f32.xlu0 %v975_v63  ;;  %845 = vadd.xlane.f32.xlu2 %v844_v0 }
 0x92c   :  { %v968_v1 = vpop.xlane.xlu1 %967 }
 0x92d   :  { %v970_v4 = vsub.f32 %v962_v48, %v968_v1 }
 0x92f   :  { %v973_v5 = vmul.f32 1.442695, %v970_v4 }
 0x931   :  { %3659 = vpow2.f32 %v973_v5 }
 0x937   :  { %v3660_v7 = vpop.eup %3659 }
 0x938   :  { %v978_v9 = vsel %vm220_vm1, %v3660_v7, 0.0 }
 0x939   :  { %979 = vadd.xlane.f32.xlu2 %v978_v9 }
 0x93d   :  { %985 = vrot.lane.b32.xlu0 %v4018_v25, %s3781_s22 }
 0x944   :  { %v852_v10 = vpop.permute.xlu1 %851 }
 0x945   :  { %872 = vmatpush.msra.mxu3 %v852_v10 }
 0x94c   :  { %v1012_v25 = vpop.permute.xlu1 %1011 }
 0x951   :  { %877 = vrot.lane.b32.xlu2 %v4026_v27, %s3780_s21 }
 0x994   :  { %v843_v11 = vpop.xlane.xlu2 %842 }
 0x995   :  { %3661 = vrcp.f32 %v843_v11 }
 0x99b   :  { %v3662_v12 = vpop.eup %3661 }
 0x99c   :  { %v849_v13 = vmul.f32 %v3662_v12, %v3654_v58  ;;  %v977_v8 = vpop.xlane.xlu0 %976  ;;  %v846_v14 = vpop.xlane.xlu2 %845 }
 0x99d   :  { %3663 = vrcp.f32 %v977_v8 }
 0x99e   :  { %3378 = vmatmul.msk.f32.vlgmr.msra.gmra.mxu3 %vm220_vm1, %v849_v13  ;;  %3665 = vrcp.f32 %v846_v14 }
 0x9a3   :  { %v3664_v15 = vpop.eup %3663 }
 0x9a4   :  { %v983_v18 = vmul.f32 %v3664_v15, %v3658_v62  ;;  %v3666_v21 = vpop.eup %3665 }
 0x9a5   :  { %v850_v23 = vmul.f32 %v3666_v21, %v3656_v61  ;;  %v3390_v61 = vld [vmem:[%s3959_s23 + $0x10] sm:$0xff]  ;;  %s4379_s23 = sld [smem:[%s4658_s0 + %s3805_s26]]  }
 0x9a6   :  { %1175 = vmatpush.msrb.mxu2 %v3390_v61 }
 0x9ac   :  { %v980_v17 = vpop.xlane.xlu2 %979 }
 0x9ad   :  { %3667 = vrcp.f32 %v980_v17 }
 0x9af   :  { %v986_v19 = vpop.permute.xlu0 %985 }
 0x9b0   :  { %1006 = vmatpush.msrb.mxu3 %v986_v19 }
 0x9b1   :  { %3384 = vmatmul.msk.f32.vlgmr.msrb.gmra.mxu3 %vm220_vm1, %v983_v18 }
 0x9b3   :  { %v3668_v26 = vpop.eup %3667 }
 0x9b4   :  { %v878_v24 = vpop.permute.xlu2 %877  ;;  %v984_v27 = vmul.f32 %v3668_v26, %v3660_v7 }
 0x9b5   :  { %898 = vmatpush.msrb.mxu0 %v878_v24 }
 0x9b6   :  { %3379 = vmatmul.msk.f32.vlgmr.msrb.gmra.mxu0 %vm220_vm1, %v850_v23 }
 0x9b7   :  { %1032 = vmatpush.msra.mxu0 %v1012_v25  ;;  %v3597_v25 = vld [vmem:[%s3936_s4 + $0x1] ss:$0 sm:$0xff]  ;;  %s3797_s4 = smov 18  }
 0x9b9   :  { %1306 = vmatpush.msrb.mxu0 %v1278_v35 }
 0x9bb   :  { %1307 = vmatpush.msrb.mxu0 %v1277_v36 }
 0x9be   :  { %3385 = vmatmul.msk.f32.vlgmr.msra.gmra.mxu0 %vm220_vm1, %v984_v27 }
 0x9c6   :  { %3404 = vmatmul.msk.f32.vlgmr.msrb.gmra.mxu0 %vm187_vm0, %v4086_v37 }
 0x9ce   :  { %3405 = vmatmul.msk.f32.gmra.mxu0 %vm187_vm0, %v4090_v38 }
 0xa21   :  { %v874_v29 = vpop.f32.mrf.mxu3 }
 0xa33   :  { %v900_v30 = vpop.f32.mrf.mxu0 }
 0xa34   :  { %v1008_v31 = vpop.f32.mrf.mxu3 }
 0xa35   :  { %1039 = vrot.lane.b32.xlu0 %v1008_v31, %s3784_s1 }
 0xa3b   :  { %v1034_v33 = vpop.f32.mrf.mxu0 }
 0xa3c   :  { %1041 = vrot.lane.b32.xlu1 %v1034_v33, %s3784_s1 }
 0xa43   :  { %v1309_v50 = vpop.f32.mrf.mxu0 }
 0xa4b   :  { %v1312_v52 = vpop.f32.mrf.mxu0 }
 0xa4c   :  { %v4109_v54 = vadd.f32 %v3596_v53, %v1312_v52 }
 0xaa7   :  { %v1040_v39 = vpop.permute.xlu0 %1039 }
 0xaa8   :  { %v1045_v2 = vsel %vm220_vm1, %v874_v29, %v1040_v39  ;;  %v161_v39 = vlaneseq }
 0xaa9   :  { %3386 = vmatmul.msk.f32.vlgmr.msrb.gmra.mxu1 %vm187_vm0, %v1045_v2 }
 0xaae   :  { %v1042_v40 = vpop.permute.xlu1 %1041 }
 0xaaf   :  { %v1046_v41 = vsel %vm220_vm1, %v900_v30, %v1042_v40  ;;  %v3598_v30 = vld [vmem:[%s3947_s9 + $0x1] ss:$0 sm:$0xff]  ;;  %v166_v40 = vsel %vm157_vm11, 1, %v3779_v16  ;;  %s4407_s9 = sld [smem:[%s4658_s0 + %s3809_s30]]  }
 0xab1   :  { %3387 = vmatmul.msk.f32.gmra.mxu1 %vm187_vm0, %v1046_v41 }
 0xb26   :  { %v1073_v44 = vpop.f32.mrf.mxu1 }
 0xb27   :  { %v1074_v45 = vadd.f32 %v3595_v42, %v1073_v44 }
 0xb29   :  { %v1079_v46 = vadd.f32 %v1074_v45, %v4009_v6  ;;  %v4113_v6 = vadd.f32 %v3596_v53, %v1309_v50  ;;  %v162_v45 = vshrl.u32 %v161_v39, 7 }
 0xb2b   :  { %v1085_v47 = vsel %vm187_vm0, %v1079_v46, 0.0 }
 0xb2c   :  { %1086 = vadd.xlane.f32.xlu0 %v1085_v47  ;;  %v172_v47 = vperm.slane %v166_v40, 0 }
 0xb2e   :  { %v1076_v3 = vpop.f32.mrf.mxu1  ;;  %vm174_vm4 = vcmp.eq.s32.totalorder %v172_v47, 1 }
 0xb2f   :  { %v1077_v48 = vadd.f32 %v3595_v42, %v1076_v3 }
 0xb31   :  { %v1080_v49 = vadd.f32 %v1077_v48, %v4013_v22 }
 0xb33   :  { %v1088_v51 = vsel %vm187_vm0, %v1080_v49, 0.0 }
 0xb34   :  { %1089 = vadd.xlane.f32.xlu1 %v1088_v51 }
 0xb40   :  { %1343 = vrot.lane.b32.xlu0 %v4109_v54, %s3776_s15 }
 0xb4d   :  { %1316 = vrot.lane.b32.xlu1 %v4113_v6, %s3776_s15 }
 0xb55   :  { %1477 = vrot.lane.b32.xlu1 %v4109_v54, %s3775_s14 }
 0xb9f   :  { %v1087_v22 = vpop.xlane.xlu0 %1086 }
 0xba0   :  { %v1091_v55 = vmul.f32 %v1087_v22, %v3940_v43 }
 0xba2   :  { %v1093_v56 = vsub.f32 %v1079_v46, %v1091_v55  ;;  %v164_v46 = vand.u32 127, %v161_v39  ;;  %v3396_v55 = vld [vmem:[%s3967_s28 + $0x38] sm:$0xff] }
 0xba3   :  { %1206 = vmatpush.msra.mxu3 %v3396_v55 }
 0xba4   :  { %v1095_v57 = vmul.f32 %v1093_v56, %v1093_v56  ;;  %vm165_vm2 = vcmp.gt.s32.totalorder %v164_v46, %v162_v45 }
 0xba5   :  { %vm4155_vm6 = vmor %vm165_vm2, %vm174_vm4 }
 0xba6   :  { %v1097_v58 = vsel %vm187_vm0, %v1095_v57, 0.0  ;;  %v3394_v57 = vld [vmem:[%s3967_s28 + $0x28] sm:$0xff] }
 0xba7   :  { %1098 = vadd.xlane.f32.xlu2 %v1097_v58  ;;  %v1090_v59 = vpop.xlane.xlu1 %1089  ;;  %v3393_v58 = vld [vmem:[%s3967_s28 + $0x20] sm:$0xff] }
 0xba8   :  { %v1092_v62 = vmul.f32 %v1090_v59, %v3940_v43 }
 0xbaa   :  { %v1094_v63 = vsub.f32 %v1080_v49, %v1092_v62 }
 0xbac   :  { %v1096_v0 = vmul.f32 %v1094_v63, %v1094_v63 }
 0xbae   :  { %v1100_v1 = vsel %vm187_vm0, %v1096_v0, 0.0  ;;  %v167_v0 = vrot.slane %v166_v40, 1 }
 0xbaf   :  { %1101 = vadd.xlane.f32.xlu0 %v1100_v1 }
 0xbb0   :  { %vm168_vm7 = vcmp.ne.s32.totalorder %v167_v0, 0 }
 0xbb2   :  { %v1344_v4 = vpop.permute.xlu0 %1343 }
 0xbb3   :  { %3408 = vmatpush.xpose.msk.msra.mxu2 %vm220_vm1, %v1344_v4 }
 0xbbf   :  { %1449 = vrot.lane.b32.xlu2 %v4113_v6, %s3775_s14  ;;  %v1317_v5 = vpop.permute.xlu1 %1316 }
 0xbc0   :  { %3406 = vmatpush.xpose.msk.msra.mxu1 %vm220_vm1, %v1317_v5 }
 0xbc3   :  { %1447 = vrot.lane.b32.xlu0 %v4113_v6, %s3777_s16  ;;  %3407 = vmatmul.msk.f32.vlgmr.msra.gmra.mxu1 %vm220_vm1, %v4113_v6 }
 0xbc7   :  { %1475 = vrot.lane.b32.xlu2 %v4109_v54, %s3777_s16  ;;  %v1478_v41 = vpop.permute.xlu1 %1477 }
 0xc1a   :  { %v1099_v7 = vpop.xlane.xlu2 %1098 }
 0xc1b   :  { %v1103_v9 = vmul.f32 %v1099_v7, %v3940_v43  ;;  %v171_v7 = vsel %vm168_vm7, 1, %v3779_v16 }
 0xc1d   :  { %v1105_v10 = vadd.f32 1e-05, %v1103_v9 }
 0xc1f   :  { %3669 = vrsqrt.f32 %v1105_v10  ;;  %vm1113_vm9 = vweird.f32 %v1105_v10 }
 0xc22   :  { %v1102_v11 = vpop.xlane.xlu0 %1101  ;;  %v1450_v12 = vpop.permute.xlu2 %1449 }
 0xc23   :  { %v1104_v13 = vmul.f32 %v1102_v11, %v3940_v43  ;;  %3412 = vmatpush.xpose.msk.msrb.mxu1 %vm220_vm1, %v1450_v12  ;;  %v173_v12 = vperm.slane %v171_v7, 0 }
 0xc25   :  { %v3670_v8 = vpop.eup %3669  ;;  %v1106_v14 = vadd.f32 1e-05, %v1104_v13 }
 0xc26   :  { %v1108_v15 = vmul.f32 %v3670_v8, %v1105_v10  ;;  %vm1114_vm8 = vweird.f32 %v3670_v8 }
 0xc27   :  { %3671 = vrsqrt.f32 %v1106_v14  ;;  %vm1115_vm10 = vmor %vm1113_vm9, %vm1114_vm8  ;;  %vm1123_vm14 = vweird.f32 %v1106_v14  ;;  %vm175_vm8 = vcmp.eq.s32.totalorder %v173_v12, 1 }
 0xc28   :  { %v1109_v17 = vmul.f32 %v3670_v8, %v1108_v15  ;;  %vm4177_vm9 = vmor %vm165_vm2, %vm175_vm8 }
 0xc2a   :  { %v1110_v18 = vmul.f32 0.5, %v1109_v17  ;;  %v1476_v22 = vpop.permute.xlu2 %1475 }
 0xc2c   :  { %v1111_v19 = vsub.f32 1.5, %v1110_v18 }
 0xc2d   :  { %v3672_v21 = vpop.eup %3671 }
 0xc2e   :  { %v1112_v23 = vmul.f32 %v3670_v8, %v1111_v19  ;;  %v1118_v24 = vmul.f32 %v3672_v21, %v1106_v14  ;;  %vm1124_vm12 = vweird.f32 %v3672_v21 }
 0xc2f   :  { %vm1125_vm15 = vmor %vm1123_vm14, %vm1124_vm12 }
 0xc30   :  { %v1116_v26 = vsel %vm1115_vm10, %v3670_v8, %v1112_v23  ;;  %v1119_v27 = vmul.f32 %v3672_v21, %v1118_v24 }
 0xc31   :  { %v1127_v29 = vmul.f32 %v1116_v26, %v1093_v56  ;;  %v3395_v56 = vld [vmem:[%s3967_s28 + $0x30] sm:$0xff]  ;;  %s4213_s28 = sld [smem:[%s4658_s0 + %s3797_s4]]   ;;  %s3802_s4 = smov 23  }
 0xc32   :  { %v1120_v31 = vmul.f32 0.5, %v1119_v27  ;;  %1207 = vmatpush.msra.mxu3 %v3395_v56 }
 0xc33   :  { %v1132_v33 = vmul.f32 %v3597_v25, %v1127_v29 }
 0xc34   :  { %v1121_v34 = vsub.f32 1.5, %v1120_v31  ;;  %1208 = vmatpush.msra.mxu3 %v3394_v57 }
 0xc35   :  { %v1448_v35 = vpop.permute.xlu0 %1447  ;;  %v4143_v36 = vadd.f32 %v3598_v30, %v1132_v33 }
 0xc36   :  { %v1122_v2 = vmul.f32 %v3672_v21, %v1121_v34  ;;  %3413 = vmatmul.msk.f32.vlgmr.msrb.gmra.mxu1 %vm220_vm1, %v1448_v35  ;;  %1209 = vmatpush.msra.mxu3 %v3393_v58  ;;  %v3600_v34 = vld [vmem:[%s3978_s5 + $0x1] ss:$0 sm:$0xff]  ;;  %s3798_s5 = smov 19  }
 0xc37   :  { %3398 = vmatmul.msk.f32.vlgmr.msrb.gmra.mxu2 %vm187_vm0, %v4143_v36  ;;  %s4220_s13 = sld [smem:[%s4658_s0 + %s3798_s5]]  }
 0xc38   :  { %v1126_v42 = vsel %vm1125_vm15, %v3672_v21, %v1122_v2  ;;  %3414 = vmatpush.xpose.msk.msrb.mxu2 %vm220_vm1, %v1478_v41  ;;  %s4274_s5 = sld [smem:[%s4658_s0 + %s3802_s4]]   ;;  %s3812_s4 = smov 33  }
 0xc39   :  { %v1128_v44 = vmul.f32 %v1126_v42, %v1094_v63  ;;  %v3599_v63 = vld [vmem:[%s3954_s17 + $0x1] ss:$0 sm:$0xff]  ;;  %s4390_s17 = sld [smem:[%s4658_s0 + %s3806_s12]]  }
 0xc3a   :  { %s4432_s12 = sld [smem:[%s4658_s0 + %s3811_s29]]  }
 0xc3b   :  { %v1133_v3 = vmul.f32 %v3597_v25, %v1128_v44  ;;  %s4442_s19 = sld [smem:[%s4658_s0 + %s3812_s4]]  }
 0xc3d   :  { %v4150_v48 = vadd.f32 %v3598_v30, %v1133_v3 }
 0xc3f   :  { %3399 = vmatmul.msk.f32.gmra.mxu2 %vm187_vm0, %v4150_v48 }
 0xc40   :  { %v1339_v49 = vpop.f32.mrf.mxu1 }
 0xc41   :  { %v1369_v51 = vmul.f32 0.35355338, %v1339_v49 }
 0xc43   :  { %v1371_v52 = vsel %vm4155_vm6, -1e+09, %v1369_v51 }
 0xc44   :  { %v1373_v53 = vsel %vm220_vm1, %v1371_v52, -inf }
 0xc45   :  { %1374 = vmax.xlane.f32.xlu0 %v1373_v53 }
 0xc47   :  { %3409 = vmatmul.msk.f32.vlgmr.msra.gmra.mxu2 %vm220_vm1, %v4109_v54 }
 0xc4f   :  { %3415 = vmatmul.msk.f32.vlgmr.msrb.gmra.mxu2 %vm220_vm1, %v1476_v22 }
 0xcb3   :  { %v1472_v59 = vpop.f32.mrf.mxu1 }
 0xcb4   :  { %v1503_v60 = vmul.f32 0.35355338, %v1472_v59 }
 0xcb6   :  { %v1505_v61 = vsel %vm4155_vm6, -1e+09, %v1503_v60 }
 0xcb7   :  { %v1507_v62 = vsel %vm220_vm1, %v1505_v61, -inf }
 0xcb8   :  { %1508 = vmax.xlane.f32.xlu1 %v1507_v62  ;;  %v1375_v9 = vpop.xlane.xlu0 %1374 }
 0xcb9   :  { %v1379_v13 = vsub.f32 %v1371_v52, %v1375_v9 }
 0xcba   :  { %v1177_v1 = vpop.f32.mrf.mxu2 }
 0xcbb   :  { %v1178_v4 = vadd.f32 %v3599_v63, %v1177_v1  ;;  %v1381_v14 = vmul.f32 1.442695, %v1379_v13 }
 0xcbd   :  { %v1183_v5 = vmax.f32 %v1178_v4, 0.0  ;;  %3673 = vpow2.f32 %v1381_v14  ;;  %v1280_v14 = vld [vmem:[%s4213_s28] sm:$0xff] }
 0xcbf   :  { %3400 = vmatmul.msk.f32.vlgmr.msra.gmra.mxu3 %vm641_vm13, %v1183_v5 }
 0xcc2   :  { %v1180_v10 = vpop.f32.mrf.mxu2 }
 0xcc3   :  { %v1181_v11 = vadd.f32 %v3599_v63, %v1180_v10  ;;  %v3674_v23 = vpop.eup %3673 }
 0xcc4   :  { %v1385_v26 = vsel %vm220_vm1, %v3674_v23, 0.0 }
 0xcc5   :  { %v1184_v8 = vmax.f32 %v1181_v11, 0.0  ;;  %v1281_v11 = vld [vmem:[%s4213_s28 + $0x8] sm:$0xff] }
 0xcc6   :  { %1614 = vmatpush.msra.mxu1 %v1281_v11 }
 0xcc7   :  { %3401 = vmatmul.msk.f32.gmra.mxu3 %vm641_vm13, %v1184_v8 }
 0xcc8   :  { %1615 = vmatpush.msra.mxu1 %v1280_v14  ;;  %v3602_v14 = vld [vmem:[%s3991_s11 + $0x1] ss:$0 sm:$0xff]  ;;  %s3803_s11 = smov 25  }
 0xcc9   :  { %s4358_s6 = sld [smem:[%s4658_s0 + %s3803_s11]]   ;;  %s3807_s11 = smov 29  }
 0xcca   :  { %v1366_v15 = vpop.f32.mrf.mxu2  ;;  %s4395_s24 = sld [smem:[%s4658_s0 + %s3807_s11]]   ;;  %s3810_s11 = smov 31  }
 0xccb   :  { %v1370_v18 = vmul.f32 0.35355338, %v1366_v15  ;;  %s4419_s27 = sld [smem:[%s4658_s0 + %s3810_s11]]  }
 0xccd   :  { %v1372_v16 = vsel %vm4177_vm9, -1e+09, %v1370_v18 }
 0xcce   :  { %v1376_v19 = vsel %vm220_vm1, %v1372_v16, -inf }
 0xccf   :  { %1377 = vmax.xlane.f32.xlu2 %v1376_v19 }
 0xcd2   :  { %v1500_v21 = vpop.f32.mrf.mxu2 }
 0xcd3   :  { %v1504_v24 = vmul.f32 0.35355338, %v1500_v21  ;;  %v3601_v21 = vld [vmem:[%s4220_s13] ss:$0 sm:$0xff] }
 0xcd5   :  { %v1506_v25 = vsel %vm4177_vm9, -1e+09, %v1504_v24 }
 0xcd6   :  { %v1510_v27 = vsel %vm220_vm1, %v1506_v25, -inf }
 0xcd7   :  { %1386 = vadd.xlane.f32.xlu2 %v1385_v26  ;;  %1511 = vmax.xlane.f32.xlu0 %v1510_v27 }
 0xceb   :  { %1395 = vrot.lane.b32.xlu0 %v4113_v6, %s3780_s21 }
 0xcf3   :  { %1555 = vrot.lane.b32.xlu0 %v4109_v54, %s3781_s22 }
 0xd2b   :  { %v1509_v28 = vpop.xlane.xlu1 %1508 }
 0xd2c   :  { %v1513_v29 = vsub.f32 %v1505_v61, %v1509_v28 }
 0xd2e   :  { %v1515_v30 = vmul.f32 1.442695, %v1513_v29 }
 0xd30   :  { %3675 = vpow2.f32 %v1515_v30 }
 0xd36   :  { %v3676_v31 = vpop.eup %3675 }
 0xd37   :  { %v1519_v33 = vsel %vm220_vm1, %v3676_v31, 0.0 }
 0xd38   :  { %1520 = vadd.xlane.f32.xlu1 %v1519_v33 }
 0xd42   :  { %v1211_v35 = vpop.f32.mrf.mxu3  ;;  %v1378_v39 = vpop.xlane.xlu2 %1377 }
 0xd43   :  { %v1212_v2 = vadd.f32 %v3600_v34, %v1211_v35  ;;  %v1380_v40 = vsub.f32 %v1372_v16, %v1378_v39 }
 0xd45   :  { %v1383_v41 = vmul.f32 1.442695, %v1380_v40  ;;  %v1217_v13 = vadd.f32 %v1212_v2, %v4143_v36 }
 0xd47   :  { %3677 = vpow2.f32 %v1383_v41  ;;  %v1223_v8 = vsel %vm187_vm0, %v1217_v13, 0.0 }
 0xd4a   :  { %v1512_v42 = vpop.xlane.xlu0 %1511  ;;  %v1387_v3 = vpop.xlane.xlu2 %1386 }
 0xd4b   :  { %v1514_v44 = vsub.f32 %v1506_v25, %v1512_v42  ;;  %v1214_v55 = vpop.f32.mrf.mxu3 }
 0xd4c   :  { %v1215_v56 = vadd.f32 %v3600_v34, %v1214_v55 }
 0xd4d   :  { %v3678_v45 = vpop.eup %3677  ;;  %v1517_v46 = vmul.f32 1.442695, %v1514_v44 }
 0xd4e   :  { %v1388_v47 = vsel %vm220_vm1, %v3678_v45, 0.0  ;;  %v4202_v57 = vadd.f32 %v1215_v56, %v4150_v48 }
 0xd4f   :  { %1389 = vadd.xlane.f32.xlu2 %v1388_v47  ;;  %3679 = vpow2.f32 %v1517_v46  ;;  %v1682_v47 = vld [vmem:[%s4255_s8 + $0x8] sm:$0xff] }
 0xd50   :  { %3681 = vrcp.f32 %v1387_v3  ;;  %1710 = vmatpush.msra.mxu2 %v1682_v47  ;;  %v1681_v3 = vld [vmem:[%s4255_s8] sm:$0xff] }
 0xd51   :  { %1529 = vrot.lane.b32.xlu1 %v4113_v6, %s3781_s22  ;;  %v1226_v6 = vsel %vm187_vm0, %v4202_v57, 0.0  ;;  %v3556_v55 = vpack.i.bf16 %v1681_v3, %v1682_v47 }
 0xd52   :  { %1711 = vmatpush.msra.mxu2 %v1681_v3 }
 0xd55   :  { %v3680_v49 = vpop.eup %3679 }
 0xd56   :  { %v1522_v51 = vsel %vm220_vm1, %v3680_v49, 0.0  ;;  %v3682_v52 = vpop.eup %3681 }
 0xd57   :  { %1523 = vadd.xlane.f32.xlu2 %v1522_v51  ;;  %v1393_v53 = vmul.f32 %v3682_v52, %v3674_v23 }
 0xd5d   :  { %v1396_v22 = vpop.permute.xlu0 %1395 }
 0xd5e   :  { %1416 = vmatpush.msrb.mxu3 %v1396_v22 }
 0xd5f   :  { %3410 = vmatmul.msk.f32.vlgmr.msrb.gmra.mxu3 %vm220_vm1, %v1393_v53 }
 0xd65   :  { %v1556_v1 = vpop.permute.xlu0 %1555 }
 0xd6f   :  { %1421 = vrot.lane.b32.xlu2 %v4109_v54, %s3780_s21 }
 0xd98   :  { %1227 = vadd.xlane.f32.xlu2 %v1226_v6 }
 0xdab   :  { %v1521_v58 = vpop.xlane.xlu1 %1520 }
 0xdac   :  { %3683 = vrcp.f32 %v1521_v58 }
 0xdb2   :  { %v3684_v59 = vpop.eup %3683 }
 0xdb3   :  { %v1527_v61 = vmul.f32 %v3684_v59, %v3676_v31 }
 0xdc2   :  { %v1390_v60 = vpop.xlane.xlu2 %1389 }
 0xdc3   :  { %v1530_v62 = vpop.permute.xlu1 %1529  ;;  %3685 = vrcp.f32 %v1390_v60 }
 0xdc4   :  { %1550 = vmatpush.msra.mxu3 %v1530_v62 }
 0xdc5   :  { %3416 = vmatmul.msk.f32.vlgmr.msra.gmra.mxu3 %vm220_vm1, %v1527_v61 }
 0xdc9   :  { %v3686_v63 = vpop.eup %3685 }
 0xdca   :  { %v1524_v54 = vpop.xlane.xlu2 %1523  ;;  %v1394_v0 = vmul.f32 %v3686_v63, %v3678_v45 }
 0xdcb   :  { %3687 = vrcp.f32 %v1524_v54 }
 0xdd1   :  { %v3688_v4 = vpop.eup %3687 }
 0xdd2   :  { %v1422_v48 = vpop.permute.xlu2 %1421  ;;  %v1528_v5 = vmul.f32 %v3688_v4, %v3680_v49 }
 0xdd3   :  { %1442 = vmatpush.msra.mxu0 %v1422_v48 }
 0xdd4   :  { %3411 = vmatmul.msk.f32.vlgmr.msra.gmra.mxu0 %vm220_vm1, %v1394_v0 }
 0xdd5   :  { %1576 = vmatpush.msrb.mxu0 %v1556_v1 }
 0xddc   :  { %3417 = vmatmul.msk.f32.vlgmr.msrb.gmra.mxu0 %vm220_vm1, %v1528_v5 }
 0xde2   :  { %v1418_v7 = vpop.f32.mrf.mxu3 }
 0xe0b   :  { %v1228_v31 = vpop.xlane.xlu2 %1227 }
 0xe0c   :  { %v1230_v34 = vmul.f32 %v1228_v31, %v3940_v43 }
 0xe48   :  { %v1552_v9 = vpop.f32.mrf.mxu3 }
 0xe49   :  { %1583 = vrot.lane.b32.xlu0 %v1552_v9, %s3784_s1  ;;  %v4285_v9 = vld [vmem:[%s4274_s5] ss:$0 sm:$0xff] }
 0xe51   :  { %v1444_v10 = vpop.f32.mrf.mxu0 }
 0xe59   :  { %v1578_v12 = vpop.f32.mrf.mxu0 }
 0xe5a   :  { %1585 = vrot.lane.b32.xlu1 %v1578_v12, %s3784_s1 }
 0xe73   :  { %1224 = vadd.xlane.f32.xlu0 %v1223_v8 }
 0xebb   :  { %v1584_v15 = vpop.permute.xlu0 %1583 }
 0xebc   :  { %v1589_v18 = vsel %vm220_vm1, %v1418_v7, %v1584_v15 }
 0xebd   :  { %3418 = vmatmul.msk.f32.vlgmr.msra.gmra.mxu1 %vm187_vm0, %v1589_v18 }
 0xecc   :  { %v1586_v16 = vpop.permute.xlu1 %1585 }
 0xecd   :  { %v1590_v19 = vsel %vm220_vm1, %v1444_v10, %v1586_v16 }
 0xece   :  { %3419 = vmatmul.msk.f32.gmra.mxu1 %vm187_vm0, %v1590_v19 }
 0xee6   :  { %v1225_v23 = vpop.xlane.xlu0 %1224 }
 0xee7   :  { %v1229_v36 = vmul.f32 %v1225_v23, %v3940_v43 }
 0xee9   :  { %v4232_v27 = vsub.f32 %v1217_v13, %v1229_v36 }
 0xeeb   :  { %v1233_v29 = vmul.f32 %v4232_v27, %v4232_v27 }
 0xeed   :  { %v1235_v30 = vsel %vm187_vm0, %v1233_v29, 0.0 }
 0xf3a   :  { %v1617_v24 = vpop.f32.mrf.mxu1 }
 0xf3b   :  { %v1618_v25 = vadd.f32 %v3601_v21, %v1617_v24 }
 0xf3d   :  { %v1623_v26 = vadd.f32 %v1618_v25, %v4086_v37  ;;  %v4241_v37 = vsub.f32 %v4202_v57, %v1230_v34 }
 0xf3f   :  { %v1627_v28 = vsel %vm187_vm0, %v1623_v26, 0.0  ;;  %v1234_v40 = vmul.f32 %v4241_v37, %v4241_v37 }
 0xf40   :  { %1628 = vadd.xlane.f32.xlu1 %v1627_v28 }
 0xf41   :  { %v1238_v41 = vsel %vm187_vm0, %v1234_v40, 0.0  ;;  %v3603_v40 = vld [vmem:[%s4250_s2] ss:$0 sm:$0xff] }
 0xf48   :  { %1236 = vadd.xlane.f32.xlu1 %v1235_v30 }
 0xf4b   :  { %v1620_v33 = vpop.f32.mrf.mxu1 }
 0xf4c   :  { %v1621_v35 = vadd.f32 %v3601_v21, %v1620_v33  ;;  %v3604_v21 = vld [vmem:[%s3999_s20 + $0x1] ss:$0 sm:$0xff] }
 0xf4e   :  { %v1624_v39 = vadd.f32 %v1621_v35, %v4090_v38 }
 0xf50   :  { %v1630_v2 = vsel %vm187_vm0, %v1624_v39, 0.0 }
 0xf51   :  { %1631 = vadd.xlane.f32.xlu0 %v1630_v2 }
 0xf59   :  { %1239 = vadd.xlane.f32.xlu0 %v1238_v41 }
 0xf6d   :  { %1727 = vrot.lane.b32.xlu0 %v4285_v9, %s3776_s15 }
 0xfb3   :  { %v1629_v42 = vpop.xlane.xlu1 %1628 }
 0xfb4   :  { %v1633_v38 = vmul.f32 %v1629_v42, %v3940_v43 }
 0xfb6   :  { %v4258_v44 = vsub.f32 %v1623_v26, %v1633_v38  ;;  %v3605_v38 = vld [vmem:[%s4268_s18] ss:$0 sm:$0xff] }
 0xfb8   :  { %v1637_v45 = vmul.f32 %v4258_v44, %v4258_v44 }
 0xfba   :  { %v1639_v46 = vsel %vm187_vm0, %v1637_v45, 0.0 }
 0xfbb   :  { %1640 = vadd.xlane.f32.xlu2 %v1639_v46  ;;  %v1237_v56 = vpop.xlane.xlu1 %1236 }
 0xfbc   :  { %v1241_v57 = vmul.f32 %v1237_v56, %v3940_v43 }
 0xfbe   :  { %v1243_v6 = vadd.f32 1e-05, %v1241_v57 }
 0xfc0   :  { %3689 = vrsqrt.f32 %v1243_v6  ;;  %vm1251_vm11 = vweird.f32 %v1243_v6 }
 0xfc4   :  { %v1632_v49 = vpop.xlane.xlu0 %1631 }
 0xfc5   :  { %v1634_v51 = vmul.f32 %v1632_v49, %v3940_v43 }
 0xfc6   :  { %v3690_v61 = vpop.eup %3689 }
 0xfc7   :  { %v4276_v52 = vsub.f32 %v1624_v39, %v1634_v51  ;;  %v1246_v62 = vmul.f32 %v3690_v61, %v1243_v6  ;;  %vm1252_vm10 = vweird.f32 %v3690_v61 }
 0xfc8   :  { %vm1253_vm12 = vmor %vm1251_vm11, %vm1252_vm10 }
 0xfc9   :  { %v1638_v53 = vmul.f32 %v4276_v52, %v4276_v52  ;;  %v1247_v54 = vmul.f32 %v3690_v61, %v1246_v62 }
 0xfcb   :  { %v1642_v22 = vsel %vm187_vm0, %v1638_v53, 0.0  ;;  %v1248_v0 = vmul.f32 0.5, %v1247_v54 }
 0xfcc   :  { %1643 = vadd.xlane.f32.xlu1 %v1642_v22  ;;  %v1240_v58 = vpop.xlane.xlu0 %1239 }
 0xfcd   :  { %v1242_v59 = vmul.f32 %v1240_v58, %v3940_v43  ;;  %v1249_v1 = vsub.f32 1.5, %v1248_v0 }
 0xfcf   :  { %v1244_v60 = vadd.f32 1e-05, %v1242_v59  ;;  %v1250_v5 = vmul.f32 %v3690_v61, %v1249_v1 }
 0xfd1   :  { %3691 = vrsqrt.f32 %v1244_v60  ;;  %v1254_v11 = vsel %vm1253_vm12, %v3690_v61, %v1250_v5  ;;  %vm1261_vm15 = vweird.f32 %v1244_v60 }
 0xfd2   :  { %v1265_v15 = vmul.f32 %v1254_v11, %v4232_v27 }
 0xfd3   :  { %3557 = vrot.lane.b32.xlu2 %v3556_v55, %s3776_s15 }
 0xfd4   :  { %v1270_v16 = vmul.f32 %v3602_v14, %v1265_v15 }
 0xfd6   :  { %v4293_v28 = vadd.f32 %v3604_v21, %v1270_v16 }
 0xfd7   :  { %v3692_v63 = vpop.eup %3691 }
 0xfd8   :  { %v1256_v48 = vmul.f32 %v3692_v63, %v1244_v60  ;;  %vm1262_vm14 = vweird.f32 %v3692_v63 }
 0xfd9   :  { %vm1263_vm2 = vmor %vm1261_vm15, %vm1262_vm14 }
 0xfda   :  { %v1257_v4 = vmul.f32 %v3692_v63, %v1256_v48 }
 0xfdc   :  { %v1258_v7 = vmul.f32 0.5, %v1257_v4 }
 0xfde   :  { %v1259_v12 = vsub.f32 1.5, %v1258_v7 }
 0xfdf   :  { %v1728_v6 = vpop.permute.xlu0 %1727 }
 0xfe0   :  { %v1260_v18 = vmul.f32 %v3692_v63, %v1259_v12 }
 0xfe2   :  { %v1264_v23 = vsel %vm1263_vm2, %v3692_v63, %v1260_v18 }
 0xfe3   :  { %v1266_v29 = vmul.f32 %v1264_v23, %v4241_v37 }
 0xfe5   :  { %v1271_v31 = vmul.f32 %v3602_v14, %v1266_v29 }
 0xfe7   :  { %v4299_v2 = vadd.f32 %v3604_v21, %v1271_v31 }
0x102e   :  { %v1641_v10 = vpop.xlane.xlu2 %1640 }
0x102f   :  { %v1645_v13 = vmul.f32 %v1641_v10, %v3940_v43 }
0x1031   :  { %v1647_v8 = vadd.f32 1e-05, %v1645_v13 }
0x1033   :  { %3693 = vrsqrt.f32 %v1647_v8  ;;  %vm1655_vm7 = vweird.f32 %v1647_v8 }
0x1036   :  { %v3558_v19 = vpop.permute.xlu2 %3557 }
0x1037   :  { %v3560_v24 = vunpack.i.h.bf16 %v3558_v19  ;;  %v3559_v36 = vunpack.i.l.bf16 %v3558_v19 }
0x1039   :  { %v3694_v25 = vpop.eup %3693  ;;  %1750 = vmatpush.msrb.mxu3 %v3559_v36 }
0x103a   :  { %v1650_v26 = vmul.f32 %v3694_v25, %v1647_v8  ;;  %vm1656_vm4 = vweird.f32 %v3694_v25 }
0x103b   :  { %1751 = vmatpush.msrb.mxu3 %v3560_v24  ;;  %vm1657_vm8 = vmor %vm1655_vm7, %vm1656_vm4 }
0x103c   :  { %v1651_v27 = vmul.f32 %v3694_v25, %v1650_v26  ;;  %3422 = vmatmul.msk.f32.vlgmr.msrb.gmra.mxu3 %vm187_vm0, %v4293_v28 }
0x103e   :  { %v1652_v30 = vmul.f32 0.5, %v1651_v27 }
0x103f   :  { %v1644_v34 = vpop.xlane.xlu1 %1643 }
0x1040   :  { %v1653_v33 = vsub.f32 1.5, %v1652_v30  ;;  %v1646_v35 = vmul.f32 %v1644_v34, %v3940_v43 }
0x1042   :  { %v1654_v39 = vmul.f32 %v3694_v25, %v1653_v33  ;;  %v1648_v37 = vadd.f32 1e-05, %v1646_v35 }
0x1044   :  { %v1658_v41 = vsel %vm1657_vm8, %v3694_v25, %v1654_v39  ;;  %3423 = vmatmul.msk.f32.gmra.mxu3 %vm187_vm0, %v4299_v2  ;;  %3695 = vrsqrt.f32 %v1648_v37  ;;  %vm1665_vm11 = vweird.f32 %v1648_v37 }
0x1045   :  { %v1669_v42 = vmul.f32 %v1658_v41, %v4258_v44 }
0x1047   :  { %v1674_v45 = vmul.f32 %v3603_v40, %v1669_v42 }
0x1049   :  { %v4306_v46 = vadd.f32 %v3605_v38, %v1674_v45 }
0x104a   :  { %v3696_v47 = vpop.eup %3695 }
0x104b   :  { %3420 = vmatmul.msk.f32.vlgmr.msra.gmra.mxu2 %vm187_vm0, %v4306_v46  ;;  %v1660_v3 = vmul.f32 %v3696_v47, %v1648_v37  ;;  %vm1666_vm10 = vweird.f32 %v3696_v47 }
0x104c   :  { %vm1667_vm12 = vmor %vm1665_vm11, %vm1666_vm10 }
0x104d   :  { %v1661_v49 = vmul.f32 %v3696_v47, %v1660_v3 }
0x104f   :  { %v1662_v51 = vmul.f32 0.5, %v1661_v49 }
0x1051   :  { %v1663_v53 = vsub.f32 1.5, %v1662_v51 }
0x1053   :  { %v1664_v22 = vmul.f32 %v3696_v47, %v1663_v53 }
0x1055   :  { %v1668_v55 = vsel %vm1667_vm12, %v3696_v47, %v1664_v22 }
0x1056   :  { %v1670_v44 = vmul.f32 %v1668_v55, %v4276_v52 }
0x1058   :  { %v1675_v56 = vmul.f32 %v3603_v40, %v1670_v44 }
0x105a   :  { %v4311_v57 = vadd.f32 %v3605_v38, %v1675_v56 }
0x105c   :  { %3421 = vmatmul.msk.f32.gmra.mxu2 %vm187_vm0, %v4311_v57 }
0x10bf   :  { %v1753_v58 = vpop.f32.mrf.mxu3 }
0x10c0   :  { %v1754_v59 = vadd.f32 %v1753_v58, %v1728_v6 }
0x10c2   :  { %1891 = vrot.lane.b32.xlu1 %v1754_v59, %s3777_s16  ;;  %3424 = vmatpush.xpose.msk.msra.mxu0 %vm220_vm1, %v1754_v59 }
0x10c7   :  { %v1756_v60 = vpop.f32.mrf.mxu3 }
0x10c8   :  { %v1757_v61 = vadd.f32 %v1756_v60, %v1728_v6 }
0x10ca   :  { %1919 = vrot.lane.b32.xlu2 %v1757_v61, %s3777_s16  ;;  %3426 = vmatpush.xpose.msk.msrb.mxu0 %vm220_vm1, %v1757_v61  ;;  %v4319_v52 = vpack.i.bf16 %v1757_v61, %v1754_v59 }
0x10ce   :  { %v1713_v62 = vpop.f32.mrf.mxu2 }
0x10cf   :  { %v1714_v54 = vadd.f32 %v4285_v9, %v1713_v62 }
0x10d1   :  { %1889 = vrot.lane.b32.xlu0 %v1714_v54, %s3777_s16  ;;  %3425 = vmatmul.msk.f32.vlgmr.msra.gmra.mxu0 %vm220_vm1, %v1714_v54 }
0x10df   :  { %v1716_v63 = vpop.f32.mrf.mxu2 }
0x10e0   :  { %v1717_v0 = vadd.f32 %v4285_v9, %v1716_v63 }
0x10e2   :  { %1917 = vrot.lane.b32.xlu1 %v1717_v0, %s3777_s16  ;;  %3427 = vmatmul.msk.f32.vlgmr.msrb.gmra.mxu0 %vm220_vm1, %v1717_v0 }
0x1124   :  { %v1920_v48 = vpop.permute.xlu2 %1919 }
0x1125   :  { %3432 = vmatpush.xpose.msk.msra.mxu0 %vm220_vm1, %v1920_v48 }
0x1134   :  { %v1892_v1 = vpop.permute.xlu1 %1891 }
0x1135   :  { %3430 = vmatpush.xpose.msk.msra.mxu3 %vm220_vm1, %v1892_v1 }
0x1143   :  { %v1890_v4 = vpop.permute.xlu0 %1889 }
0x1144   :  { %3431 = vmatmul.msk.f32.vlgmr.msra.gmra.mxu3 %vm220_vm1, %v1890_v4 }
0x114e   :  { %v1782_v5 = vpop.f32.mrf.mxu0 }
0x114f   :  { %v1811_v7 = vmul.f32 0.35355338, %v1782_v5 }
0x1151   :  { %v1813_v10 = vsel %vm3875_vm3, -1e+09, %v1811_v7 }
0x1152   :  { %v1815_v9 = vsel %vm220_vm1, %v1813_v10, -inf }
0x1153   :  { %1816 = vmax.xlane.f32.xlu0 %v1815_v9 }
0x1154   :  { %v1918_v11 = vpop.permute.xlu1 %1917 }
0x1155   :  { %3433 = vmatmul.msk.f32.vlgmr.msra.gmra.mxu0 %vm220_vm1, %v1918_v11  ;;  %v1685_v11 = vld [vmem:[%s4365_s3 + $0x8] sm:$0xff] }
0x1156   :  { %2056 = vmatpush.msrb.mxu3 %v1685_v11  ;;  %v2127_v11 = vld [vmem:[%s4407_s9 + $0x8] sm:$0xff] }
0x115f   :  { %v1808_v12 = vpop.f32.mrf.mxu0 }
0x1160   :  { %v1812_v13 = vmul.f32 0.35355338, %v1808_v12  ;;  %v1684_v12 = vld [vmem:[%s4365_s3] sm:$0xff] }
0x1161   :  { %2057 = vmatpush.msrb.mxu3 %v1684_v12  ;;  %v2126_v12 = vld [vmem:[%s4407_s9] sm:$0xff] }
0x1162   :  { %v1814_v8 = vsel %vm3886_vm5, -1e+09, %v1812_v13 }
0x1163   :  { %v1818_v14 = vsel %vm220_vm1, %v1814_v8, -inf }
0x1164   :  { %1819 = vmax.xlane.f32.xlu2 %v1818_v14 }
0x11c6   :  { %v1817_v15 = vpop.xlane.xlu0 %1816 }
0x11c7   :  { %v1821_v18 = vsub.f32 %v1813_v10, %v1817_v15  ;;  %v1914_v16 = vpop.f32.mrf.mxu3 }
0x11c8   :  { %v1945_v19 = vmul.f32 0.35355338, %v1914_v16 }
0x11c9   :  { %v1823_v21 = vmul.f32 1.442695, %v1821_v18  ;;  %v3607_v18 = vld [vmem:[%s4358_s6] ss:$0 sm:$0xff] }
0x11ca   :  { %v1947_v23 = vsel %vm3875_vm3, -1e+09, %v1945_v19 }
0x11cb   :  { %3697 = vpow2.f32 %v1823_v21  ;;  %v1949_v24 = vsel %vm220_vm1, %v1947_v23, -inf }
0x11cc   :  { %1950 = vmax.xlane.f32.xlu1 %v1949_v24 }
0x11d1   :  { %v3698_v36 = vpop.eup %3697 }
0x11d2   :  { %v1827_v25 = vsel %vm220_vm1, %v3698_v36, 0.0  ;;  %v1942_v26 = vpop.f32.mrf.mxu0 }
0x11d3   :  { %1828 = vadd.xlane.f32.xlu2 %v1827_v25  ;;  %v1946_v29 = vmul.f32 0.35355338, %v1942_v26 }
0x11d5   :  { %v1948_v27 = vsel %vm3886_vm5, -1e+09, %v1946_v29 }
0x11d6   :  { %v1952_v30 = vsel %vm220_vm1, %v1948_v27, -inf }
0x11d7   :  { %v1820_v31 = vpop.xlane.xlu2 %1819  ;;  %1953 = vmax.xlane.f32.xlu0 %v1952_v30 }
0x11d8   :  { %v1822_v33 = vsub.f32 %v1814_v8, %v1820_v31 }
0x11da   :  { %v1825_v34 = vmul.f32 1.442695, %v1822_v33 }
0x11dc   :  { %3699 = vpow2.f32 %v1825_v34 }
0x11e2   :  { %v3700_v35 = vpop.eup %3699 }
0x11e3   :  { %v1830_v39 = vsel %vm220_vm1, %v3700_v35, 0.0 }
0x11e4   :  { %1831 = vadd.xlane.f32.xlu1 %v1830_v39 }
0x11eb   :  { %3562 = vrot.lane.b32.xlu2 %v4319_v52, %s3776_s15 }
0x123f   :  { %v1951_v40 = vpop.xlane.xlu1 %1950 }
0x1240   :  { %v1955_v37 = vsub.f32 %v1947_v23, %v1951_v40 }
0x1242   :  { %v1957_v41 = vmul.f32 1.442695, %v1955_v37  ;;  %v2123_v37 = vld [vmem:[%s4400_s7] sm:$0xff] }
0x1244   :  { %3701 = vpow2.f32 %v1957_v41 }
0x1246   :  { %v1829_v42 = vpop.xlane.xlu2 %1828 }
0x1247   :  { %3703 = vrcp.f32 %v1829_v42 }
0x124a   :  { %v3702_v38 = vpop.eup %3701  ;;  %v1954_v45 = vpop.xlane.xlu0 %1953 }
0x124b   :  { %v1961_v47 = vsel %vm220_vm1, %v3702_v38, 0.0  ;;  %v1956_v3 = vsub.f32 %v1948_v27, %v1954_v45  ;;  %v2129_v45 = vld [vmem:[%s4407_s9 + $0x18] sm:$0xff] }
0x124c   :  { %1962 = vadd.xlane.f32.xlu0 %v1961_v47 }
0x124d   :  { %v3704_v49 = vpop.eup %3703  ;;  %v1959_v51 = vmul.f32 1.442695, %v1956_v3 }
0x124e   :  { %v3563_v53 = vpop.permute.xlu2 %3562  ;;  %v1835_v44 = vmul.f32 %v3704_v49, %v3698_v36 }
0x124f   :  { %v3565_v22 = vunpack.i.h.bf16 %v3563_v53  ;;  %v3564_v55 = vunpack.i.l.bf16 %v3563_v53  ;;  %3705 = vpow2.f32 %v1959_v51 }
0x1251   :  { %1858 = vmatpush.msrb.mxu1 %v3564_v55  ;;  %1884 = vmatpush.msrb.mxu2 %v3565_v22 }
0x1252   :  { %3428 = vmatmul.msk.f32.vlgmr.msrb.gmra.mxu1 %vm220_vm1, %v1835_v44 }
0x1255   :  { %v3706_v56 = vpop.eup %3705 }
0x1256   :  { %v1964_v6 = vsel %vm220_vm1, %v3706_v56, 0.0 }
0x1257   :  { %1965 = vadd.xlane.f32.xlu1 %v1964_v6  ;;  %v1832_v58 = vpop.xlane.xlu1 %1831 }
0x1258   :  { %3707 = vrcp.f32 %v1832_v58 }
0x125e   :  { %v3708_v59 = vpop.eup %3707 }
0x125f   :  { %v1836_v60 = vmul.f32 %v3708_v59, %v3700_v35  ;;  %v3608_v59 = vld [vmem:[%s4379_s23] ss:$0 sm:$0xff] }
0x1260   :  { %3567 = vrot.lane.b32.xlu0 %v4319_v52, %s3775_s14 }
0x1261   :  { %3429 = vmatmul.msk.f32.vlgmr.msrb.gmra.mxu2 %vm220_vm1, %v1836_v60 }
0x12bf   :  { %v1963_v61 = vpop.xlane.xlu0 %1962 }
0x12c0   :  { %3709 = vrcp.f32 %v1963_v61 }
0x12c6   :  { %v3710_v54 = vpop.eup %3709 }
0x12c7   :  { %v1969_v4 = vmul.f32 %v3710_v54, %v3702_v38  ;;  %v3609_v54 = vld [vmem:[%s4390_s17] ss:$0 sm:$0xff] }
0x12ca   :  { %v1966_v62 = vpop.xlane.xlu1 %1965 }
0x12cb   :  { %3711 = vrcp.f32 %v1966_v62 }
0x12cf   :  { %v1860_v52 = vpop.f32.mrf.mxu1 }
0x12d1   :  { %v3712_v63 = vpop.eup %3711 }
0x12d2   :  { %v3568_v0 = vpop.permute.xlu0 %3567  ;;  %v1970_v5 = vmul.f32 %v3712_v63, %v3706_v56 }
0x12d3   :  { %v3570_v48 = vunpack.i.h.bf16 %v3568_v0  ;;  %v3569_v1 = vunpack.i.l.bf16 %v3568_v0 }
0x12d5   :  { %1992 = vmatpush.msra.mxu1 %v3569_v1  ;;  %2018 = vmatpush.msra.mxu2 %v3570_v48 }
0x12d6   :  { %3434 = vmatmul.msk.f32.vlgmr.msra.gmra.mxu1 %vm220_vm1, %v1969_v4  ;;  %3435 = vmatmul.msk.f32.vlgmr.msra.gmra.mxu2 %vm220_vm1, %v1970_v5 }
0x12d7   :  { %2186 = vmatpush.msrb.mxu1 %v2129_v45 }
0x12e4   :  { %v1886_v7 = vpop.f32.mrf.mxu2 }
0x1353   :  { %v1994_v10 = vpop.f32.mrf.mxu1 }
0x1354   :  { %2025 = vrot.lane.b32.xlu1 %v1994_v10, %s3784_s1 }
0x1359   :  { %v2020_v9 = vpop.f32.mrf.mxu2 }
0x135a   :  { %2027 = vrot.lane.b32.xlu2 %v2020_v9, %s3784_s1  ;;  %v2128_v9 = vld [vmem:[%s4407_s9 + $0x10] sm:$0xff] }
0x135b   :  { %2187 = vmatpush.msrb.mxu1 %v2128_v9 }
0x135d   :  { %2188 = vmatpush.msrb.mxu1 %v2127_v11 }
0x135f   :  { %2189 = vmatpush.msrb.mxu1 %v2126_v12  ;;  %v3614_v12 = vld [vmem:[%s4101_s10 + $0x1] ss:$0 sm:$0xff] }
0x13b4   :  { %v2028_v14 = vpop.permute.xlu2 %2027 }
0x13b5   :  { %v2032_v15 = vsel %vm220_vm1, %v1886_v7, %v2028_v14 }
0x13c6   :  { %v2026_v13 = vpop.permute.xlu1 %2025 }
0x13c7   :  { %v2031_v8 = vsel %vm220_vm1, %v1860_v52, %v2026_v13  ;;  %v3610_v13 = vld [vmem:[%s4395_s24] ss:$0 sm:$0xff] }
0x13c8   :  { %3436 = vmatmul.msk.f32.vlgmr.msrb.gmra.mxu3 %vm187_vm0, %v2031_v8 }
0x13d0   :  { %3437 = vmatmul.msk.f32.gmra.mxu3 %vm187_vm0, %v2032_v15 }
0x144b   :  { %v2059_v16 = vpop.f32.mrf.mxu3 }
0x144c   :  { %v2060_v19 = vadd.f32 %v3607_v18, %v2059_v16 }
0x144e   :  { %v2065_v21 = vadd.f32 %v2060_v19, %v4306_v46 }
0x1450   :  { %v2069_v23 = vsel %vm187_vm0, %v2065_v21, 0.0 }
0x1451   :  { %2070 = vadd.xlane.f32.xlu0 %v2069_v23 }
0x1453   :  { %v2062_v24 = vpop.f32.mrf.mxu3 }
0x1454   :  { %v2063_v36 = vadd.f32 %v3607_v18, %v2062_v24 }
0x1456   :  { %v2066_v25 = vadd.f32 %v2063_v36, %v4311_v57  ;;  %v2124_v57 = vld [vmem:[%s4400_s7 + $0x8] sm:$0xff] }
0x1457   :  { %2154 = vmatpush.msrb.mxu0 %v2124_v57 }
0x1458   :  { %v2072_v26 = vsel %vm187_vm0, %v2066_v25, 0.0 }
0x1459   :  { %2073 = vadd.xlane.f32.xlu2 %v2072_v26  ;;  %2155 = vmatpush.msrb.mxu0 %v2123_v37 }
0x14c4   :  { %v2071_v29 = vpop.xlane.xlu0 %2070 }
0x14c5   :  { %v2075_v27 = vmul.f32 %v2071_v29, %v3940_v43 }
0x14c7   :  { %v2077_v46 = vsub.f32 %v2065_v21, %v2075_v27  ;;  %v3611_v21 = vld [vmem:[%s4419_s27] ss:$0 sm:$0xff] }
0x14c9   :  { %v2079_v30 = vmul.f32 %v2077_v46, %v2077_v46 }
0x14cb   :  { %v2081_v31 = vsel %vm187_vm0, %v2079_v30, 0.0 }
0x14cc   :  { %v2074_v33 = vpop.xlane.xlu2 %2073  ;;  %2082 = vadd.xlane.f32.xlu1 %v2081_v31 }
0x14cd   :  { %v2076_v34 = vmul.f32 %v2074_v33, %v3940_v43 }
0x14cf   :  { %v2078_v35 = vsub.f32 %v2066_v25, %v2076_v34 }
0x14d1   :  { %v2080_v39 = vmul.f32 %v2078_v35, %v2078_v35 }
0x14d3   :  { %v2084_v40 = vsel %vm187_vm0, %v2080_v39, 0.0 }
0x14d4   :  { %2085 = vadd.xlane.f32.xlu0 %v2084_v40 }
0x153f   :  { %v2083_v41 = vpop.xlane.xlu1 %2082 }
0x1540   :  { %v2087_v42 = vmul.f32 %v2083_v41, %v3940_v43 }
0x1542   :  { %v2089_v38 = vadd.f32 1e-05, %v2087_v42  ;;  %v3443_v42 = vld [vmem:[%s4079_s25 + $0x18] sm:$0xff] }
0x1543   :  { %2288 = vmatpush.msrb.mxu2 %v3443_v42 }
0x1544   :  { %3713 = vrsqrt.f32 %v2089_v38  ;;  %vm2097_vm15 = vweird.f32 %v2089_v38 }
0x1547   :  { %v2086_v47 = vpop.xlane.xlu0 %2085 }
0x1548   :  { %v2088_v3 = vmul.f32 %v2086_v47, %v3940_v43 }
0x154a   :  { %v3714_v49 = vpop.eup %3713  ;;  %v2090_v51 = vadd.f32 1e-05, %v2088_v3 }
0x154b   :  { %v2092_v53 = vmul.f32 %v3714_v49, %v2089_v38  ;;  %vm2098_vm14 = vweird.f32 %v3714_v49  ;;  %v3442_v38 = vld [vmem:[%s4079_s25 + $0x10] sm:$0xff] }
0x154c   :  { %3715 = vrsqrt.f32 %v2090_v51  ;;  %vm2099_vm2 = vmor %vm2097_vm15, %vm2098_vm14  ;;  %vm2107_vm7 = vweird.f32 %v2090_v51  ;;  %2289 = vmatpush.msrb.mxu2 %v3442_v38 }
0x154d   :  { %v2093_v22 = vmul.f32 %v3714_v49, %v2092_v53 }
0x154f   :  { %v2094_v55 = vmul.f32 0.5, %v2093_v22 }
0x1551   :  { %v2095_v44 = vsub.f32 1.5, %v2094_v55 }
0x1552   :  { %v3716_v56 = vpop.eup %3715 }
0x1553   :  { %v2096_v6 = vmul.f32 %v3714_v49, %v2095_v44  ;;  %v2102_v58 = vmul.f32 %v3716_v56, %v2090_v51  ;;  %vm2108_vm4 = vweird.f32 %v3716_v56 }
0x1554   :  { %vm2109_vm8 = vmor %vm2107_vm7, %vm2108_vm4 }
0x1555   :  { %v2100_v60 = vsel %vm2099_vm2, %v3714_v49, %v2096_v6  ;;  %v2103_v61 = vmul.f32 %v3716_v56, %v2102_v58 }
0x1556   :  { %v2111_v62 = vmul.f32 %v2100_v60, %v2077_v46 }
0x1557   :  { %v2104_v63 = vmul.f32 0.5, %v2103_v61  ;;  %v3612_v61 = vld [vmem:[%s4432_s12] ss:$0 sm:$0xff] }
0x1558   :  { %v2116_v0 = vmul.f32 %v3608_v59, %v2111_v62 }
0x1559   :  { %v2105_v48 = vsub.f32 1.5, %v2104_v63 }
0x155a   :  { %v2121_v1 = vadd.f32 %v3609_v54, %v2116_v0  ;;  %v3613_v0 = vld [vmem:[%s4442_s19] ss:$0 sm:$0xff] }
0x155b   :  { %v2106_v4 = vmul.f32 %v3716_v56, %v2105_v48 }
0x155c   :  { %3438 = vmatmul.msk.f32.vlgmr.msrb.gmra.mxu0 %vm187_vm0, %v2121_v1 }
0x155d   :  { %v2110_v5 = vsel %vm2109_vm8, %v3716_v56, %v2106_v4 }
0x155e   :  { %v2112_v52 = vmul.f32 %v2110_v5, %v2078_v35 }
0x1560   :  { %v2117_v7 = vmul.f32 %v3608_v59, %v2112_v52 }
0x1562   :  { %v2122_v10 = vadd.f32 %v3609_v54, %v2117_v7 }
0x1564   :  { %3439 = vmatmul.msk.f32.gmra.mxu0 %vm187_vm0, %v2122_v10 }
0x15d9   :  { %v2157_v8 = vpop.f32.mrf.mxu0 }
0x15da   :  { %v2158_v14 = vadd.f32 %v3610_v13, %v2157_v8 }
0x15dc   :  { %v2163_v15 = vmax.f32 %v2158_v14, 0.0 }
0x15de   :  { %3440 = vmatmul.msk.f32.vlgmr.msrb.gmra.mxu1 %vm641_vm13, %v2163_v15 }
0x15e1   :  { %v2160_v18 = vpop.f32.mrf.mxu0 }
0x15e2   :  { %v2161_v16 = vadd.f32 %v3610_v13, %v2160_v18 }
0x15e4   :  { %v2164_v19 = vmax.f32 %v2161_v16, 0.0 }
0x15e6   :  { %3441 = vmatmul.msk.f32.gmra.mxu1 %vm641_vm13, %v2164_v19 }
0x165b   :  { %v2191_v23 = vpop.f32.mrf.mxu1 }
0x165c   :  { %v2192_v24 = vadd.f32 %v3611_v21, %v2191_v23 }
0x165e   :  { %v2197_v36 = vadd.f32 %v2192_v24, %v2121_v1 }
0x1660   :  { %v2201_v25 = vsel %vm187_vm0, %v2197_v36, 0.0 }
0x1661   :  { %2202 = vadd.xlane.f32.xlu2 %v2201_v25 }
0x1663   :  { %v2194_v26 = vpop.f32.mrf.mxu1 }
0x1664   :  { %v2195_v29 = vadd.f32 %v3611_v21, %v2194_v26 }
0x1666   :  { %v2198_v27 = vadd.f32 %v2195_v29, %v2122_v10 }
0x1668   :  { %v2204_v46 = vsel %vm187_vm0, %v2198_v27, 0.0 }
0x1669   :  { %2205 = vadd.xlane.f32.xlu0 %v2204_v46 }
0x16d4   :  { %v2203_v30 = vpop.xlane.xlu2 %2202 }
0x16d5   :  { %v2207_v31 = vmul.f32 %v2203_v30, %v3940_v43 }
0x16d7   :  { %v2209_v33 = vsub.f32 %v2197_v36, %v2207_v31 }
0x16d9   :  { %v2211_v34 = vmul.f32 %v2209_v33, %v2209_v33 }
0x16db   :  { %v2213_v35 = vsel %vm187_vm0, %v2211_v34, 0.0 }
0x16dc   :  { %2214 = vadd.xlane.f32.xlu1 %v2213_v35  ;;  %v2206_v39 = vpop.xlane.xlu0 %2205 }
0x16dd   :  { %v2208_v40 = vmul.f32 %v2206_v39, %v3940_v43 }
0x16df   :  { %v2210_v57 = vsub.f32 %v2198_v27, %v2208_v40 }
0x16e1   :  { %v2212_v37 = vmul.f32 %v2210_v57, %v2210_v57 }
0x16e3   :  { %v2216_v41 = vsel %vm187_vm0, %v2212_v37, 0.0 }
0x16e4   :  { %2217 = vadd.xlane.f32.xlu2 %v2216_v41 }
0x174f   :  { %v2215_v45 = vpop.xlane.xlu1 %2214 }
0x1750   :  { %v2219_v47 = vmul.f32 %v2215_v45, %v3940_v43 }
0x1752   :  { %v2221_v3 = vadd.f32 1e-05, %v2219_v47 }
0x1754   :  { %3717 = vrsqrt.f32 %v2221_v3  ;;  %vm2229_vm11 = vweird.f32 %v2221_v3 }
0x1757   :  { %v2218_v49 = vpop.xlane.xlu2 %2217 }
0x1758   :  { %v2220_v51 = vmul.f32 %v2218_v49, %v3940_v43 }
0x175a   :  { %v3718_v53 = vpop.eup %3717  ;;  %v2222_v22 = vadd.f32 1e-05, %v2220_v51 }
0x175b   :  { %v2224_v55 = vmul.f32 %v3718_v53, %v2221_v3  ;;  %vm2230_vm10 = vweird.f32 %v3718_v53 }
0x175c   :  { %3719 = vrsqrt.f32 %v2222_v22  ;;  %vm2231_vm12 = vmor %vm2229_vm11, %vm2230_vm10  ;;  %vm2239_vm15 = vweird.f32 %v2222_v22 }
0x175d   :  { %v2225_v44 = vmul.f32 %v3718_v53, %v2224_v55 }
0x175f   :  { %v2226_v56 = vmul.f32 0.5, %v2225_v44 }
0x1761   :  { %v2227_v6 = vsub.f32 1.5, %v2226_v56 }
0x1762   :  { %v3720_v58 = vpop.eup %3719 }
0x1763   :  { %v2228_v59 = vmul.f32 %v3718_v53, %v2227_v6  ;;  %v2234_v60 = vmul.f32 %v3720_v58, %v2222_v22  ;;  %vm2240_vm14 = vweird.f32 %v3720_v58 }
0x1764   :  { %vm2241_vm2 = vmor %vm2239_vm15, %vm2240_vm14 }
0x1765   :  { %v2232_v62 = vsel %vm2231_vm12, %v3718_v53, %v2228_v59  ;;  %v2235_v54 = vmul.f32 %v3720_v58, %v2234_v60 }
0x1766   :  { %v2243_v63 = vmul.f32 %v2232_v62, %v2209_v33 }
0x1767   :  { %v2236_v48 = vmul.f32 0.5, %v2235_v54 }
0x1768   :  { %v2248_v1 = vmul.f32 %v3612_v61, %v2243_v63 }
0x1769   :  { %v2237_v4 = vsub.f32 1.5, %v2236_v48 }
0x176a   :  { %v4450_v5 = vadd.f32 %v3613_v0, %v2248_v1 }
0x176b   :  { %v2238_v52 = vmul.f32 %v3720_v58, %v2237_v4 }
0x176c   :  { %3448 = vmatmul.msk.f32.vlgmr.msrb.gmra.mxu2 %vm187_vm0, %v4450_v5 }
0x176d   :  { %v2242_v7 = vsel %vm2241_vm2, %v3720_v58, %v2238_v52 }
0x176e   :  { %v2244_v10 = vmul.f32 %v2242_v7, %v2210_v57 }
0x1770   :  { %v2249_v9 = vmul.f32 %v3612_v61, %v2244_v10 }
0x1772   :  { %v4454_v11 = vadd.f32 %v3613_v0, %v2249_v9 }
0x1774   :  { %3449 = vmatmul.msk.f32.gmra.mxu2 %vm187_vm0, %v4454_v11 }
0x17ef   :  { %v2291_v13 = vpop.f32.mrf.mxu2 }
0x17f0   :  { %v4459_v8 = vadd.f32 %v3614_v12, %v2291_v13 }
0x17f2   :  { %2298 = vrot.lane.b32.xlu0 %v4459_v8, %s3776_s15  ;;  %2431 = vrot.lane.b32.xlu2 %v4459_v8, %s3775_s14 }
0x17f7   :  { %v2294_v14 = vpop.f32.mrf.mxu2 }
0x17f8   :  { %v4465_v15 = vadd.f32 %v3614_v12, %v2294_v14 }
0x17fa   :  { %2429 = vrot.lane.b32.xlu0 %v4459_v8, %s3777_s16  ;;  %2325 = vrot.lane.b32.xlu1 %v4465_v15, %s3776_s15  ;;  %v3571_v54 = vpack.i.bf16 %v4465_v15, %v4459_v8 }
0x1802   :  { %2459 = vrot.lane.b32.xlu0 %v4465_v15, %s3775_s14  ;;  %2457 = vrot.lane.b32.xlu1 %v4465_v15, %s3777_s16 }
0x184c   :  { %v2432_v16 = vpop.permute.xlu2 %2431 }
0x1864   :  { %v2299_v18 = vpop.permute.xlu0 %2298 }
0x1865   :  { %3450 = vmatpush.xpose.msk.msra.mxu3 %vm220_vm1, %v2299_v18 }
0x1868   :  { %3451 = vmatmul.msk.f32.vlgmr.msra.gmra.mxu3 %vm220_vm1, %v4459_v8 }
0x1869   :  { %3456 = vmatpush.xpose.msk.msrb.mxu3 %vm220_vm1, %v2432_v16 }
0x186c   :  { %v2326_v19 = vpop.permute.xlu1 %2325  ;;  %v2430_v21 = vpop.permute.xlu0 %2429 }
0x186d   :  { %3452 = vmatpush.xpose.msk.msra.mxu0 %vm220_vm1, %v2326_v19 }
0x1870   :  { %3453 = vmatmul.msk.f32.vlgmr.msra.gmra.mxu0 %vm220_vm1, %v4465_v15  ;;  %3457 = vmatmul.msk.f32.vlgmr.msrb.gmra.mxu3 %vm220_vm1, %v2430_v21 }
0x1874   :  { %v2460_v23 = vpop.permute.xlu0 %2459  ;;  %v2458_v24 = vpop.permute.xlu1 %2457 }
0x1875   :  { %3458 = vmatpush.xpose.msk.msrb.mxu0 %vm220_vm1, %v2460_v23 }
0x1878   :  { %3459 = vmatmul.msk.f32.vlgmr.msrb.gmra.mxu0 %vm220_vm1, %v2458_v24 }
0x18eb   :  { %v2321_v36 = vpop.f32.mrf.mxu3 }
0x18ec   :  { %v2351_v25 = vmul.f32 0.35355338, %v2321_v36 }
0x18ed   :  { %v2348_v26 = vpop.f32.mrf.mxu0 }
0x18ee   :  { %v2352_v29 = vmul.f32 0.35355338, %v2348_v26  ;;  %v2353_v27 = vsel %vm4155_vm6, -1e+09, %v2351_v25  ;;  %v3446_v26 = vld [vmem:[%s4213_s28 + $0x18] sm:$0xff] }
0x18ef   :  { %v2355_v46 = vsel %vm220_vm1, %v2353_v27, -inf  ;;  %2596 = vmatpush.msra.mxu3 %v3446_v26 }
0x18f0   :  { %2356 = vmax.xlane.f32.xlu2 %v2355_v46  ;;  %v2354_v30 = vsel %vm4177_vm9, -1e+09, %v2352_v29  ;;  %v3445_v29 = vld [vmem:[%s4213_s28 + $0x10] sm:$0xff]  ;;  %s3815_s28 = smov 36  }
0x18f1   :  { %v2358_v31 = vsel %vm220_vm1, %v2354_v30, -inf  ;;  %2597 = vmatpush.msra.mxu3 %v3445_v29 }
0x18f2   :  { %2359 = vmax.xlane.f32.xlu0 %v2358_v31 }
0x18f3   :  { %v2454_v33 = vpop.f32.mrf.mxu3 }
0x18f4   :  { %v2485_v34 = vmul.f32 0.35355338, %v2454_v33  ;;  %v3467_v33 = vld [vmem:[%s4255_s8 + $0x18] sm:$0xff] }
0x18f5   :  { %v2482_v35 = vpop.f32.mrf.mxu0  ;;  %2698 = vmatpush.msra.mxu0 %v3467_v33 }
0x18f6   :  { %v2486_v39 = vmul.f32 0.35355338, %v2482_v35  ;;  %v2487_v40 = vsel %vm4155_vm6, -1e+09, %v2485_v34  ;;  %v3466_v34 = vld [vmem:[%s4255_s8 + $0x10] sm:$0xff]  ;;  %s3345_s8 = sld [smem:[%s4658_s0 + %s3815_s28]]  }
0x18f7   :  { %v2489_v57 = vsel %vm220_vm1, %v2487_v40, -inf  ;;  %2699 = vmatpush.msra.mxu0 %v3466_v34  ;;  %v3615_v35 = vld [vmem:[%s4220_s13 + $0x1] ss:$0 sm:$0xff] }
0x18f8   :  { %2490 = vmax.xlane.f32.xlu1 %v2489_v57  ;;  %v2488_v37 = vsel %vm4177_vm9, -1e+09, %v2486_v39 }
0x18f9   :  { %v2492_v41 = vsel %vm220_vm1, %v2488_v37, -inf }
0x18fa   :  { %2493 = vmax.xlane.f32.xlu2 %v2492_v41 }
0x1963   :  { %v2357_v42 = vpop.xlane.xlu2 %2356 }
0x1964   :  { %v2361_v38 = vsub.f32 %v2353_v27, %v2357_v42 }
0x1965   :  { %v2360_v45 = vpop.xlane.xlu0 %2359 }
0x1966   :  { %v2363_v47 = vmul.f32 1.442695, %v2361_v38  ;;  %v2362_v3 = vsub.f32 %v2354_v30, %v2360_v45 }
0x1968   :  { %3721 = vpow2.f32 %v2363_v47  ;;  %v2365_v49 = vmul.f32 1.442695, %v2362_v3  ;;  %v3581_v47 = vpack.i.bf16 %v3466_v34, %v3467_v33 }
0x196a   :  { %3723 = vpow2.f32 %v2365_v49 }
0x196b   :  { %v2491_v51 = vpop.xlane.xlu1 %2490 }
0x196c   :  { %v2495_v50 = vsub.f32 %v2487_v40, %v2491_v51 }
0x196d   :  { %v2494_v53 = vpop.xlane.xlu2 %2493 }
0x196e   :  { %v3722_v22 = vpop.eup %3721  ;;  %v2497_v55 = vmul.f32 1.442695, %v2495_v50  ;;  %v2496_v44 = vsub.f32 %v2488_v37, %v2494_v53 }
0x196f   :  { %v2367_v17 = vsel %vm220_vm1, %v3722_v22, 0.0 }
0x1970   :  { %v3724_v56 = vpop.eup %3723  ;;  %3725 = vpow2.f32 %v2497_v55  ;;  %v2499_v6 = vmul.f32 1.442695, %v2496_v44  ;;  %2368 = vadd.xlane.f32.xlu2 %v2367_v17 }
0x1971   :  { %v2370_v58 = vsel %vm220_vm1, %v3724_v56, 0.0 }
0x1972   :  { %3727 = vpow2.f32 %v2499_v6  ;;  %2371 = vadd.xlane.f32.xlu0 %v2370_v58  ;;  %v3616_v58 = vld [vmem:[%s4274_s5 + $0x1] ss:$0 sm:$0xff] }
0x1976   :  { %v3726_v59 = vpop.eup %3725 }
0x1977   :  { %v2501_v60 = vsel %vm220_vm1, %v3726_v59, 0.0 }
0x1978   :  { %v3728_v61 = vpop.eup %3727  ;;  %2502 = vadd.xlane.f32.xlu1 %v2501_v60 }
0x1979   :  { %v2504_v62 = vsel %vm220_vm1, %v3728_v61, 0.0 }
0x197a   :  { %2505 = vadd.xlane.f32.xlu0 %v2504_v62 }
0x1988   :  { %3572 = vrot.lane.b32.xlu2 %v3571_v54, %s3780_s21 }
0x1991   :  { %3577 = vrot.lane.b32.xlu1 %v3571_v54, %s3781_s22  ;;  %s3814_s22 = smov 34  }
0x1992   :  { %s3343_s10 = sld [smem:[%s4658_s0 + %s3814_s22]]  }
0x19e3   :  { %v2369_v63 = vpop.xlane.xlu2 %2368 }
0x19e4   :  { %3729 = vrcp.f32 %v2369_v63 }
0x19e5   :  { %v2372_v0 = vpop.xlane.xlu0 %2371 }
0x19e6   :  { %3731 = vrcp.f32 %v2372_v0 }
0x19ea   :  { %v3730_v48 = vpop.eup %3729 }
0x19eb   :  { %v3573_v1 = vpop.permute.xlu2 %3572  ;;  %v2375_v10 = vmul.f32 %v3730_v48, %v3722_v22  ;;  %v2503_v12 = vpop.xlane.xlu1 %2502 }
0x19ec   :  { %v3732_v4 = vpop.eup %3731  ;;  %v3575_v52 = vunpack.i.h.bf16 %v3573_v1  ;;  %v3574_v7 = vunpack.i.l.bf16 %v3573_v1  ;;  %3733 = vrcp.f32 %v2503_v12 }
0x19ed   :  { %v2376_v9 = vmul.f32 %v3732_v4, %v3724_v56  ;;  %v2506_v13 = vpop.xlane.xlu0 %2505 }
0x19ee   :  { %2398 = vmatpush.msra.mxu1 %v3574_v7  ;;  %2424 = vmatpush.msra.mxu2 %v3575_v52  ;;  %3735 = vrcp.f32 %v2506_v13 }
0x19ef   :  { %3454 = vmatmul.msk.f32.vlgmr.msra.gmra.mxu1 %vm220_vm1, %v2375_v10  ;;  %3455 = vmatmul.msk.f32.vlgmr.msra.gmra.mxu2 %vm220_vm1, %v2376_v9  ;;  %v3617_v10 = vld [vmem:[%s4250_s2 + $0x1] ss:$0 sm:$0xff] }
0x19f2   :  { %v3734_v8 = vpop.eup %3733 }
0x19f3   :  { %v2509_v19 = vmul.f32 %v3734_v8, %v3726_v59  ;;  %v3618_v8 = vld [vmem:[%s4268_s18 + $0x1] ss:$0 sm:$0xff] }
0x19f4   :  { %v3736_v14 = vpop.eup %3735 }
0x19f5   :  { %v2510_v21 = vmul.f32 %v3736_v14, %v3728_v61 }
0x1a03   :  { %v3578_v15 = vpop.permute.xlu1 %3577 }
0x1a04   :  { %v3580_v18 = vunpack.i.h.bf16 %v3578_v15  ;;  %v3579_v16 = vunpack.i.l.bf16 %v3578_v15 }
0x1a06   :  { %2532 = vmatpush.msrb.mxu1 %v3579_v16  ;;  %2558 = vmatpush.msrb.mxu2 %v3580_v18 }
0x1a07   :  { %3460 = vmatmul.msk.f32.vlgmr.msrb.gmra.mxu1 %vm220_vm1, %v2509_v19  ;;  %3461 = vmatmul.msk.f32.vlgmr.msrb.gmra.mxu2 %vm220_vm1, %v2510_v21 }
0x1a6c   :  { %v2400_v23 = vpop.f32.mrf.mxu1 }
0x1a72   :  { %v2426_v24 = vpop.f32.mrf.mxu2 }
0x1a84   :  { %v2534_v36 = vpop.f32.mrf.mxu1 }
0x1a85   :  { %2565 = vrot.lane.b32.xlu0 %v2534_v36, %s3784_s1 }
0x1a8a   :  { %v2560_v25 = vpop.f32.mrf.mxu2 }
0x1a8b   :  { %2567 = vrot.lane.b32.xlu2 %v2560_v25, %s3784_s1 }
0x1ae5   :  { %v2568_v30 = vpop.permute.xlu2 %2567 }
0x1ae6   :  { %v2572_v31 = vsel %vm220_vm1, %v2426_v24, %v2568_v30 }
0x1af7   :  { %v2566_v27 = vpop.permute.xlu0 %2565 }
0x1af8   :  { %v2571_v46 = vsel %vm220_vm1, %v2400_v23, %v2566_v27 }
0x1af9   :  { %3462 = vmatmul.msk.f32.vlgmr.msra.gmra.mxu3 %vm187_vm0, %v2571_v46 }
0x1b01   :  { %3463 = vmatmul.msk.f32.gmra.mxu3 %vm187_vm0, %v2572_v31 }
0x1b7c   :  { %v2599_v39 = vpop.f32.mrf.mxu3 }
0x1b7d   :  { %v2600_v40 = vadd.f32 %v3615_v35, %v2599_v39 }
0x1b7f   :  { %v2605_v57 = vadd.f32 %v2600_v40, %v4450_v5 }
0x1b81   :  { %v2611_v37 = vsel %vm187_vm0, %v2605_v57, 0.0 }
0x1b82   :  { %2612 = vadd.xlane.f32.xlu1 %v2611_v37 }
0x1b84   :  { %v2602_v41 = vpop.f32.mrf.mxu3 }
0x1b85   :  { %v2603_v42 = vadd.f32 %v3615_v35, %v2602_v41 }
0x1b87   :  { %v2606_v38 = vadd.f32 %v2603_v42, %v4454_v11 }
0x1b89   :  { %v2614_v45 = vsel %vm187_vm0, %v2606_v38, 0.0 }
0x1b8a   :  { %2615 = vadd.xlane.f32.xlu0 %v2614_v45 }
0x1b9e   :  { %3582 = vrot.lane.b32.xlu0 %v3581_v47, %s3776_s15 }
0x1bf5   :  { %v2613_v3 = vpop.xlane.xlu1 %2612 }
0x1bf6   :  { %v2617_v49 = vmul.f32 %v2613_v3, %v3940_v43 }
0x1bf8   :  { %v2619_v51 = vsub.f32 %v2605_v57, %v2617_v49 }
0x1bfa   :  { %v2621_v50 = vmul.f32 %v2619_v51, %v2619_v51 }
0x1bfc   :  { %v2623_v5 = vsel %vm187_vm0, %v2621_v50, 0.0 }
0x1bfd   :  { %v2616_v53 = vpop.xlane.xlu0 %2615  ;;  %2624 = vadd.xlane.f32.xlu2 %v2623_v5 }
0x1bfe   :  { %v2618_v22 = vmul.f32 %v2616_v53, %v3940_v43 }
0x1c00   :  { %v2620_v55 = vsub.f32 %v2606_v38, %v2618_v22 }
0x1c02   :  { %v2622_v11 = vmul.f32 %v2620_v55, %v2620_v55 }
0x1c04   :  { %v2626_v44 = vsel %vm187_vm0, %v2622_v11, 0.0 }
0x1c05   :  { %2627 = vadd.xlane.f32.xlu1 %v2626_v44 }
0x1c10   :  { %v3583_v17 = vpop.permute.xlu0 %3582 }
0x1c11   :  { %v3585_v56 = vunpack.i.h.bf16 %v3583_v17  ;;  %v3584_v6 = vunpack.i.l.bf16 %v3583_v17 }
0x1c13   :  { %2732 = vmatpush.msra.mxu1 %v3584_v6 }
0x1c15   :  { %2733 = vmatpush.msra.mxu1 %v3585_v56  ;;  %2715 = vrot.lane.b32.xlu2 %v3616_v58, %s3776_s15 }
0x1c16   :  { %3474 = vmatmul.msk.f32.vlgmr.msra.gmra.mxu1 %vm187_vm0, %v4293_v28 }
0x1c1e   :  { %3475 = vmatmul.msk.f32.gmra.mxu1 %vm187_vm0, %v4299_v2 }
0x1c70   :  { %v2625_v59 = vpop.xlane.xlu2 %2624 }
0x1c71   :  { %v2629_v60 = vmul.f32 %v2625_v59, %v3940_v43 }
0x1c73   :  { %v2631_v61 = vadd.f32 1e-05, %v2629_v60 }
0x1c75   :  { %3737 = vrsqrt.f32 %v2631_v61  ;;  %vm2639_vm9 = vweird.f32 %v2631_v61 }
0x1c78   :  { %v2628_v62 = vpop.xlane.xlu1 %2627  ;;  %v2716_v24 = vpop.permute.xlu2 %2715 }
0x1c79   :  { %v2630_v54 = vmul.f32 %v2628_v62, %v3940_v43 }
0x1c7b   :  { %v3738_v63 = vpop.eup %3737  ;;  %v2632_v0 = vadd.f32 1e-05, %v2630_v54 }
0x1c7c   :  { %v2634_v48 = vmul.f32 %v3738_v63, %v2631_v61  ;;  %vm2640_vm6 = vweird.f32 %v3738_v63 }
0x1c7d   :  { %3739 = vrsqrt.f32 %v2632_v0  ;;  %vm2641_vm4 = vmor %vm2639_vm9, %vm2640_vm6  ;;  %vm2649_vm8 = vweird.f32 %v2632_v0 }
0x1c7e   :  { %v2635_v1 = vmul.f32 %v3738_v63, %v2634_v48 }
0x1c80   :  { %v2636_v4 = vmul.f32 0.5, %v2635_v1 }
0x1c82   :  { %v2637_v28 = vsub.f32 1.5, %v2636_v4 }
0x1c83   :  { %v3740_v52 = vpop.eup %3739 }
0x1c84   :  { %v2638_v2 = vmul.f32 %v3738_v63, %v2637_v28  ;;  %v2644_v7 = vmul.f32 %v3740_v52, %v2632_v0  ;;  %vm2650_vm7 = vweird.f32 %v3740_v52 }
0x1c85   :  { %vm2651_vm10 = vmor %vm2649_vm8, %vm2650_vm7 }
0x1c86   :  { %v2642_v9 = vsel %vm2641_vm4, %v3738_v63, %v2638_v2  ;;  %v2645_v12 = vmul.f32 %v3740_v52, %v2644_v7 }
0x1c87   :  { %v2653_v13 = vmul.f32 %v2642_v9, %v2619_v51 }
0x1c88   :  { %v2646_v14 = vmul.f32 0.5, %v2645_v12 }
0x1c89   :  { %v2658_v15 = vmul.f32 %v3617_v10, %v2653_v13 }
0x1c8a   :  { %v2647_v18 = vsub.f32 1.5, %v2646_v14 }
0x1c8b   :  { %v4539_v16 = vadd.f32 %v3618_v8, %v2658_v15 }
0x1c8c   :  { %v2648_v19 = vmul.f32 %v3740_v52, %v2647_v18 }
0x1c8d   :  { %3472 = vmatmul.msk.f32.vlgmr.msra.gmra.mxu0 %vm187_vm0, %v4539_v16 }
0x1c8e   :  { %v2652_v21 = vsel %vm2651_vm10, %v3740_v52, %v2648_v19 }
0x1c8f   :  { %v2654_v23 = vmul.f32 %v2652_v21, %v2620_v55 }
0x1c91   :  { %v2659_v36 = vmul.f32 %v3617_v10, %v2654_v23 }
0x1c93   :  { %v2735_v25 = vpop.f32.mrf.mxu1  ;;  %v4543_v26 = vadd.f32 %v3618_v8, %v2659_v36 }
0x1c94   :  { %v4545_v29 = vadd.f32 %v2735_v25, %v2716_v24 }
0x1c95   :  { %3473 = vmatmul.msk.f32.gmra.mxu0 %vm187_vm0, %v4543_v26 }
0x1c96   :  { %2873 = vrot.lane.b32.xlu1 %v4545_v29, %s3777_s16  ;;  %3476 = vmatpush.xpose.msk.msra.mxu2 %vm220_vm1, %v4545_v29 }
0x1c9b   :  { %v2738_v27 = vpop.f32.mrf.mxu1 }
0x1c9c   :  { %v4553_v46 = vadd.f32 %v2738_v27, %v2716_v24 }
0x1c9e   :  { %2901 = vrot.lane.b32.xlu2 %v4553_v46, %s3777_s16  ;;  %3478 = vmatpush.xpose.msk.msrb.mxu2 %vm220_vm1, %v4553_v46 }
0x1cf8   :  { %v2902_v34 = vpop.permute.xlu2 %2901 }
0x1d08   :  { %v2874_v30 = vpop.permute.xlu1 %2873 }
0x1d09   :  { %3482 = vmatpush.xpose.msk.msrb.mxu1 %vm220_vm1, %v2874_v30 }
0x1d0a   :  { %v2701_v31 = vpop.f32.mrf.mxu0 }
0x1d0b   :  { %v2702_v33 = vadd.f32 %v3616_v58, %v2701_v31 }
0x1d0d   :  { %2871 = vrot.lane.b32.xlu0 %v2702_v33, %s3777_s16  ;;  %3477 = vmatmul.msk.f32.vlgmr.msra.gmra.mxu2 %vm220_vm1, %v2702_v33 }
0x1d0e   :  { %3484 = vmatpush.xpose.msk.msra.mxu2 %vm220_vm1, %v2902_v34 }
0x1d12   :  { %v2704_v35 = vpop.f32.mrf.mxu0 }
0x1d13   :  { %v2705_v39 = vadd.f32 %v3616_v58, %v2704_v35  ;;  %v3469_v35 = vld [vmem:[%s4365_s3 + $0x10] sm:$0xff] }
0x1d15   :  { %2899 = vrot.lane.b32.xlu0 %v2705_v39, %s3777_s16  ;;  %3479 = vmatmul.msk.f32.vlgmr.msrb.gmra.mxu2 %vm220_vm1, %v2705_v39 }
0x1d7f   :  { %v2872_v40 = vpop.permute.xlu0 %2871 }
0x1d80   :  { %3483 = vmatmul.msk.f32.vlgmr.msrb.gmra.mxu1 %vm220_vm1, %v2872_v40 }
0x1d87   :  { %v2900_v57 = vpop.permute.xlu0 %2899 }
0x1d88   :  { %3485 = vmatmul.msk.f32.vlgmr.msra.gmra.mxu2 %vm220_vm1, %v2900_v57 }
0x1d90   :  { %v2764_v37 = vpop.f32.mrf.mxu2 }
0x1d91   :  { %v2793_v41 = vmul.f32 0.35355338, %v2764_v37 }
0x1d93   :  { %v2795_v42 = vsel %vm3875_vm3, -1e+09, %v2793_v41  ;;  %v3619_v41 = vld [vmem:[%s4358_s6 + $0x1] ss:$0 sm:$0xff] }
0x1d94   :  { %v2797_v38 = vsel %vm220_vm1, %v2795_v42, -inf }
0x1d95   :  { %2798 = vmax.xlane.f32.xlu1 %v2797_v38 }
0x1d98   :  { %v2790_v45 = vpop.f32.mrf.mxu2 }
0x1d99   :  { %v2794_v47 = vmul.f32 0.35355338, %v2790_v45 }
0x1d9b   :  { %v2796_v3 = vsel %vm3886_vm5, -1e+09, %v2794_v47 }
0x1d9c   :  { %v2800_v49 = vsel %vm220_vm1, %v2796_v3, -inf }
0x1d9d   :  { %2801 = vmax.xlane.f32.xlu0 %v2800_v49 }
0x1dfd   :  { %v2896_v51 = vpop.f32.mrf.mxu1 }
0x1dfe   :  { %v2927_v50 = vmul.f32 0.35355338, %v2896_v51 }
0x1e00   :  { %v2929_v5 = vsel %vm3875_vm3, -1e+09, %v2927_v50 }
0x1e01   :  { %v2931_v53 = vsel %vm220_vm1, %v2929_v5, -inf }
0x1e02   :  { %2932 = vmax.xlane.f32.xlu2 %v2931_v53 }
0x1e08   :  { %v2799_v22 = vpop.xlane.xlu1 %2798 }
0x1e09   :  { %v2803_v55 = vsub.f32 %v2795_v42, %v2799_v22 }
0x1e0b   :  { %v2805_v11 = vmul.f32 1.442695, %v2803_v55  ;;  %v2924_v44 = vpop.f32.mrf.mxu2 }
0x1e0c   :  { %v2928_v17 = vmul.f32 0.35355338, %v2924_v44 }
0x1e0d   :  { %3741 = vpow2.f32 %v2805_v11 }
0x1e0e   :  { %v2930_v56 = vsel %vm3886_vm5, -1e+09, %v2928_v17 }
0x1e0f   :  { %v2934_v6 = vsel %vm220_vm1, %v2930_v56, -inf }
0x1e10   :  { %2935 = vmax.xlane.f32.xlu1 %v2934_v6  ;;  %v2802_v58 = vpop.xlane.xlu0 %2801  ;;  %v3493_v6 = vld [vmem:[%s4400_s7 + $0x18] sm:$0xff] }
0x1e11   :  { %v2804_v59 = vsub.f32 %v2796_v3, %v2802_v58  ;;  %3142 = vmatpush.msrb.mxu2 %v3493_v6  ;;  %v3492_v58 = vld [vmem:[%s4400_s7 + $0x10] sm:$0xff] }
0x1e13   :  { %v3742_v60 = vpop.eup %3741  ;;  %v2807_v20 = vmul.f32 1.442695, %v2804_v59  ;;  %3143 = vmatpush.msrb.mxu2 %v3492_v58 }
0x1e14   :  { %v2809_v61 = vsel %vm220_vm1, %v3742_v60, 0.0 }
0x1e15   :  { %3743 = vpow2.f32 %v2807_v20  ;;  %2810 = vadd.xlane.f32.xlu2 %v2809_v61  ;;  %v3498_v61 = vld [vmem:[%s4407_s9 + $0x38] sm:$0xff] }
0x1e1b   :  { %v3744_v62 = vpop.eup %3743 }
0x1e1c   :  { %v2812_v54 = vsel %vm220_vm1, %v3744_v62, 0.0 }
0x1e1d   :  { %2813 = vadd.xlane.f32.xlu2 %v2812_v54 }
0x1e29   :  { %2819 = vrot.lane.b32.xlu1 %v4545_v29, %s3776_s15 }
0x1e31   :  { %2979 = vrot.lane.b32.xlu1 %v4553_v46, %s3775_s14 }
0x1e75   :  { %v2933_v32 = vpop.xlane.xlu2 %2932 }
0x1e76   :  { %v2937_v63 = vsub.f32 %v2929_v5, %v2933_v32 }
0x1e78   :  { %v2939_v0 = vmul.f32 1.442695, %v2937_v63 }
0x1e7a   :  { %3745 = vpow2.f32 %v2939_v0 }
0x1e80   :  { %v3746_v48 = vpop.eup %3745 }
0x1e81   :  { %v2943_v1 = vsel %vm220_vm1, %v3746_v48, 0.0 }
0x1e82   :  { %2944 = vadd.xlane.f32.xlu0 %v2943_v1 }
0x1e83   :  { %v2936_v4 = vpop.xlane.xlu1 %2935 }
0x1e84   :  { %v2938_v28 = vsub.f32 %v2930_v56, %v2936_v4 }
0x1e86   :  { %v2941_v52 = vmul.f32 1.442695, %v2938_v28 }
0x1e88   :  { %3747 = vpow2.f32 %v2941_v52  ;;  %v2811_v7 = vpop.xlane.xlu2 %2810 }
0x1e89   :  { %3749 = vrcp.f32 %v2811_v7  ;;  %v3620_v7 = vld [vmem:[%s4379_s23 + $0x1] ss:$0 sm:$0xff] }
0x1e8e   :  { %v3748_v2 = vpop.eup %3747 }
0x1e8f   :  { %v2946_v10 = vsel %vm220_vm1, %v3748_v2, 0.0  ;;  %v3750_v9 = vpop.eup %3749 }
0x1e90   :  { %2947 = vadd.xlane.f32.xlu2 %v2946_v10  ;;  %v2817_v12 = vmul.f32 %v3750_v9, %v3742_v60  ;;  %v2814_v8 = vpop.xlane.xlu2 %2813 }
0x1e96   :  { %2953 = vrot.lane.b32.xlu0 %v4545_v29, %s3775_s14  ;;  %s3813_s14 = smov 35  }
0x1e97   :  { %s4637_s21 = sld [smem:[%s4658_s0 + %s3813_s14]]  }
0x1e9b   :  { %v2820_v13 = vpop.permute.xlu1 %2819 }
0x1e9c   :  { %2840 = vmatpush.msrb.mxu3 %v2820_v13  ;;  %v3621_v13 = vld [vmem:[%s4390_s17 + $0x1] ss:$0 sm:$0xff] }
0x1e9d   :  { %3480 = vmatmul.msk.f32.vlgmr.msrb.gmra.mxu3 %vm220_vm1, %v2817_v12 }
0x1ea3   :  { %v2980_v25 = vpop.permute.xlu1 %2979 }
0x1ea8   :  { %2845 = vrot.lane.b32.xlu2 %v4553_v46, %s3776_s15  ;;  %v3470_v46 = vld [vmem:[%s4365_s3 + $0x18] sm:$0xff] }
0x1ea9   :  { %3038 = vmatpush.msra.mxu1 %v3470_v46  ;;  %v3622_v46 = vld [vmem:[%s4395_s24 + $0x1] ss:$0 sm:$0xff] }
0x1eab   :  { %3039 = vmatpush.msra.mxu1 %v3469_v35 }
0x1ef5   :  { %v2945_v14 = vpop.xlane.xlu0 %2944 }
0x1ef6   :  { %3751 = vrcp.f32 %v2945_v14 }
0x1ef7   :  { %3753 = vrcp.f32 %v2814_v8 }
0x1efc   :  { %v3752_v18 = vpop.eup %3751 }
0x1efd   :  { %v3754_v19 = vpop.eup %3753  ;;  %v2951_v21 = vmul.f32 %v3752_v18, %v3746_v48 }
0x1efe   :  { %v2818_v24 = vmul.f32 %v3754_v19, %v3744_v62 }
0x1f03   :  { %v2948_v15 = vpop.xlane.xlu2 %2947 }
0x1f04   :  { %3755 = vrcp.f32 %v2948_v15 }
0x1f08   :  { %v2954_v23 = vpop.permute.xlu0 %2953 }
0x1f09   :  { %2974 = vmatpush.msra.mxu3 %v2954_v23 }
0x1f0a   :  { %3486 = vmatmul.msk.f32.vlgmr.msra.gmra.mxu3 %vm220_vm1, %v2951_v21  ;;  %v3756_v29 = vpop.eup %3755 }
0x1f0b   :  { %v2846_v36 = vpop.permute.xlu2 %2845  ;;  %v2952_v27 = vmul.f32 %v3756_v29, %v3748_v2  ;;  %3174 = vmatpush.msrb.mxu3 %v3498_v61  ;;  %v3496_v29 = vld [vmem:[%s4407_s9 + $0x28] sm:$0xff] }
0x1f0c   :  { %2866 = vmatpush.msrb.mxu0 %v2846_v36 }
0x1f0d   :  { %3481 = vmatmul.msk.f32.vlgmr.msrb.gmra.mxu0 %vm220_vm1, %v2818_v24 }
0x1f0e   :  { %3000 = vmatpush.msra.mxu0 %v2980_v25  ;;  %v3497_v25 = vld [vmem:[%s4407_s9 + $0x30] sm:$0xff] }
0x1f0f   :  { %3175 = vmatpush.msrb.mxu3 %v3497_v25 }
0x1f11   :  { %3176 = vmatpush.msrb.mxu3 %v3496_v29 }
0x1f15   :  { %3487 = vmatmul.msk.f32.vlgmr.msra.gmra.mxu0 %vm220_vm1, %v2952_v27  ;;  %v3495_v27 = vld [vmem:[%s4407_s9 + $0x20] sm:$0xff] }
0x1f16   :  { %3177 = vmatpush.msrb.mxu3 %v3495_v27 }
0x1f20   :  { %v2842_v30 = vpop.f32.mrf.mxu3 }
0x1f8a   :  { %v2868_v31 = vpop.f32.mrf.mxu0 }
0x1f8d   :  { %v2976_v33 = vpop.f32.mrf.mxu3 }
0x1f8e   :  { %3007 = vrot.lane.b32.xlu0 %v2976_v33, %s3784_s1 }
0x1f92   :  { %v3002_v34 = vpop.f32.mrf.mxu0 }
0x1f93   :  { %3009 = vrot.lane.b32.xlu1 %v3002_v34, %s3784_s1 }
0x2000   :  { %v3008_v39 = vpop.permute.xlu0 %3007 }
0x2001   :  { %v3013_v40 = vsel %vm220_vm1, %v2842_v30, %v3008_v39 }
0x2002   :  { %3488 = vmatmul.msk.f32.vlgmr.msra.gmra.mxu1 %vm187_vm0, %v3013_v40  ;;  %v3623_v40 = vld [vmem:[%s4419_s27 + $0x1] ss:$0 sm:$0xff] }
0x2005   :  { %v3010_v57 = vpop.permute.xlu1 %3009 }
0x2006   :  { %v3014_v37 = vsel %vm220_vm1, %v2868_v31, %v3010_v57 }
0x200a   :  { %3489 = vmatmul.msk.f32.gmra.mxu1 %vm187_vm0, %v3014_v37 }
0x207f   :  { %v3041_v42 = vpop.f32.mrf.mxu1 }
0x2080   :  { %v3042_v38 = vadd.f32 %v3619_v41, %v3041_v42 }
0x2082   :  { %v3047_v45 = vadd.f32 %v3042_v38, %v4539_v16 }
0x2084   :  { %v3053_v47 = vsel %vm187_vm0, %v3047_v45, 0.0 }
0x2085   :  { %3054 = vadd.xlane.f32.xlu0 %v3053_v47 }
0x2087   :  { %v3044_v3 = vpop.f32.mrf.mxu1 }
0x2088   :  { %v3045_v49 = vadd.f32 %v3619_v41, %v3044_v3 }
0x208a   :  { %v3048_v51 = vadd.f32 %v3045_v49, %v4543_v26 }
0x208c   :  { %v3056_v50 = vsel %vm187_vm0, %v3048_v51, 0.0 }
0x208d   :  { %3057 = vadd.xlane.f32.xlu1 %v3056_v50 }
0x20f8   :  { %v3055_v5 = vpop.xlane.xlu0 %3054 }
0x20f9   :  { %v3059_v53 = vmul.f32 %v3055_v5, %v3940_v43 }
0x20fb   :  { %v3061_v22 = vsub.f32 %v3047_v45, %v3059_v53 }
0x20fd   :  { %v3063_v55 = vmul.f32 %v3061_v22, %v3061_v22 }
0x20ff   :  { %v3065_v11 = vsel %vm187_vm0, %v3063_v55, 0.0 }
0x2100   :  { %3066 = vadd.xlane.f32.xlu2 %v3065_v11  ;;  %v3058_v16 = vpop.xlane.xlu1 %3057 }
0x2101   :  { %v3060_v44 = vmul.f32 %v3058_v16, %v3940_v43 }
0x2103   :  { %v3062_v17 = vsub.f32 %v3048_v51, %v3060_v44 }
0x2105   :  { %v3064_v56 = vmul.f32 %v3062_v17, %v3062_v17 }
0x2107   :  { %v3068_v26 = vsel %vm187_vm0, %v3064_v56, 0.0  ;;  %v3245_v56 = vld [vmem:[%s3343_s10] sm:$0xff] }
0x2108   :  { %3069 = vadd.xlane.f32.xlu0 %v3068_v26 }
0x2173   :  { %v3067_v59 = vpop.xlane.xlu2 %3066 }
0x2174   :  { %v3071_v60 = vmul.f32 %v3067_v59, %v3940_v43 }
0x2176   :  { %v3073_v20 = vadd.f32 1e-05, %v3071_v60 }
0x2178   :  { %3757 = vrsqrt.f32 %v3073_v20  ;;  %vm3081_vm3 = vweird.f32 %v3073_v20 }
0x217b   :  { %v3070_v62 = vpop.xlane.xlu0 %3069 }
0x217c   :  { %v3072_v54 = vmul.f32 %v3070_v62, %v3940_v43 }
0x217e   :  { %v3758_v32 = vpop.eup %3757  ;;  %v3074_v63 = vadd.f32 1e-05, %v3072_v54 }
0x217f   :  { %v3076_v0 = vmul.f32 %v3758_v32, %v3073_v20  ;;  %vm3082_vm1 = vweird.f32 %v3758_v32 }
0x2180   :  { %3759 = vrsqrt.f32 %v3074_v63  ;;  %vm3083_vm5 = vmor %vm3081_vm3, %vm3082_vm1  ;;  %vm3091_vm12 = vweird.f32 %v3074_v63 }
0x2181   :  { %v3077_v48 = vmul.f32 %v3758_v32, %v3076_v0 }
0x2183   :  { %v3078_v1 = vmul.f32 0.5, %v3077_v48 }
0x2185   :  { %v3079_v4 = vsub.f32 1.5, %v3078_v1 }
0x2186   :  { %v3760_v28 = vpop.eup %3759 }
0x2187   :  { %v3080_v52 = vmul.f32 %v3758_v32, %v3079_v4  ;;  %v3086_v2 = vmul.f32 %v3760_v28, %v3074_v63  ;;  %vm3092_vm11 = vweird.f32 %v3760_v28  ;;  %v3624_v4 = vld [vmem:[%s4432_s12 + $0x1] ss:$0 sm:$0xff] }
0x2188   :  { %vm3093_vm14 = vmor %vm3091_vm12, %vm3092_vm11 }
0x2189   :  { %v3084_v10 = vsel %vm3083_vm5, %v3758_v32, %v3080_v52  ;;  %v3087_v9 = vmul.f32 %v3760_v28, %v3086_v2 }
0x218a   :  { %v3095_v12 = vmul.f32 %v3084_v10, %v3061_v22 }
0x218b   :  { %v3088_v8 = vmul.f32 0.5, %v3087_v9 }
0x218c   :  { %v3100_v14 = vmul.f32 %v3620_v7, %v3095_v12 }
0x218d   :  { %v3089_v15 = vsub.f32 1.5, %v3088_v8 }
0x218e   :  { %v3105_v18 = vadd.f32 %v3621_v13, %v3100_v14 }
0x218f   :  { %v3090_v19 = vmul.f32 %v3760_v28, %v3089_v15 }
0x2190   :  { %3500 = vmatmul.msk.f32.vlgmr.msrb.gmra.mxu2 %vm187_vm0, %v3105_v18 }
0x2191   :  { %v3094_v21 = vsel %vm3093_vm14, %v3760_v28, %v3090_v19  ;;  %v3626_v19 = vld [vmem:[%s4637_s21] ss:$0 sm:$0xff] }
0x2192   :  { %v3096_v23 = vmul.f32 %v3094_v21, %v3062_v17  ;;  %v3246_v17 = vld [vmem:[%s3343_s10 + $0x8] sm:$0xff] }
0x2193   :  { %3271 = vmatpush.msrb.mxu0 %v3246_v17 }
0x2194   :  { %v3101_v24 = vmul.f32 %v3620_v7, %v3096_v23 }
0x2195   :  { %3272 = vmatpush.msrb.mxu0 %v3245_v56 }
0x2196   :  { %v3106_v36 = vadd.f32 %v3621_v13, %v3101_v24 }
0x2198   :  { %3501 = vmatmul.msk.f32.gmra.mxu2 %vm187_vm0, %v3106_v36 }
0x2213   :  { %v3145_v30 = vpop.f32.mrf.mxu2 }
0x2214   :  { %v3146_v31 = vadd.f32 %v3622_v46, %v3145_v30 }
0x2216   :  { %v3151_v33 = vmax.f32 %v3146_v31, 0.0 }
0x2218   :  { %3502 = vmatmul.msk.f32.vlgmr.msrb.gmra.mxu3 %vm641_vm13, %v3151_v33 }
0x221b   :  { %v3148_v34 = vpop.f32.mrf.mxu2 }
0x221c   :  { %v3149_v35 = vadd.f32 %v3622_v46, %v3148_v34 }
0x221e   :  { %v3152_v39 = vmax.f32 %v3149_v35, 0.0 }
0x2220   :  { %3503 = vmatmul.msk.f32.gmra.mxu3 %vm641_vm13, %v3152_v39 }
0x229b   :  { %v3179_v57 = vpop.f32.mrf.mxu3 }
0x229c   :  { %v3180_v37 = vadd.f32 %v3623_v40, %v3179_v57 }
0x229e   :  { %v3185_v41 = vadd.f32 %v3180_v37, %v3105_v18 }
0x22a0   :  { %v3191_v42 = vsel %vm187_vm0, %v3185_v41, 0.0 }
0x22a1   :  { %3192 = vadd.xlane.f32.xlu1 %v3191_v42 }
0x22a3   :  { %v3182_v38 = vpop.f32.mrf.mxu3 }
0x22a4   :  { %v3183_v45 = vadd.f32 %v3623_v40, %v3182_v38 }
0x22a6   :  { %v3186_v47 = vadd.f32 %v3183_v45, %v3106_v36 }
0x22a8   :  { %v3194_v3 = vsel %vm187_vm0, %v3186_v47, 0.0 }
0x22a9   :  { %3195 = vadd.xlane.f32.xlu0 %v3194_v3 }
0x2314   :  { %v3193_v49 = vpop.xlane.xlu1 %3192 }
0x2315   :  { %v3197_v51 = vmul.f32 %v3193_v49, %v3940_v43 }
0x2317   :  { %v3199_v50 = vsub.f32 %v3185_v41, %v3197_v51 }
0x2319   :  { %v3201_v5 = vmul.f32 %v3199_v50, %v3199_v50 }
0x231b   :  { %v3203_v53 = vsel %vm187_vm0, %v3201_v5, 0.0 }
0x231c   :  { %v3196_v22 = vpop.xlane.xlu0 %3195  ;;  %3204 = vadd.xlane.f32.xlu2 %v3203_v53 }
0x231d   :  { %v3198_v55 = vmul.f32 %v3196_v22, %v3940_v43 }
0x231f   :  { %v3200_v11 = vsub.f32 %v3186_v47, %v3198_v55 }
0x2321   :  { %v3202_v16 = vmul.f32 %v3200_v11, %v3200_v11 }
0x2323   :  { %v3206_v44 = vsel %vm187_vm0, %v3202_v16, 0.0 }
0x2324   :  { %3207 = vadd.xlane.f32.xlu1 %v3206_v44 }
0x238f   :  { %v3205_v26 = vpop.xlane.xlu2 %3204 }
0x2390   :  { %v3209_v6 = vmul.f32 %v3205_v26, %v3940_v43 }
0x2392   :  { %v3211_v58 = vadd.f32 1e-05, %v3209_v6 }
0x2394   :  { %3761 = vrsqrt.f32 %v3211_v58  ;;  %vm3219_vm2 = vweird.f32 %v3211_v58 }
0x2397   :  { %v3208_v59 = vpop.xlane.xlu1 %3207 }
0x2398   :  { %v3210_v60 = vmul.f32 %v3208_v59, %v3940_v43  ;;  %v3625_v43 = vld [vmem:[%s4442_s19 + $0x1] ss:$0 sm:$0xff] }
0x239a   :  { %v3762_v20 = vpop.eup %3761  ;;  %v3212_v61 = vadd.f32 1e-05, %v3210_v60 }
0x239b   :  { %v3214_v62 = vmul.f32 %v3762_v20, %v3211_v58  ;;  %vm3220_vm15 = vweird.f32 %v3762_v20 }
0x239c   :  { %3763 = vrsqrt.f32 %v3212_v61  ;;  %vm3221_vm6 = vmor %vm3219_vm2, %vm3220_vm15  ;;  %vm3229_vm4 = vweird.f32 %v3212_v61 }
0x239d   :  { %v3215_v54 = vmul.f32 %v3762_v20, %v3214_v62 }
0x239f   :  { %v3216_v32 = vmul.f32 0.5, %v3215_v54 }
0x23a1   :  { %v3217_v63 = vsub.f32 1.5, %v3216_v32 }
0x23a2   :  { %v3764_v0 = vpop.eup %3763 }
0x23a3   :  { %v3218_v48 = vmul.f32 %v3762_v20, %v3217_v63  ;;  %v3224_v1 = vmul.f32 %v3764_v0, %v3212_v61  ;;  %vm3230_vm9 = vweird.f32 %v3764_v0 }
0x23a4   :  { %vm3231_vm7 = vmor %vm3229_vm4, %vm3230_vm9 }
0x23a5   :  { %v3222_v28 = vsel %vm3221_vm6, %v3762_v20, %v3218_v48  ;;  %v3225_v52 = vmul.f32 %v3764_v0, %v3224_v1 }
0x23a6   :  { %v3233_v2 = vmul.f32 %v3222_v28, %v3199_v50 }
0x23a7   :  { %v3226_v7 = vmul.f32 0.5, %v3225_v52 }
0x23a8   :  { %v3238_v10 = vmul.f32 %v3624_v4, %v3233_v2 }
0x23a9   :  { %v3227_v9 = vsub.f32 1.5, %v3226_v7 }
0x23aa   :  { %v3243_v12 = vadd.f32 %v3625_v43, %v3238_v10 }
0x23ab   :  { %v3228_v13 = vmul.f32 %v3764_v0, %v3227_v9 }
0x23ac   :  { %3506 = vmatmul.msk.f32.vlgmr.msrb.gmra.mxu0 %vm187_vm0, %v3243_v12 }
0x23ad   :  { %v3232_v8 = vsel %vm3231_vm7, %v3764_v0, %v3228_v13 }
0x23ae   :  { %v3234_v14 = vmul.f32 %v3232_v8, %v3200_v11 }
0x23b0   :  { %v3239_v15 = vmul.f32 %v3624_v4, %v3234_v14 }
0x23b2   :  { %v3244_v18 = vadd.f32 %v3625_v43, %v3239_v15 }
0x23b4   :  { %3507 = vmatmul.msk.f32.gmra.mxu0 %vm187_vm0, %v3244_v18 }
0x2429   :  { %v3274_v21 = vpop.f32.mrf.mxu0 }
0x242a   :  { %v3275_v23 = vadd.f32 %v3626_v19, %v3274_v21 }
0x242c   :  { %v3280_v24 = vsel %vm641_vm13, %v3275_v23, -inf }
0x242d   :  { %3281 = vmax.xlane.f32.xlu0 %v3280_v24 }
0x2431   :  { %v3277_v36 = vpop.f32.mrf.mxu0 }
0x2432   :  { %v3278_v25 = vadd.f32 %v3626_v19, %v3277_v36 }
0x2434   :  { %v3283_v29 = vsel %vm641_vm13, %v3278_v25, -inf }
0x2435   :  { %3284 = vmax.xlane.f32.xlu2 %v3283_v29 }
0x24a0   :  { %v3282_v27 = vpop.xlane.xlu0 %3281 }
0x24a1   :  { %v3286_v46 = vsub.f32 %v3275_v23, %v3282_v27 }
0x24a3   :  { %v3288_v30 = vmul.f32 1.442695, %v3286_v46 }
0x24a5   :  { %3765 = vpow2.f32 %v3288_v30 }
0x24a8   :  { %v3285_v31 = vpop.xlane.xlu2 %3284 }
0x24a9   :  { %v3287_v33 = vsub.f32 %v3278_v25, %v3285_v31 }
0x24ab   :  { %v3766_v34 = vpop.eup %3765  ;;  %v3290_v35 = vmul.f32 1.442695, %v3287_v33 }
0x24ac   :  { %v3292_v39 = vsel %vm641_vm13, %v3766_v34, 0.0 }
0x24ad   :  { %3767 = vpow2.f32 %v3290_v35  ;;  %3293 = vadd.xlane.f32.xlu1 %v3292_v39 }
0x24b3   :  { %v3768_v40 = vpop.eup %3767 }
0x24b4   :  { %v3295_v57 = vsel %vm641_vm13, %v3768_v40, 0.0 }
0x24b5   :  { %3296 = vadd.xlane.f32.xlu0 %v3295_v57 }
0x2520   :  { %v3294_v37 = vpop.xlane.xlu1 %3293 }
0x2521   :  { %3769 = vlog2.f32 %v3294_v37 }
0x2527   :  { %v3770_v41 = vpop.eup %3769 }
0x2528   :  { %v3299_v42 = vmul.f32 0.6931472, %v3770_v41  ;;  %v3297_v38 = vpop.xlane.xlu0 %3296 }
0x2529   :  { %3771 = vlog2.f32 %v3297_v38 }
0x252a   :  { %v3302_v45 = vsub.f32 %v3286_v46, %v3299_v42 }
0x252c   :  { %3304 = vst.msk [vmem:[%s3345_s8] sm:$0xff] %vm641_vm13, %v3302_v45 }
0x252f   :  { %v3772_v47 = vpop.eup %3771 }
0x2530   :  { %v3301_v3 = vmul.f32 0.6931472, %v3772_v47 }
0x2532   :  { %v3303_v49 = vsub.f32 %v3287_v33, %v3301_v3 }
0x2534   :  { %3305 = vst.msk [vmem:[%s3345_s8 + $0x8] sm:$0xff] %vm641_vm13, %v3303_v49 }

</bundles_post_ra>
